<compile_context>
chip_gen: v5e
topology: v5e:2x2
jax: 0.10.0
libtpu: 0.0.40
codegen_flags: <defaults>
</compile_context>

<pallas_src>
import jax
import jax.numpy as jnp
import numpy as np
from jax import lax
from jax.experimental import pallas as pl
from jax.experimental.pallas import tpu as pltpu  # noqa: F401  (kept for TPU-specific extensions)

# Module defaults (fixed by the PyTorch __init__ signature)
INPUT_SIZE = 3
HIDDEN_SIZE = 3
PROJ_SIZE = 1  # nn.LSTM proj_size == output_size


def lstm_kernel(x_ref, p_ref, out_ref):
    """Whole sequence in one invocation; h/c carried in registers.

    x_ref: (B, T, I) batch-first input.
    p_ref: (4, I+3, H) packed gate-major params:
           rows [0:I]  -> W_ih per gate (cell gate pre-scaled by 2)
           row  [I]    -> W_hh vector per gate (proj_size == 1)
           row  [I+1]  -> b_ih + b_hh per gate (cell gate pre-scaled by 2)
           row  [I+2]  -> gate 0 holds the projection weights W_hr
    out_ref: (B, P) projected hidden state of the last timestep.
    """
    B, T, I = x_ref.shape
    H = p_ref.shape[2]
    P = out_ref.shape[1]

    x_all = x_ref[...]             # (B, T, I)
    p = p_ref[...]                 # (4, I+3, H)
    w_ih = p[:, :I, :]             # (4, I, H)
    w_hh = p[:, I:I + 1, :]        # (4, 1, H)
    bias = p[:, I + 1:I + 2, :]    # (4, 1, H)
    w_hr = p[0:1, I + 2, :]        # (1, H)

    # ---- hoisted input contributions (off the recurrent critical path) ----
    # x_pre[g, b, t, h] = sum_i x[b, t, i] * W_ih[g, i, h] + b[g, h]
    x_pre = jnp.stack(
        [jnp.sum(x_all[:, :, :, None] * w_ih[g][None, None, :, :], axis=2)
         for g in range(4)],
        axis=0)                                    # (4, B, T, H)
    x_pre = x_pre + bias[:, None, :, :]            # broadcast (4,1,1,H)

    h = jnp.zeros((B, P), jnp.float32)   # projected hidden state (register-carried)
    c = jnp.zeros((B, H), jnp.float32)   # cell state            (register-carried)

    # T is small and static -> statically unrolled time loop: no per-step grid
    # overhead, static slices of x_pre, no VMEM carry traffic.
    for t in range(T):
        # All 4 gate pre-activations at once; the recurrent term is an outer
        # product (proj_size == 1), so no contraction sits on the h->h chain.
        pre = x_pre[:, :, t, :] + h[None, :, :] * w_hh          # (4, B, H)
        s = jax.nn.sigmoid(pre)                                  # one EUP op for all gates
        i_g, f_g, o_g = s[0], s[1], s[3]
        g_g = 2.0 * s[2] - 1.0            # tanh(z) = 2*sigmoid(2z) - 1 (weights pre-scaled)
        c = f_g * c + i_g * g_g                                  # (B, H)
        h_raw = o_g * jnp.tanh(c)                                # (B, H)
        # projection to proj_size = 1: the single lane-reduce per step
        h = jnp.sum(h_raw * w_hr, axis=1, keepdims=True)         # (B, 1)

    out_ref[...] = h.astype(out_ref.dtype)


def prepare_params(params):
    """One-time gate-major re-layout + packing of the (tiny) LSTM parameters.

    Call once at parameter-load time; the packed tensor is reused every forward.
    PyTorch packs gate rows as [i; f; g; o] along dim 0.
    """
    w_ih, w_hh, b_ih, b_hh, w_hr = params
    H, I, P = HIDDEN_SIZE, INPUT_SIZE, PROJ_SIZE

    w_ih_g = jnp.transpose(w_ih.reshape(4, H, I), (0, 2, 1))       # (4, I, H)
    # proj_size == 1 -> W_hh per gate is a single column; keep it as one row.
    w_hh_g = w_hh.reshape(4, H, P)[:, :, 0].reshape(4, 1, H)       # (4, 1, H)
    b_g = (b_ih + b_hh).reshape(4, 1, H)                           # (4, 1, H)

    # Pre-scale the cell gate (index 2) by 2 so the kernel can use
    # tanh(z) = 2*sigmoid(2z) - 1 and share one sigmoid across all gates.
    scale = jnp.array([1.0, 1.0, 2.0, 1.0], jnp.float32)[:, None, None]
    w_ih_g = w_ih_g * scale
    w_hh_g = w_hh_g * scale
    b_g = b_g * scale

    # Projection weights live in gate 0's slot of the last packed row.
    w_hr_row = jnp.zeros((4, 1, H), jnp.float32).at[0, 0, :].set(w_hr[0])

    # Single packed tensor -> one parameter DMA instead of five.
    packed = jnp.concatenate([w_ih_g, w_hh_g, b_g, w_hr_row], axis=1)  # (4, I+3, H)
    return packed


@jax.jit
def lstm_forward(x, packed_params):
    """x: (B, T, I) float32 (batch_first) -> (B, P) == lstm(x)[0][:, -1, :]."""
    B = x.shape[0]
    # No grid: single invocation, whole (tiny) arrays resident in VMEM.
    return pl.pallas_call(
        lstm_kernel,
        out_shape=jax.ShapeDtypeStruct((B, PROJ_SIZE), jnp.float32),
    )(x, packed_params)


def lstm_reference(x, params):
    """Pure-JAX reference of nn.LSTM(proj_size=P, batch_first=True) last step."""
    w_ih, w_hh, b_ih, b_hh, w_hr = params
    B, T, I = x.shape
    H, P = HIDDEN_SIZE, PROJ_SIZE
    b = b_ih + b_hh

    def step(carry, x_t):
        h, c = carry
        gates = x_t @ w_ih.T + h @ w_hh.T + b
        i_g = jax.nn.sigmoid(gates[:, 0:H])
        f_g = jax.nn.sigmoid(gates[:, H:2 * H])
        g_g = jnp.tanh(gates[:, 2 * H:3 * H])
        o_g = jax.nn.sigmoid(gates[:, 3 * H:4 * H])
        c_new = f_g * c + i_g * g_g
        h_new = (o_g * jnp.tanh(c_new)) @ w_hr.T
        return (h_new, c_new), h_new

    init = (jnp.zeros((B, P), jnp.float32), jnp.zeros((B, H), jnp.float32))
    _, outs = lax.scan(step, init, jnp.transpose(x, (1, 0, 2)))
    return outs[-1]


if __name__ == "__main__":
    key = jax.random.PRNGKey(0)
    k1, k2, k3, k4, k5, kx = jax.random.split(key, 6)
    H, I, P = HIDDEN_SIZE, INPUT_SIZE, PROJ_SIZE

    # PyTorch-style uniform(-1/sqrt(H), 1/sqrt(H)) init, deterministic.
    bound = 1.0 / (H ** 0.5)
    w_ih = jax.random.uniform(k1, (4 * H, I), jnp.float32, -bound, bound)  # weight_ih_l0
    w_hh = jax.random.uniform(k2, (4 * H, P), jnp.float32, -bound, bound)  # weight_hh_l0 (proj_size cols)
    b_ih = jax.random.uniform(k3, (4 * H,), jnp.float32, -bound, bound)    # bias_ih_l0
    b_hh = jax.random.uniform(k4, (4 * H,), jnp.float32, -bound, bound)    # bias_hh_l0
    w_hr = jax.random.uniform(k5, (P, H), jnp.float32, -bound, bound)      # weight_hr_l0
    params = (w_ih, w_hh, b_ih, b_hh, w_hr)

    B, T = 2, 8
    x = jax.random.normal(kx, (B, T, I), jnp.float32)   # (batch, seq, input_size)

    # One-time parameter re-layout (kept out of the per-call forward path).
    packed = jax.block_until_ready(prepare_params(params))

    out = jax.block_until_ready(lstm_forward(x, packed))
    ref = lstm_reference(x, params)

    assert out.shape == (B, P)
    np.testing.assert_allclose(np.asarray(out), np.asarray(ref), rtol=1e-5, atol=1e-5)
    # TODO(synk): for large-batch throughput, move batch onto the lane axis
    # (128 sequences per vreg) and add a 'parallel' batch grid axis for v7x.
    print("KERNEL_OK")
</pallas_src>

<mosaic_0001>
module attributes {stable_mosaic.version = 11 : i64} {
  func.func @lstm_kernel(%arg0: memref<2x8x3xf32, #tpu.memory_space<vmem>>, %arg1: memref<4x6x3xf32, #tpu.memory_space<vmem>>, %arg2: memref<2x1xf32, #tpu.memory_space<vmem>>) attributes {dimension_semantics = [], scalar_prefetch = 0 : i64, scratch_operands = 0 : i64, tpu.core_type = #tpu.core_type<tc>} {
    %c0 = arith.constant 0 : index
    %c0_0 = arith.constant 0 : index
    %c0_1 = arith.constant 0 : index
    %0 = vector.load %arg0[%c0, %c0_0, %c0_1] : memref<2x8x3xf32, #tpu.memory_space<vmem>>, vector<2x8x3xf32>
    %c0_2 = arith.constant 0 : index
    %c0_3 = arith.constant 0 : index
    %c0_4 = arith.constant 0 : index
    %1 = vector.load %arg1[%c0_2, %c0_3, %c0_4] : memref<4x6x3xf32, #tpu.memory_space<vmem>>, vector<4x6x3xf32>
    %2 = vector.extract_strided_slice %1 {offsets = [0, 0, 0], sizes = [4, 3, 3], strides = [1, 1, 1]} : vector<4x6x3xf32> to vector<4x3x3xf32>
    %3 = vector.extract_strided_slice %1 {offsets = [0, 3, 0], sizes = [4, 1, 3], strides = [1, 1, 1]} : vector<4x6x3xf32> to vector<4x1x3xf32>
    %4 = vector.extract_strided_slice %1 {offsets = [0, 4, 0], sizes = [4, 1, 3], strides = [1, 1, 1]} : vector<4x6x3xf32> to vector<4x1x3xf32>
    %5 = vector.extract_strided_slice %1 {offsets = [0, 5, 0], sizes = [1, 1, 3], strides = [1, 1, 1]} : vector<4x6x3xf32> to vector<1x1x3xf32>
    %6 = vector.shape_cast %5 : vector<1x1x3xf32> to vector<1x3xf32>
    %7 = vector.shape_cast %0 : vector<2x8x3xf32> to vector<2x8x3x1xf32>
    %8 = vector.extract_strided_slice %2 {offsets = [0, 0, 0], sizes = [1, 3, 3], strides = [1, 1, 1]} : vector<4x3x3xf32> to vector<1x3x3xf32>
    %9 = vector.shape_cast %8 : vector<1x3x3xf32> to vector<3x3xf32>
    %10 = vector.shape_cast %9 : vector<3x3xf32> to vector<1x1x3x3xf32>
    %11 = vector.broadcast %7 : vector<2x8x3x1xf32> to vector<2x8x3x3xf32>
    %12 = vector.broadcast %10 : vector<1x1x3x3xf32> to vector<2x8x3x3xf32>
    %13 = arith.mulf %11, %12 : vector<2x8x3x3xf32>
    %cst = arith.constant dense<0.000000e+00> : vector<2x8x3xf32>
    %14 = vector.multi_reduction <add>, %13, %cst [2] : vector<2x8x3x3xf32> to vector<2x8x3xf32>
    %15 = vector.shape_cast %0 : vector<2x8x3xf32> to vector<2x8x3x1xf32>
    %16 = vector.extract_strided_slice %2 {offsets = [1, 0, 0], sizes = [1, 3, 3], strides = [1, 1, 1]} : vector<4x3x3xf32> to vector<1x3x3xf32>
    %17 = vector.shape_cast %16 : vector<1x3x3xf32> to vector<3x3xf32>
    %18 = vector.shape_cast %17 : vector<3x3xf32> to vector<1x1x3x3xf32>
    %19 = vector.broadcast %15 : vector<2x8x3x1xf32> to vector<2x8x3x3xf32>
    %20 = vector.broadcast %18 : vector<1x1x3x3xf32> to vector<2x8x3x3xf32>
    %21 = arith.mulf %19, %20 : vector<2x8x3x3xf32>
    %cst_5 = arith.constant dense<0.000000e+00> : vector<2x8x3xf32>
    %22 = vector.multi_reduction <add>, %21, %cst_5 [2] : vector<2x8x3x3xf32> to vector<2x8x3xf32>
    %23 = vector.shape_cast %0 : vector<2x8x3xf32> to vector<2x8x3x1xf32>
    %24 = vector.extract_strided_slice %2 {offsets = [2, 0, 0], sizes = [1, 3, 3], strides = [1, 1, 1]} : vector<4x3x3xf32> to vector<1x3x3xf32>
    %25 = vector.shape_cast %24 : vector<1x3x3xf32> to vector<3x3xf32>
    %26 = vector.shape_cast %25 : vector<3x3xf32> to vector<1x1x3x3xf32>
    %27 = vector.broadcast %23 : vector<2x8x3x1xf32> to vector<2x8x3x3xf32>
    %28 = vector.broadcast %26 : vector<1x1x3x3xf32> to vector<2x8x3x3xf32>
    %29 = arith.mulf %27, %28 : vector<2x8x3x3xf32>
    %cst_6 = arith.constant dense<0.000000e+00> : vector<2x8x3xf32>
    %30 = vector.multi_reduction <add>, %29, %cst_6 [2] : vector<2x8x3x3xf32> to vector<2x8x3xf32>
    %31 = vector.shape_cast %0 : vector<2x8x3xf32> to vector<2x8x3x1xf32>
    %32 = vector.extract_strided_slice %2 {offsets = [3, 0, 0], sizes = [1, 3, 3], strides = [1, 1, 1]} : vector<4x3x3xf32> to vector<1x3x3xf32>
    %33 = vector.shape_cast %32 : vector<1x3x3xf32> to vector<3x3xf32>
    %34 = vector.shape_cast %33 : vector<3x3xf32> to vector<1x1x3x3xf32>
    %35 = vector.broadcast %31 : vector<2x8x3x1xf32> to vector<2x8x3x3xf32>
    %36 = vector.broadcast %34 : vector<1x1x3x3xf32> to vector<2x8x3x3xf32>
    %37 = arith.mulf %35, %36 : vector<2x8x3x3xf32>
    %cst_7 = arith.constant dense<0.000000e+00> : vector<2x8x3xf32>
    %38 = vector.multi_reduction <add>, %37, %cst_7 [2] : vector<2x8x3x3xf32> to vector<2x8x3xf32>
    %39 = vector.shape_cast %14 : vector<2x8x3xf32> to vector<1x2x8x3xf32>
    %40 = vector.shape_cast %22 : vector<2x8x3xf32> to vector<1x2x8x3xf32>
    %41 = vector.shape_cast %30 : vector<2x8x3xf32> to vector<1x2x8x3xf32>
    %42 = vector.shape_cast %38 : vector<2x8x3xf32> to vector<1x2x8x3xf32>
    %43 = tpu.concatenate %39, %40, %41, %42 in 0 : vector<1x2x8x3xf32>, vector<1x2x8x3xf32>, vector<1x2x8x3xf32>, vector<1x2x8x3xf32> -> vector<4x2x8x3xf32>
    %44 = vector.shape_cast %4 : vector<4x1x3xf32> to vector<4x1x1x3xf32>
    %45 = vector.broadcast %44 : vector<4x1x1x3xf32> to vector<4x2x8x3xf32>
    %46 = arith.addf %43, %45 : vector<4x2x8x3xf32>
    %cst_8 = arith.constant 0.000000e+00 : f32
    %47 = vector.broadcast %cst_8 : f32 to vector<2x1xf32>
    %cst_9 = arith.constant 0.000000e+00 : f32
    %48 = vector.broadcast %cst_9 : f32 to vector<2x3xf32>
    %49 = vector.extract_strided_slice %46 {offsets = [0, 0, 0, 0], sizes = [4, 2, 1, 3], strides = [1, 1, 1, 1]} : vector<4x2x8x3xf32> to vector<4x2x1x3xf32>
    %50 = vector.shape_cast %49 : vector<4x2x1x3xf32> to vector<4x2x3xf32>
    %51 = vector.shape_cast %47 : vector<2x1xf32> to vector<1x2x1xf32>
    %52 = vector.broadcast %51 : vector<1x2x1xf32> to vector<4x2x3xf32>
    %53 = vector.broadcast %3 : vector<4x1x3xf32> to vector<4x2x3xf32>
    %54 = arith.mulf %52, %53 : vector<4x2x3xf32>
    %55 = arith.addf %50, %54 : vector<4x2x3xf32>
    %56 = arith.negf %55 : vector<4x2x3xf32>
    %57 = math.exp %56 : vector<4x2x3xf32>
    %cst_10 = arith.constant 1.000000e+00 : f32
    %58 = vector.broadcast %cst_10 : f32 to vector<4x2x3xf32>
    %59 = arith.addf %58, %57 : vector<4x2x3xf32>
    %60 = arith.divf %58, %59 : vector<4x2x3xf32>
    %61 = vector.extract_strided_slice %60 {offsets = [0, 0, 0], sizes = [1, 2, 3], strides = [1, 1, 1]} : vector<4x2x3xf32> to vector<1x2x3xf32>
    %62 = vector.shape_cast %61 : vector<1x2x3xf32> to vector<2x3xf32>
    %63 = vector.extract_strided_slice %60 {offsets = [1, 0, 0], sizes = [1, 2, 3], strides = [1, 1, 1]} : vector<4x2x3xf32> to vector<1x2x3xf32>
    %64 = vector.shape_cast %63 : vector<1x2x3xf32> to vector<2x3xf32>
    %65 = vector.extract_strided_slice %60 {offsets = [3, 0, 0], sizes = [1, 2, 3], strides = [1, 1, 1]} : vector<4x2x3xf32> to vector<1x2x3xf32>
    %66 = vector.shape_cast %65 : vector<1x2x3xf32> to vector<2x3xf32>
    %67 = vector.extract_strided_slice %60 {offsets = [2, 0, 0], sizes = [1, 2, 3], strides = [1, 1, 1]} : vector<4x2x3xf32> to vector<1x2x3xf32>
    %68 = vector.shape_cast %67 : vector<1x2x3xf32> to vector<2x3xf32>
    %cst_11 = arith.constant 2.000000e+00 : f32
    %69 = vector.broadcast %cst_11 : f32 to vector<2x3xf32>
    %70 = arith.mulf %69, %68 : vector<2x3xf32>
    %cst_12 = arith.constant 1.000000e+00 : f32
    %71 = vector.broadcast %cst_12 : f32 to vector<2x3xf32>
    %72 = arith.subf %70, %71 : vector<2x3xf32>
    %73 = arith.mulf %64, %48 : vector<2x3xf32>
    %74 = arith.mulf %62, %72 : vector<2x3xf32>
    %75 = arith.addf %73, %74 : vector<2x3xf32>
    %76 = math.tanh %75 : vector<2x3xf32>
    %77 = arith.mulf %66, %76 : vector<2x3xf32>
    %78 = vector.broadcast %6 : vector<1x3xf32> to vector<2x3xf32>
    %79 = arith.mulf %77, %78 : vector<2x3xf32>
    %cst_13 = arith.constant dense<0.000000e+00> : vector<2xf32>
    %80 = vector.multi_reduction <add>, %79, %cst_13 [1] : vector<2x3xf32> to vector<2xf32>
    %81 = vector.shape_cast %80 : vector<2xf32> to vector<2x1xf32>
    %82 = vector.extract_strided_slice %46 {offsets = [0, 0, 1, 0], sizes = [4, 2, 1, 3], strides = [1, 1, 1, 1]} : vector<4x2x8x3xf32> to vector<4x2x1x3xf32>
    %83 = vector.shape_cast %82 : vector<4x2x1x3xf32> to vector<4x2x3xf32>
    %84 = vector.shape_cast %81 : vector<2x1xf32> to vector<1x2x1xf32>
    %85 = vector.broadcast %84 : vector<1x2x1xf32> to vector<4x2x3xf32>
    %86 = vector.broadcast %3 : vector<4x1x3xf32> to vector<4x2x3xf32>
    %87 = arith.mulf %85, %86 : vector<4x2x3xf32>
    %88 = arith.addf %83, %87 : vector<4x2x3xf32>
    %89 = arith.negf %88 : vector<4x2x3xf32>
    %90 = math.exp %89 : vector<4x2x3xf32>
    %cst_14 = arith.constant 1.000000e+00 : f32
    %91 = vector.broadcast %cst_14 : f32 to vector<4x2x3xf32>
    %92 = arith.addf %91, %90 : vector<4x2x3xf32>
    %93 = arith.divf %91, %92 : vector<4x2x3xf32>
    %94 = vector.extract_strided_slice %93 {offsets = [0, 0, 0], sizes = [1, 2, 3], strides = [1, 1, 1]} : vector<4x2x3xf32> to vector<1x2x3xf32>
    %95 = vector.shape_cast %94 : vector<1x2x3xf32> to vector<2x3xf32>
    %96 = vector.extract_strided_slice %93 {offsets = [1, 0, 0], sizes = [1, 2, 3], strides = [1, 1, 1]} : vector<4x2x3xf32> to vector<1x2x3xf32>
    %97 = vector.shape_cast %96 : vector<1x2x3xf32> to vector<2x3xf32>
    %98 = vector.extract_strided_slice %93 {offsets = [3, 0, 0], sizes = [1, 2, 3], strides = [1, 1, 1]} : vector<4x2x3xf32> to vector<1x2x3xf32>
    %99 = vector.shape_cast %98 : vector<1x2x3xf32> to vector<2x3xf32>
    %100 = vector.extract_strided_slice %93 {offsets = [2, 0, 0], sizes = [1, 2, 3], strides = [1, 1, 1]} : vector<4x2x3xf32> to vector<1x2x3xf32>
    %101 = vector.shape_cast %100 : vector<1x2x3xf32> to vector<2x3xf32>
    %cst_15 = arith.constant 2.000000e+00 : f32
    %102 = vector.broadcast %cst_15 : f32 to vector<2x3xf32>
    %103 = arith.mulf %102, %101 : vector<2x3xf32>
    %cst_16 = arith.constant 1.000000e+00 : f32
    %104 = vector.broadcast %cst_16 : f32 to vector<2x3xf32>
    %105 = arith.subf %103, %104 : vector<2x3xf32>
    %106 = arith.mulf %97, %75 : vector<2x3xf32>
    %107 = arith.mulf %95, %105 : vector<2x3xf32>
    %108 = arith.addf %106, %107 : vector<2x3xf32>
    %109 = math.tanh %108 : vector<2x3xf32>
    %110 = arith.mulf %99, %109 : vector<2x3xf32>
    %111 = vector.broadcast %6 : vector<1x3xf32> to vector<2x3xf32>
    %112 = arith.mulf %110, %111 : vector<2x3xf32>
    %cst_17 = arith.constant dense<0.000000e+00> : vector<2xf32>
    %113 = vector.multi_reduction <add>, %112, %cst_17 [1] : vector<2x3xf32> to vector<2xf32>
    %114 = vector.shape_cast %113 : vector<2xf32> to vector<2x1xf32>
    %115 = vector.extract_strided_slice %46 {offsets = [0, 0, 2, 0], sizes = [4, 2, 1, 3], strides = [1, 1, 1, 1]} : vector<4x2x8x3xf32> to vector<4x2x1x3xf32>
    %116 = vector.shape_cast %115 : vector<4x2x1x3xf32> to vector<4x2x3xf32>
    %117 = vector.shape_cast %114 : vector<2x1xf32> to vector<1x2x1xf32>
    %118 = vector.broadcast %117 : vector<1x2x1xf32> to vector<4x2x3xf32>
    %119 = vector.broadcast %3 : vector<4x1x3xf32> to vector<4x2x3xf32>
    %120 = arith.mulf %118, %119 : vector<4x2x3xf32>
    %121 = arith.addf %116, %120 : vector<4x2x3xf32>
    %122 = arith.negf %121 : vector<4x2x3xf32>
    %123 = math.exp %122 : vector<4x2x3xf32>
    %cst_18 = arith.constant 1.000000e+00 : f32
    %124 = vector.broadcast %cst_18 : f32 to vector<4x2x3xf32>
    %125 = arith.addf %124, %123 : vector<4x2x3xf32>
    %126 = arith.divf %124, %125 : vector<4x2x3xf32>
    %127 = vector.extract_strided_slice %126 {offsets = [0, 0, 0], sizes = [1, 2, 3], strides = [1, 1, 1]} : vector<4x2x3xf32> to vector<1x2x3xf32>
    %128 = vector.shape_cast %127 : vector<1x2x3xf32> to vector<2x3xf32>
    %129 = vector.extract_strided_slice %126 {offsets = [1, 0, 0], sizes = [1, 2, 3], strides = [1, 1, 1]} : vector<4x2x3xf32> to vector<1x2x3xf32>
    %130 = vector.shape_cast %129 : vector<1x2x3xf32> to vector<2x3xf32>
    %131 = vector.extract_strided_slice %126 {offsets = [3, 0, 0], sizes = [1, 2, 3], strides = [1, 1, 1]} : vector<4x2x3xf32> to vector<1x2x3xf32>
    %132 = vector.shape_cast %131 : vector<1x2x3xf32> to vector<2x3xf32>
    %133 = vector.extract_strided_slice %126 {offsets = [2, 0, 0], sizes = [1, 2, 3], strides = [1, 1, 1]} : vector<4x2x3xf32> to vector<1x2x3xf32>
    %134 = vector.shape_cast %133 : vector<1x2x3xf32> to vector<2x3xf32>
    %cst_19 = arith.constant 2.000000e+00 : f32
    %135 = vector.broadcast %cst_19 : f32 to vector<2x3xf32>
    %136 = arith.mulf %135, %134 : vector<2x3xf32>
    %cst_20 = arith.constant 1.000000e+00 : f32
    %137 = vector.broadcast %cst_20 : f32 to vector<2x3xf32>
    %138 = arith.subf %136, %137 : vector<2x3xf32>
    %139 = arith.mulf %130, %108 : vector<2x3xf32>
    %140 = arith.mulf %128, %138 : vector<2x3xf32>
    %141 = arith.addf %139, %140 : vector<2x3xf32>
    %142 = math.tanh %141 : vector<2x3xf32>
    %143 = arith.mulf %132, %142 : vector<2x3xf32>
    %144 = vector.broadcast %6 : vector<1x3xf32> to vector<2x3xf32>
    %145 = arith.mulf %143, %144 : vector<2x3xf32>
    %cst_21 = arith.constant dense<0.000000e+00> : vector<2xf32>
    %146 = vector.multi_reduction <add>, %145, %cst_21 [1] : vector<2x3xf32> to vector<2xf32>
    %147 = vector.shape_cast %146 : vector<2xf32> to vector<2x1xf32>
    %148 = vector.extract_strided_slice %46 {offsets = [0, 0, 3, 0], sizes = [4, 2, 1, 3], strides = [1, 1, 1, 1]} : vector<4x2x8x3xf32> to vector<4x2x1x3xf32>
    %149 = vector.shape_cast %148 : vector<4x2x1x3xf32> to vector<4x2x3xf32>
    %150 = vector.shape_cast %147 : vector<2x1xf32> to vector<1x2x1xf32>
    %151 = vector.broadcast %150 : vector<1x2x1xf32> to vector<4x2x3xf32>
    %152 = vector.broadcast %3 : vector<4x1x3xf32> to vector<4x2x3xf32>
    %153 = arith.mulf %151, %152 : vector<4x2x3xf32>
    %154 = arith.addf %149, %153 : vector<4x2x3xf32>
    %155 = arith.negf %154 : vector<4x2x3xf32>
    %156 = math.exp %155 : vector<4x2x3xf32>
    %cst_22 = arith.constant 1.000000e+00 : f32
    %157 = vector.broadcast %cst_22 : f32 to vector<4x2x3xf32>
    %158 = arith.addf %157, %156 : vector<4x2x3xf32>
    %159 = arith.divf %157, %158 : vector<4x2x3xf32>
    %160 = vector.extract_strided_slice %159 {offsets = [0, 0, 0], sizes = [1, 2, 3], strides = [1, 1, 1]} : vector<4x2x3xf32> to vector<1x2x3xf32>
    %161 = vector.shape_cast %160 : vector<1x2x3xf32> to vector<2x3xf32>
    %162 = vector.extract_strided_slice %159 {offsets = [1, 0, 0], sizes = [1, 2, 3], strides = [1, 1, 1]} : vector<4x2x3xf32> to vector<1x2x3xf32>
    %163 = vector.shape_cast %162 : vector<1x2x3xf32> to vector<2x3xf32>
    %164 = vector.extract_strided_slice %159 {offsets = [3, 0, 0], sizes = [1, 2, 3], strides = [1, 1, 1]} : vector<4x2x3xf32> to vector<1x2x3xf32>
    %165 = vector.shape_cast %164 : vector<1x2x3xf32> to vector<2x3xf32>
    %166 = vector.extract_strided_slice %159 {offsets = [2, 0, 0], sizes = [1, 2, 3], strides = [1, 1, 1]} : vector<4x2x3xf32> to vector<1x2x3xf32>
    %167 = vector.shape_cast %166 : vector<1x2x3xf32> to vector<2x3xf32>
    %cst_23 = arith.constant 2.000000e+00 : f32
    %168 = vector.broadcast %cst_23 : f32 to vector<2x3xf32>
    %169 = arith.mulf %168, %167 : vector<2x3xf32>
    %cst_24 = arith.constant 1.000000e+00 : f32
    %170 = vector.broadcast %cst_24 : f32 to vector<2x3xf32>
    %171 = arith.subf %169, %170 : vector<2x3xf32>
    %172 = arith.mulf %163, %141 : vector<2x3xf32>
    %173 = arith.mulf %161, %171 : vector<2x3xf32>
    %174 = arith.addf %172, %173 : vector<2x3xf32>
    %175 = math.tanh %174 : vector<2x3xf32>
    %176 = arith.mulf %165, %175 : vector<2x3xf32>
    %177 = vector.broadcast %6 : vector<1x3xf32> to vector<2x3xf32>
    %178 = arith.mulf %176, %177 : vector<2x3xf32>
    %cst_25 = arith.constant dense<0.000000e+00> : vector<2xf32>
    %179 = vector.multi_reduction <add>, %178, %cst_25 [1] : vector<2x3xf32> to vector<2xf32>
    %180 = vector.shape_cast %179 : vector<2xf32> to vector<2x1xf32>
    %181 = vector.extract_strided_slice %46 {offsets = [0, 0, 4, 0], sizes = [4, 2, 1, 3], strides = [1, 1, 1, 1]} : vector<4x2x8x3xf32> to vector<4x2x1x3xf32>
    %182 = vector.shape_cast %181 : vector<4x2x1x3xf32> to vector<4x2x3xf32>
    %183 = vector.shape_cast %180 : vector<2x1xf32> to vector<1x2x1xf32>
    %184 = vector.broadcast %183 : vector<1x2x1xf32> to vector<4x2x3xf32>
    %185 = vector.broadcast %3 : vector<4x1x3xf32> to vector<4x2x3xf32>
    %186 = arith.mulf %184, %185 : vector<4x2x3xf32>
    %187 = arith.addf %182, %186 : vector<4x2x3xf32>
    %188 = arith.negf %187 : vector<4x2x3xf32>
    %189 = math.exp %188 : vector<4x2x3xf32>
    %cst_26 = arith.constant 1.000000e+00 : f32
    %190 = vector.broadcast %cst_26 : f32 to vector<4x2x3xf32>
    %191 = arith.addf %190, %189 : vector<4x2x3xf32>
    %192 = arith.divf %190, %191 : vector<4x2x3xf32>
    %193 = vector.extract_strided_slice %192 {offsets = [0, 0, 0], sizes = [1, 2, 3], strides = [1, 1, 1]} : vector<4x2x3xf32> to vector<1x2x3xf32>
    %194 = vector.shape_cast %193 : vector<1x2x3xf32> to vector<2x3xf32>
    %195 = vector.extract_strided_slice %192 {offsets = [1, 0, 0], sizes = [1, 2, 3], strides = [1, 1, 1]} : vector<4x2x3xf32> to vector<1x2x3xf32>
    %196 = vector.shape_cast %195 : vector<1x2x3xf32> to vector<2x3xf32>
    %197 = vector.extract_strided_slice %192 {offsets = [3, 0, 0], sizes = [1, 2, 3], strides = [1, 1, 1]} : vector<4x2x3xf32> to vector<1x2x3xf32>
    %198 = vector.shape_cast %197 : vector<1x2x3xf32> to vector<2x3xf32>
    %199 = vector.extract_strided_slice %192 {offsets = [2, 0, 0], sizes = [1, 2, 3], strides = [1, 1, 1]} : vector<4x2x3xf32> to vector<1x2x3xf32>
    %200 = vector.shape_cast %199 : vector<1x2x3xf32> to vector<2x3xf32>
    %cst_27 = arith.constant 2.000000e+00 : f32
    %201 = vector.broadcast %cst_27 : f32 to vector<2x3xf32>
    %202 = arith.mulf %201, %200 : vector<2x3xf32>
    %cst_28 = arith.constant 1.000000e+00 : f32
    %203 = vector.broadcast %cst_28 : f32 to vector<2x3xf32>
    %204 = arith.subf %202, %203 : vector<2x3xf32>
    %205 = arith.mulf %196, %174 : vector<2x3xf32>
    %206 = arith.mulf %194, %204 : vector<2x3xf32>
    %207 = arith.addf %205, %206 : vector<2x3xf32>
    %208 = math.tanh %207 : vector<2x3xf32>
    %209 = arith.mulf %198, %208 : vector<2x3xf32>
    %210 = vector.broadcast %6 : vector<1x3xf32> to vector<2x3xf32>
    %211 = arith.mulf %209, %210 : vector<2x3xf32>
    %cst_29 = arith.constant dense<0.000000e+00> : vector<2xf32>
    %212 = vector.multi_reduction <add>, %211, %cst_29 [1] : vector<2x3xf32> to vector<2xf32>
    %213 = vector.shape_cast %212 : vector<2xf32> to vector<2x1xf32>
    %214 = vector.extract_strided_slice %46 {offsets = [0, 0, 5, 0], sizes = [4, 2, 1, 3], strides = [1, 1, 1, 1]} : vector<4x2x8x3xf32> to vector<4x2x1x3xf32>
    %215 = vector.shape_cast %214 : vector<4x2x1x3xf32> to vector<4x2x3xf32>
    %216 = vector.shape_cast %213 : vector<2x1xf32> to vector<1x2x1xf32>
    %217 = vector.broadcast %216 : vector<1x2x1xf32> to vector<4x2x3xf32>
    %218 = vector.broadcast %3 : vector<4x1x3xf32> to vector<4x2x3xf32>
    %219 = arith.mulf %217, %218 : vector<4x2x3xf32>
    %220 = arith.addf %215, %219 : vector<4x2x3xf32>
    %221 = arith.negf %220 : vector<4x2x3xf32>
    %222 = math.exp %221 : vector<4x2x3xf32>
    %cst_30 = arith.constant 1.000000e+00 : f32
    %223 = vector.broadcast %cst_30 : f32 to vector<4x2x3xf32>
    %224 = arith.addf %223, %222 : vector<4x2x3xf32>
    %225 = arith.divf %223, %224 : vector<4x2x3xf32>
    %226 = vector.extract_strided_slice %225 {offsets = [0, 0, 0], sizes = [1, 2, 3], strides = [1, 1, 1]} : vector<4x2x3xf32> to vector<1x2x3xf32>
    %227 = vector.shape_cast %226 : vector<1x2x3xf32> to vector<2x3xf32>
    %228 = vector.extract_strided_slice %225 {offsets = [1, 0, 0], sizes = [1, 2, 3], strides = [1, 1, 1]} : vector<4x2x3xf32> to vector<1x2x3xf32>
    %229 = vector.shape_cast %228 : vector<1x2x3xf32> to vector<2x3xf32>
    %230 = vector.extract_strided_slice %225 {offsets = [3, 0, 0], sizes = [1, 2, 3], strides = [1, 1, 1]} : vector<4x2x3xf32> to vector<1x2x3xf32>
    %231 = vector.shape_cast %230 : vector<1x2x3xf32> to vector<2x3xf32>
    %232 = vector.extract_strided_slice %225 {offsets = [2, 0, 0], sizes = [1, 2, 3], strides = [1, 1, 1]} : vector<4x2x3xf32> to vector<1x2x3xf32>
    %233 = vector.shape_cast %232 : vector<1x2x3xf32> to vector<2x3xf32>
    %cst_31 = arith.constant 2.000000e+00 : f32
    %234 = vector.broadcast %cst_31 : f32 to vector<2x3xf32>
    %235 = arith.mulf %234, %233 : vector<2x3xf32>
    %cst_32 = arith.constant 1.000000e+00 : f32
    %236 = vector.broadcast %cst_32 : f32 to vector<2x3xf32>
    %237 = arith.subf %235, %236 : vector<2x3xf32>
    %238 = arith.mulf %229, %207 : vector<2x3xf32>
    %239 = arith.mulf %227, %237 : vector<2x3xf32>
    %240 = arith.addf %238, %239 : vector<2x3xf32>
    %241 = math.tanh %240 : vector<2x3xf32>
    %242 = arith.mulf %231, %241 : vector<2x3xf32>
    %243 = vector.broadcast %6 : vector<1x3xf32> to vector<2x3xf32>
    %244 = arith.mulf %242, %243 : vector<2x3xf32>
    %cst_33 = arith.constant dense<0.000000e+00> : vector<2xf32>
    %245 = vector.multi_reduction <add>, %244, %cst_33 [1] : vector<2x3xf32> to vector<2xf32>
    %246 = vector.shape_cast %245 : vector<2xf32> to vector<2x1xf32>
    %247 = vector.extract_strided_slice %46 {offsets = [0, 0, 6, 0], sizes = [4, 2, 1, 3], strides = [1, 1, 1, 1]} : vector<4x2x8x3xf32> to vector<4x2x1x3xf32>
    %248 = vector.shape_cast %247 : vector<4x2x1x3xf32> to vector<4x2x3xf32>
    %249 = vector.shape_cast %246 : vector<2x1xf32> to vector<1x2x1xf32>
    %250 = vector.broadcast %249 : vector<1x2x1xf32> to vector<4x2x3xf32>
    %251 = vector.broadcast %3 : vector<4x1x3xf32> to vector<4x2x3xf32>
    %252 = arith.mulf %250, %251 : vector<4x2x3xf32>
    %253 = arith.addf %248, %252 : vector<4x2x3xf32>
    %254 = arith.negf %253 : vector<4x2x3xf32>
    %255 = math.exp %254 : vector<4x2x3xf32>
    %cst_34 = arith.constant 1.000000e+00 : f32
    %256 = vector.broadcast %cst_34 : f32 to vector<4x2x3xf32>
    %257 = arith.addf %256, %255 : vector<4x2x3xf32>
    %258 = arith.divf %256, %257 : vector<4x2x3xf32>
    %259 = vector.extract_strided_slice %258 {offsets = [0, 0, 0], sizes = [1, 2, 3], strides = [1, 1, 1]} : vector<4x2x3xf32> to vector<1x2x3xf32>
    %260 = vector.shape_cast %259 : vector<1x2x3xf32> to vector<2x3xf32>
    %261 = vector.extract_strided_slice %258 {offsets = [1, 0, 0], sizes = [1, 2, 3], strides = [1, 1, 1]} : vector<4x2x3xf32> to vector<1x2x3xf32>
    %262 = vector.shape_cast %261 : vector<1x2x3xf32> to vector<2x3xf32>
    %263 = vector.extract_strided_slice %258 {offsets = [3, 0, 0], sizes = [1, 2, 3], strides = [1, 1, 1]} : vector<4x2x3xf32> to vector<1x2x3xf32>
    %264 = vector.shape_cast %263 : vector<1x2x3xf32> to vector<2x3xf32>
    %265 = vector.extract_strided_slice %258 {offsets = [2, 0, 0], sizes = [1, 2, 3], strides = [1, 1, 1]} : vector<4x2x3xf32> to vector<1x2x3xf32>
    %266 = vector.shape_cast %265 : vector<1x2x3xf32> to vector<2x3xf32>
    %cst_35 = arith.constant 2.000000e+00 : f32
    %267 = vector.broadcast %cst_35 : f32 to vector<2x3xf32>
    %268 = arith.mulf %267, %266 : vector<2x3xf32>
    %cst_36 = arith.constant 1.000000e+00 : f32
    %269 = vector.broadcast %cst_36 : f32 to vector<2x3xf32>
    %270 = arith.subf %268, %269 : vector<2x3xf32>
    %271 = arith.mulf %262, %240 : vector<2x3xf32>
    %272 = arith.mulf %260, %270 : vector<2x3xf32>
    %273 = arith.addf %271, %272 : vector<2x3xf32>
    %274 = math.tanh %273 : vector<2x3xf32>
    %275 = arith.mulf %264, %274 : vector<2x3xf32>
    %276 = vector.broadcast %6 : vector<1x3xf32> to vector<2x3xf32>
    %277 = arith.mulf %275, %276 : vector<2x3xf32>
    %cst_37 = arith.constant dense<0.000000e+00> : vector<2xf32>
    %278 = vector.multi_reduction <add>, %277, %cst_37 [1] : vector<2x3xf32> to vector<2xf32>
    %279 = vector.shape_cast %278 : vector<2xf32> to vector<2x1xf32>
    %280 = vector.extract_strided_slice %46 {offsets = [0, 0, 7, 0], sizes = [4, 2, 1, 3], strides = [1, 1, 1, 1]} : vector<4x2x8x3xf32> to vector<4x2x1x3xf32>
    %281 = vector.shape_cast %280 : vector<4x2x1x3xf32> to vector<4x2x3xf32>
    %282 = vector.shape_cast %279 : vector<2x1xf32> to vector<1x2x1xf32>
    %283 = vector.broadcast %282 : vector<1x2x1xf32> to vector<4x2x3xf32>
    %284 = vector.broadcast %3 : vector<4x1x3xf32> to vector<4x2x3xf32>
    %285 = arith.mulf %283, %284 : vector<4x2x3xf32>
    %286 = arith.addf %281, %285 : vector<4x2x3xf32>
    %287 = arith.negf %286 : vector<4x2x3xf32>
    %288 = math.exp %287 : vector<4x2x3xf32>
    %cst_38 = arith.constant 1.000000e+00 : f32
    %289 = vector.broadcast %cst_38 : f32 to vector<4x2x3xf32>
    %290 = arith.addf %289, %288 : vector<4x2x3xf32>
    %291 = arith.divf %289, %290 : vector<4x2x3xf32>
    %292 = vector.extract_strided_slice %291 {offsets = [0, 0, 0], sizes = [1, 2, 3], strides = [1, 1, 1]} : vector<4x2x3xf32> to vector<1x2x3xf32>
    %293 = vector.shape_cast %292 : vector<1x2x3xf32> to vector<2x3xf32>
    %294 = vector.extract_strided_slice %291 {offsets = [1, 0, 0], sizes = [1, 2, 3], strides = [1, 1, 1]} : vector<4x2x3xf32> to vector<1x2x3xf32>
    %295 = vector.shape_cast %294 : vector<1x2x3xf32> to vector<2x3xf32>
    %296 = vector.extract_strided_slice %291 {offsets = [3, 0, 0], sizes = [1, 2, 3], strides = [1, 1, 1]} : vector<4x2x3xf32> to vector<1x2x3xf32>
    %297 = vector.shape_cast %296 : vector<1x2x3xf32> to vector<2x3xf32>
    %298 = vector.extract_strided_slice %291 {offsets = [2, 0, 0], sizes = [1, 2, 3], strides = [1, 1, 1]} : vector<4x2x3xf32> to vector<1x2x3xf32>
    %299 = vector.shape_cast %298 : vector<1x2x3xf32> to vector<2x3xf32>
    %cst_39 = arith.constant 2.000000e+00 : f32
    %300 = vector.broadcast %cst_39 : f32 to vector<2x3xf32>
    %301 = arith.mulf %300, %299 : vector<2x3xf32>
    %cst_40 = arith.constant 1.000000e+00 : f32
    %302 = vector.broadcast %cst_40 : f32 to vector<2x3xf32>
    %303 = arith.subf %301, %302 : vector<2x3xf32>
    %304 = arith.mulf %295, %273 : vector<2x3xf32>
    %305 = arith.mulf %293, %303 : vector<2x3xf32>
    %306 = arith.addf %304, %305 : vector<2x3xf32>
    %307 = math.tanh %306 : vector<2x3xf32>
    %308 = arith.mulf %297, %307 : vector<2x3xf32>
    %309 = vector.broadcast %6 : vector<1x3xf32> to vector<2x3xf32>
    %310 = arith.mulf %308, %309 : vector<2x3xf32>
    %cst_41 = arith.constant dense<0.000000e+00> : vector<2xf32>
    %311 = vector.multi_reduction <add>, %310, %cst_41 [1] : vector<2x3xf32> to vector<2xf32>
    %312 = vector.shape_cast %311 : vector<2xf32> to vector<2x1xf32>
    %c0_42 = arith.constant 0 : index
    %c0_43 = arith.constant 0 : index
    %313 = vector.load %arg2[%c0_42, %c0_43] : memref<2x1xf32, #tpu.memory_space<vmem>>, vector<2x1xf32>
    tpu.vector_store %arg2[%c0_42, %c0_43], %312 {strides = array<i32>} : memref<2x1xf32, #tpu.memory_space<vmem>>, vector<2x1xf32>,
    return
  }
}

</mosaic_0001>

<bundles_post_ra>
// kernel: lstm_forward.1
= control target key start
LH: loop header
LB: loop body
LE: loop exit
PB: predicated region body
PF: predicated region fallthrough
CT: control target
= control target key end

     0   :  { %v18_v0 = vlaneseq  ;;  %vm4510_vm0 = vcmask 18432   ;;  %s4507_s0 = inlined_call_operand.vmem [shape: f32[2,8,3], index: 0, kind: input, shape index: {}]   ;;  %s4508_s1 = inlined_call_operand.vmem [shape: f32[4,6,3], index: 1, kind: input, shape index: {}]   ;;  %s4509_s2 = inlined_call_operand.vmem [shape: f32[2,1], index: 2, kind: output, shape index: {}]  }
   0x1   :  { %v2744_v2 = vld [vmem:[%s4507_s0 + $0x8] sm:$0xff]  ;;  %v2750_v4 = vld [vmem:[%s4507_s0] sm:$0xff]  ;;  %v2772_v16 = vld [vmem:[%s4508_s1 + $0x10] sm:$0x3f] }
   0x2   :  { %v19_v1 = vshrl.u32 %v18_v0, 7  ;;  %v73_v3 = vperm.slane %v2744_v2, 0  ;;  %v17_v5 = vperm.slane %v2750_v4, 0  ;;  %v31_v6 = vperm.slane %v2750_v4, 2  ;;  %v2761_v12 = vld [vmem:[%s4508_s1] sm:$0x3f] }
   0x3   :  { %v94_v7 = vperm.slane %v2744_v2, 3  ;;  %v38_v8 = vperm.slane %v2750_v4, 3  ;;  %v101_v9 = vperm.slane %v2744_v2, 4  ;;  %v45_v10 = vperm.slane %v2750_v4, 4  ;;  %v2767_v14 = vld [vmem:[%s4508_s1 + $0x8] sm:$0x3f] }
   0x4   :  { %2419 = vset.pattern.permute.xlu0 %v19_v1  ;;  %2420 = vset.pattern.permute.xlu1 %v19_v1  ;;  %v2787_v31 = vld [vmem:[%s4508_s1 + $0x18] sm:$0x3f]  ;;  %v2795_v60 = vperm.slane %v2761_v12, 4  ;;  %v2798_v61 = vperm.slane %v2761_v12, 3 }
   0x5   :  { %2421 = vset.pattern.permute.xlu2 %v19_v1 }
   0xc   :  { %78 = vperm.xlu0 %2419, %v73_v3  }
  0x14   :  { %22 = vperm.xlu0 %2419, %v17_v5  }
  0x1c   :  { %36 = vperm.xlu0 %2419, %v31_v6  }
  0x24   :  { %99 = vperm.xlu0 %2419, %v94_v7  }
  0x2c   :  { %43 = vperm.xlu0 %2419, %v38_v8   ;;  %v714_v8 = vmul.f32 0.0, %v2798_v61 }
  0x34   :  { %106 = vperm.xlu0 %2419, %v101_v9  }
  0x3c   :  { %50 = vperm.xlu0 %2419, %v45_v10  }
  0x7e   :  { %v79_v11 = vpop.permute.xlu0 %78 }
  0x7f   :  { %v137_v13 = vmul.f32 %v79_v11, %v2761_v12  ;;  %v266_v20 = vmul.f32 %v79_v11, %v2767_v14  ;;  %v394_v24 = vmul.f32 %v79_v11, %v2772_v16  ;;  %v522_v38 = vmul.f32 %v79_v11, %v2787_v31 }
  0x81   :  { %v202_v17 = vsel %vm4510_vm0, %v137_v13, 0.0  ;;  %v330_v27 = vsel %vm4510_vm0, %v266_v20, 0.0  ;;  %v458_v33 = vsel %vm4510_vm0, %v394_v24, 0.0  ;;  %v586_v46 = vsel %vm4510_vm0, %v522_v38, 0.0 }
  0x82   :  { %v203_v23 = vrot.slane %v202_v17, 4  ;;  %v331_v34 = vrot.slane %v330_v27, 4  ;;  %v459_v37 = vrot.slane %v458_v33, 4  ;;  %v587_v52 = vrot.slane %v586_v46, 4 }
  0x83   :  { %v2807_v20 = vperm.slane %v2767_v14, 3 }
  0x84   :  { %v204_v32 = vadd.f32 %v203_v23, %v202_v17  ;;  %v332_v43 = vadd.f32 %v331_v34, %v330_v27  ;;  %v460_v45 = vadd.f32 %v459_v37, %v458_v33  ;;  %v588_v62 = vadd.f32 %v587_v52, %v586_v46 }
  0x86   :  { %v23_v15 = vpop.permute.xlu0 %22  ;;  %v205_v40 = vrot.slane %v204_v32, 2  ;;  %v333_v51 = vrot.slane %v332_v43, 2  ;;  %v461_v54 = vrot.slane %v460_v45, 2  ;;  %v589_v9 = vrot.slane %v588_v62, 2 }
  0x87   :  { %v129_v18 = vmul.f32 %v23_v15, %v2761_v12  ;;  %v258_v19 = vmul.f32 %v23_v15, %v2767_v14  ;;  %v386_v22 = vmul.f32 %v23_v15, %v2772_v16  ;;  %v514_v42 = vmul.f32 %v23_v15, %v2787_v31 }
  0x88   :  { %v206_v48 = vadd.f32 %v205_v40, %v204_v32  ;;  %v334_v59 = vadd.f32 %v333_v51, %v332_v43  ;;  %v462_v0 = vadd.f32 %v461_v54, %v460_v45  ;;  %v590_v23 = vadd.f32 %v589_v9, %v588_v62 }
  0x89   :  { %v146_v21 = vsel %vm4510_vm0, %v129_v18, 0.0  ;;  %v274_v25 = vsel %vm4510_vm0, %v258_v19, 0.0  ;;  %v402_v30 = vsel %vm4510_vm0, %v386_v22, 0.0  ;;  %v530_v50 = vsel %vm4510_vm0, %v514_v42, 0.0 }
  0x8a   :  { %v147_v26 = vrot.slane %v146_v21, 4  ;;  %v275_v29 = vrot.slane %v274_v25, 4  ;;  %v403_v36 = vrot.slane %v402_v30, 4  ;;  %v531_v56 = vrot.slane %v530_v50, 4 }
  0x8b   :  { %v207_v57 = vrot.slane %v206_v48, 1  ;;  %v335_v7 = vrot.slane %v334_v59, 1  ;;  %v463_v11 = vrot.slane %v462_v0, 1  ;;  %v2804_v19 = vperm.slane %v2767_v14, 4 }
  0x8c   :  { %v148_v28 = vadd.f32 %v147_v26, %v146_v21  ;;  %v276_v39 = vadd.f32 %v275_v29, %v274_v25  ;;  %v404_v44 = vadd.f32 %v403_v36, %v402_v30  ;;  %v532_v3 = vadd.f32 %v531_v56, %v530_v50 }
  0x8d   :  { %v208_v5 = vadd.f32 %v207_v57, %v206_v48  ;;  %v336_v21 = vadd.f32 %v335_v7, %v334_v59  ;;  %v2810_v22 = vperm.slane %v2772_v16, 4  ;;  %v2813_v25 = vperm.slane %v2772_v16, 3 }
  0x8e   :  { %v149_v35 = vrot.slane %v148_v28, 2  ;;  %v277_v47 = vrot.slane %v276_v39, 2  ;;  %v405_v53 = vrot.slane %v404_v44, 2  ;;  %v533_v15 = vrot.slane %v532_v3, 2 }
  0x8f   :  { %v654_v17 = vadd.f32 %v2795_v60, %v208_v5  ;;  %v464_v26 = vadd.f32 %v463_v11, %v462_v0  ;;  %v715_v32 = vmul.f32 0.0, %v2807_v20  ;;  %v670_v33 = vadd.f32 %v2804_v19, %v336_v21 }
  0x90   :  { %v150_v41 = vadd.f32 %v149_v35, %v148_v28  ;;  %v278_v55 = vadd.f32 %v277_v47, %v276_v39  ;;  %v406_v63 = vadd.f32 %v405_v53, %v404_v44  ;;  %v534_v27 = vadd.f32 %v533_v15, %v532_v3 }
  0x91   :  { %v719_v29 = vadd.f32 %v714_v8, %v654_v17  ;;  %v591_v34 = vrot.slane %v590_v23, 1  ;;  %v716_v36 = vmul.f32 0.0, %v2813_v25  ;;  %v686_v37 = vadd.f32 %v2810_v22, %v464_v26 }
  0x92   :  { %v151_v49 = vrot.slane %v150_v41, 1  ;;  %v279_v1 = vrot.slane %v278_v55, 1  ;;  %v407_v10 = vrot.slane %v406_v63, 1  ;;  %v535_v38 = vrot.slane %v534_v27, 1 }
  0x93   :  { %v2340_v40 = vmul.f32 -1.442695, %v719_v29  ;;  %v2822_v42 = vperm.slane %v2787_v31, 4  ;;  %v2825_v43 = vperm.slane %v2787_v31, 3  ;;  %v592_v44 = vadd.f32 %v591_v34, %v590_v23 }
  0x94   :  { %v152_v58 = vadd.f32 %v151_v49, %v150_v41  ;;  %v280_v13 = vadd.f32 %v279_v1, %v278_v55  ;;  %v408_v24 = vadd.f32 %v407_v10, %v406_v63  ;;  %v721_v41 = vadd.f32 %v715_v32, %v670_v33 }
  0x95   :  { %v723_v46 = vadd.f32 %v716_v36, %v686_v37  ;;  %v536_v47 = vadd.f32 %v535_v38, %v534_v27  ;;  %v717_v51 = vmul.f32 0.0, %v2825_v43  ;;  %v702_v52 = vadd.f32 %v2822_v42, %v592_v44 }
  0x96   :  { %v646_v6 = vadd.f32 %v2795_v60, %v152_v58  ;;  %v662_v28 = vadd.f32 %v2804_v19, %v280_v13  ;;  %v678_v35 = vadd.f32 %v2810_v22, %v408_v24  ;;  %v2342_v49 = vmul.f32 -1.442695, %v721_v41 }
  0x97   :  { %v2344_v54 = vmul.f32 -1.442695, %v723_v46  ;;  %v694_v55 = vadd.f32 %v2822_v42, %v536_v47  ;;  %v725_v58 = vadd.f32 %v717_v51, %v702_v52  ;;  %v80_v62 = vperm.slane %v2744_v2, 1 }
  0x98   :  { %v718_v18 = vadd.f32 %v714_v8, %v646_v6  ;;  %v720_v39 = vadd.f32 %v715_v32, %v662_v28  ;;  %v722_v45 = vadd.f32 %v716_v36, %v678_v35  ;;  %v24_v13 = vperm.slane %v2750_v4, 1 }
  0x99   :  { %v724_v59 = vadd.f32 %v717_v51, %v694_v55  ;;  %v2346_v1 = vmul.f32 -1.442695, %v725_v58  ;;  %85 = vperm.xlu1 %2420, %v80_v62  }
  0x9a   :  { %v2339_v30 = vmul.f32 -1.442695, %v718_v18  ;;  %v2341_v48 = vmul.f32 -1.442695, %v720_v39  ;;  %v2343_v53 = vmul.f32 -1.442695, %v722_v45 }
  0x9b   :  { %v2345_v5 = vmul.f32 -1.442695, %v724_v59 }
  0x9c   :  { %2422 = vpow2.f32 %v2339_v30 }
  0x9d   :  { %2424 = vpow2.f32 %v2340_v40 }
  0x9e   :  { %2426 = vpow2.f32 %v2341_v48 }
  0x9f   :  { %2428 = vpow2.f32 %v2342_v49 }
  0xa0   :  { %2430 = vpow2.f32 %v2343_v53 }
  0xa1   :  { %2432 = vpow2.f32 %v2344_v54  ;;  %29 = vperm.xlu1 %2420, %v24_v13  }
  0xa2   :  { %v2423_v50 = vpop.eup %2422 }
  0xa3   :  { %v2830_v56 = vadd.f32 1.0, %v2423_v50  ;;  %v2425_v57 = vpop.eup %2424 }
  0xa4   :  { %v2427_v63 = vpop.eup %2426  ;;  %v2833_v0 = vadd.f32 1.0, %v2425_v57 }
  0xa5   :  { %2434 = vrcp.f32 %v2830_v56  ;;  %v2429_v3 = vpop.eup %2428  ;;  %v2836_v7 = vadd.f32 1.0, %v2427_v63  ;;  %vm763_vm2 = vweird.f32 %v2830_v56  ;;  %v767_v41 = vand.u32 2147483647, %v2830_v56 }
  0xa6   :  { %v2431_v6 = vpop.eup %2430  ;;  %2436 = vrcp.f32 %v2833_v0  ;;  %v2839_v9 = vadd.f32 1.0, %v2429_v3  ;;  %v769_v44 = vand.u32 2147483648, %v2830_v56  ;;  %vm778_vm3 = vweird.f32 %v2833_v0 }
  0xa7   :  { %v2433_v8 = vpop.eup %2432  ;;  %2438 = vpow2.f32 %v2346_v1  ;;  %v2843_v2 = vadd.f32 1.0, %v2431_v6  ;;  %v782_v46 = vand.u32 2147483647, %v2833_v0  ;;  %v784_v47 = vand.u32 2147483648, %v2833_v0 }
  0xa8   :  { %2440 = vpow2.f32 %v2345_v5  ;;  %v2845_v11 = vadd.f32 1.0, %v2433_v8  ;;  %vm793_vm6 = vweird.f32 %v2836_v7  ;;  %v797_v54 = vand.u32 2147483647, %v2836_v7 }
  0xa9   :  { %2442 = vrcp.f32 %v2836_v7  ;;  %v799_v55 = vand.u32 2147483648, %v2836_v7  ;;  %v829_v59 = vand.u32 2147483648, %v2843_v2  ;;  %vm823_vm10 = vweird.f32 %v2843_v2 }
  0xaa   :  { %2444 = vrcp.f32 %v2839_v9  ;;  %v827_v3 = vand.u32 2147483647, %v2843_v2  ;;  %v842_v13 = vand.u32 2147483647, %v2845_v11  ;;  %vm838_vm14 = vweird.f32 %v2845_v11 }
  0xab   :  { %v2841_v10 = vpop.eup %2434  ;;  %2446 = vrcp.f32 %v2843_v2 }
  0xac   :  { %v759_v15 = vmul.f32 %v2841_v10, %v2830_v56  ;;  %v2852_v17 = vpop.eup %2436  ;;  %2448 = vrcp.f32 %v2845_v11  ;;  %vm764_vm1 = vweird.f32 %v2841_v10 }
  0xad   :  { %v2439_v18 = vpop.eup %2438  ;;  %v774_v26 = vmul.f32 %v2852_v17, %v2833_v0  ;;  %vm779_vm4 = vweird.f32 %v2852_v17  ;;  %vm2891_vm5 = vmor %vm763_vm2, %vm764_vm1  ;;  %vm808_vm1 = vweird.f32 %v2839_v9  ;;  %vm828_vm2 = vcmp.eq.f32.partialorder %v827_v3, 8.507059e+37 }
  0xae   :  { %v760_v21 = vsub.f32 1.0, %v759_v15  ;;  %v2441_v23 = vpop.eup %2440  ;;  %v2860_v27 = vadd.f32 1.0, %v2439_v18  ;;  %vm2925_vm11 = vmor %vm778_vm3, %vm779_vm4  ;;  %v844_v18 = vand.u32 2147483648, %v2845_v11 }
  0xaf   :  { %v2856_v24 = vpop.eup %2442  ;;  %v775_v29 = vsub.f32 1.0, %v774_v26  ;;  %v2867_v32 = vadd.f32 1.0, %v2441_v23  ;;  %v830_v26 = vor.u32 1.1754944e-38, %v829_v59  ;;  %v770_v59 = vor.u32 1.1754944e-38, %v769_v44 }
  0xb0   :  { %v2862_v4 = vpop.eup %2444  ;;  %v761_v28 = vmul.f32 %v2841_v10, %v760_v21  ;;  %v789_v33 = vmul.f32 %v2856_v24, %v2836_v7  ;;  %2450 = vrcp.f32 %v2860_v27  ;;  %vm794_vm7 = vweird.f32 %v2856_v24 }
  0xb1   :  { %v2865_v30 = vpop.eup %2446  ;;  %v776_v38 = vmul.f32 %v2852_v17, %v775_v29  ;;  %2452 = vrcp.f32 %v2867_v32  ;;  %v804_v40 = vmul.f32 %v2862_v4, %v2839_v9  ;;  %vm809_vm9 = vweird.f32 %v2862_v4  ;;  %vm2943_vm15 = vmor %vm793_vm6, %vm794_vm7 }
  0xb2   :  { %v2871_v34 = vpop.eup %2448  ;;  %v790_v35 = vsub.f32 1.0, %v789_v33  ;;  %v819_v36 = vmul.f32 %v2865_v30, %v2843_v2  ;;  %v2877_v37 = vadd.f32 %v2841_v10, %v761_v28  ;;  %vm824_vm8 = vweird.f32 %v2865_v30  ;;  %vm2957_vm4 = vmor %vm808_vm1, %vm809_vm9 }
  0xb3   :  { %v834_v39 = vmul.f32 %v2871_v34, %v2845_v11  ;;  %v805_v49 = vsub.f32 1.0, %v804_v40  ;;  %v2903_v51 = vadd.f32 %v2852_v17, %v776_v38  ;;  %vm839_vm12 = vweird.f32 %v2871_v34  ;;  %vm825_vm13 = vmor %vm823_vm10, %vm824_vm8 }
  0xb4   :  { %v791_v48 = vmul.f32 %v2856_v24, %v790_v35  ;;  %v766_v50 = vsel %vm2891_vm5, %v2841_v10, %v2877_v37  ;;  %v820_v52 = vsub.f32 1.0, %v819_v36  ;;  %v814_v2 = vand.u32 2147483648, %v2839_v9  ;;  %vm840_vm3 = vmor %vm838_vm14, %vm839_vm12 }
  0xb5   :  { %v806_v57 = vmul.f32 %v2862_v4, %v805_v49  ;;  %v835_v62 = vsub.f32 1.0, %v834_v39  ;;  %v812_v11 = vand.u32 2147483647, %v2839_v9  ;;  %v845_v7 = vor.u32 1.1754944e-38, %v844_v18 }
  0xb6   :  { %v2906_v53 = vpop.eup %2450  ;;  %v821_v58 = vmul.f32 %v2865_v30, %v820_v52  ;;  %v792_v1 = vadd.f32 %v2856_v24, %v791_v48  ;;  %vm843_vm6 = vcmp.eq.f32.partialorder %v842_v13, 8.507059e+37  ;;  %v781_v9 = vsel %vm2925_vm11, %v2852_v17, %v2903_v51 }
  0xb7   :  { %v2915_v63 = vpop.eup %2452  ;;  %v836_v8 = vmul.f32 %v2871_v34, %v835_v62  ;;  %v807_v15 = vadd.f32 %v2862_v4, %v806_v57  ;;  %v864_v36 = vmul.f32 %v2906_v53, %v2860_v27  ;;  %v800_v48 = vor.u32 1.1754944e-38, %v799_v55 }
  0xb8   :  { %v822_v6 = vadd.f32 %v2865_v30, %v821_v58  ;;  %v849_v29 = vmul.f32 %v2915_v63, %v2867_v32  ;;  %v796_v38 = vsel %vm2943_vm15, %v2856_v24, %v792_v1  ;;  %vm798_vm7 = vcmp.eq.f32.partialorder %v797_v54, 8.507059e+37 }
  0xb9   :  { %v837_v28 = vadd.f32 %v2871_v34, %v836_v8  ;;  %v811_v39 = vsel %vm2957_vm4, %v2862_v4, %v807_v15  ;;  %v865_v52 = vsub.f32 1.0, %v864_v36  ;;  %vm813_vm8 = vcmp.eq.f32.partialorder %v812_v11, 8.507059e+37 }
  0xba   :  { %v826_v23 = vsel %vm825_vm13, %v2865_v30, %v822_v6  ;;  %v850_v49 = vsub.f32 1.0, %v849_v29  ;;  %v785_v62 = vor.u32 1.1754944e-38, %v784_v47  ;;  %v801_v17 = vsel %vm798_vm7, %v800_v48, %v796_v38 }
  0xbb   :  { %v831_v30 = vsel %vm828_vm2, %v830_v26, %v826_v23  ;;  %v841_v35 = vsel %vm840_vm3, %v2871_v34, %v837_v28  ;;  %v815_v34 = vor.u32 1.1754944e-38, %v814_v2  ;;  %vm768_vm9 = vcmp.eq.f32.partialorder %v767_v41, 8.507059e+37 }
  0xbc   :  { %v846_v40 = vsel %vm843_vm6, %v845_v7, %v841_v35  ;;  %v878_v57 = vmul.f32 2.0, %v831_v30  ;;  %vm783_vm10 = vcmp.eq.f32.partialorder %v782_v46, 8.507059e+37  ;;  %v771_v54 = vsel %vm768_vm9, %v770_v59, %v766_v50 }
  0xbd   :  { %v879_v58 = vmul.f32 2.0, %v846_v40  ;;  %v816_v51 = vsel %vm813_vm8, %v815_v34, %v811_v39  ;;  %v786_v55 = vsel %vm783_vm10, %v785_v62, %v781_v9  ;;  %v851_v44 = vmul.f32 %v2915_v63, %v850_v49 }
  0xbe   :  { %v2347_v24 = vadd.f32 -1.0, %v878_v57  ;;  %v866_v47 = vmul.f32 %v2906_v53, %v865_v52  ;;  %v882_v1 = vmul.f32 0.0, %v801_v17  ;;  %v883_v3 = vmul.f32 0.0, %v816_v51 }
  0xbf   :  { %v2348_v4 = vadd.f32 -1.0, %v879_v58  ;;  %v852_v46 = vadd.f32 %v2915_v63, %v851_v44  ;;  %vm854_vm11 = vweird.f32 %v2915_v63  ;;  %v859_v10 = vand.u32 2147483648, %v2867_v32 }
  0xc0   :  { %v884_v56 = vmul.f32 %v2347_v24, %v771_v54  ;;  %v867_v37 = vadd.f32 %v2906_v53, %v866_v47  ;;  %vm869_vm5 = vweird.f32 %v2906_v53  ;;  %vm853_vm12 = vweird.f32 %v2867_v32 }
  0xc1   :  { %v885_v41 = vmul.f32 %v2348_v4, %v786_v55  ;;  %v857_v45 = vand.u32 2147483647, %v2867_v32  ;;  %v874_v50 = vand.u32 2147483648, %v2860_v27  ;;  %vm855_vm13 = vmor %vm853_vm12, %vm854_vm11  ;;  %vm868_vm14 = vweird.f32 %v2860_v27 }
  0xc2   :  { %v2985_v5 = vadd.f32 %v884_v56, %v882_v1  ;;  %v872_v6 = vand.u32 2147483647, %v2860_v27  ;;  %v856_v8 = vsel %vm855_vm13, %v2915_v63, %v852_v46  ;;  %vm870_vm15 = vmor %vm868_vm14, %vm869_vm5  ;;  %v860_v13 = vor.u32 1.1754944e-38, %v859_v10 }
  0xc3   :  { %v2987_v0 = vadd.f32 %v885_v41, %v883_v3  ;;  %v871_v15 = vsel %vm870_vm15, %v2906_v53, %v867_v37  ;;  %vm858_vm1 = vcmp.eq.f32.partialorder %v857_v45, 8.507059e+37  ;;  %v875_v2 = vor.u32 1.1754944e-38, %v874_v50 }
  0xc4   :  { %2454 = vtanh.f32 %v2985_v5  ;;  %v861_v21 = vsel %vm858_vm1, %v860_v13, %v856_v8  ;;  %vm873_vm2 = vcmp.eq.f32.partialorder %v872_v6, 8.507059e+37  ;;  %v3004_v32 = vperm.slane %v2761_v12, 5 }
  0xc5   :  { %2456 = vtanh.f32 %v2987_v0  ;;  %v876_v26 = vsel %vm873_vm2, %v875_v2, %v871_v15  ;;  %vm898_vm3 = vcmask 1041409   ;;  %vm901_vm4 = vcmask 17408  }
  0xca   :  { %v2455_v18 = vpop.eup %2454 }
  0xcb   :  { %v2457_v23 = vpop.eup %2456  ;;  %v890_v28 = vmul.f32 %v2455_v18, %v861_v21 }
  0xcc   :  { %v891_v29 = vmul.f32 %v2457_v23, %v876_v26 }
  0xcd   :  { %v893_v27 = vmul.f32 %v3004_v32, %v890_v28 }
  0xce   :  { %v894_v63 = vmul.f32 %v3004_v32, %v891_v29 }
  0xd0   :  { %v897_v11 = vrot.slane %v894_v63, 7 }
  0xd2   :  { %v899_v53 = vsel %vm898_vm3, %v897_v11, %v893_v27 }
  0xd3   :  { %v902_v7 = vsel %vm901_vm4, %v899_v53, 0.0 }
  0xd4   :  { %903 = vadd.xlane.f32.xlu2 %v902_v7 }
 0x10b   :  { %v86_v33 = vpop.permute.xlu1 %85 }
 0x10c   :  { %v138_v35 = vmul.f32 %v86_v33, %v2761_v12  ;;  %v267_v36 = vmul.f32 %v86_v33, %v2767_v14  ;;  %v395_v40 = vmul.f32 %v86_v33, %v2772_v16  ;;  %v523_v34 = vmul.f32 %v86_v33, %v2787_v31 }
 0x10e   :  { %v209_v48 = vsel %vm4510_vm0, %v138_v35, 0.0  ;;  %v337_v52 = vsel %vm4510_vm0, %v267_v36, 0.0  ;;  %v593_v62 = vsel %vm4510_vm0, %v523_v34, 0.0 }
 0x10f   :  { %v210_v59 = vrot.slane %v209_v48, 4  ;;  %v338_v17 = vrot.slane %v337_v52, 4  ;;  %v594_v55 = vrot.slane %v593_v62, 4 }
 0x111   :  { %v211_v54 = vadd.f32 %v210_v59, %v209_v48  ;;  %v339_v47 = vadd.f32 %v338_v17, %v337_v52  ;;  %v595_v10 = vadd.f32 %v594_v55, %v593_v62 }
 0x113   :  { %v30_v30 = vpop.permute.xlu1 %29  ;;  %v212_v46 = vrot.slane %v211_v54, 2  ;;  %v340_v45 = vrot.slane %v339_v47, 2  ;;  %v596_v2 = vrot.slane %v595_v10, 2 }
 0x114   :  { %v130_v9 = vmul.f32 %v30_v30, %v2761_v12  ;;  %v259_v38 = vmul.f32 %v30_v30, %v2767_v14  ;;  %v387_v39 = vmul.f32 %v30_v30, %v2772_v16  ;;  %v515_v49 = vmul.f32 %v30_v30, %v2787_v31 }
 0x115   :  { %v465_v14 = vsel %vm4510_vm0, %v395_v40, 0.0  ;;  %v213_v15 = vadd.f32 %v212_v46, %v211_v54  ;;  %v341_v21 = vadd.f32 %v340_v45, %v339_v47  ;;  %v597_v63 = vadd.f32 %v596_v2, %v595_v10 }
 0x116   :  { %v153_v57 = vsel %vm4510_vm0, %v130_v9, 0.0  ;;  %v281_v58 = vsel %vm4510_vm0, %v259_v38, 0.0  ;;  %v409_v12 = vsel %vm4510_vm0, %v387_v39, 0.0  ;;  %v537_v16 = vsel %vm4510_vm0, %v515_v49, 0.0 }
 0x117   :  { %v154_v51 = vrot.slane %v153_v57, 4  ;;  %v282_v24 = vrot.slane %v281_v58, 4  ;;  %v410_v4 = vrot.slane %v409_v12, 4  ;;  %v466_v31 = vrot.slane %v465_v14, 4 }
 0x118   :  { %v538_v44 = vrot.slane %v537_v16, 4  ;;  %v214_v27 = vrot.slane %v213_v15, 1  ;;  %v342_v53 = vrot.slane %v341_v21, 1  ;;  %v598_v9 = vrot.slane %v597_v63, 1 }
 0x119   :  { %v155_v1 = vadd.f32 %v154_v51, %v153_v57  ;;  %v283_v3 = vadd.f32 %v282_v24, %v281_v58  ;;  %v411_v56 = vadd.f32 %v410_v4, %v409_v12  ;;  %v467_v41 = vadd.f32 %v466_v31, %v465_v14 }
 0x11a   :  { %v539_v37 = vadd.f32 %v538_v44, %v537_v16  ;;  %v215_v36 = vadd.f32 %v214_v27, %v213_v15  ;;  %v343_v39 = vadd.f32 %v342_v53, %v341_v21  ;;  %v599_v52 = vadd.f32 %v598_v9, %v597_v63 }
 0x11b   :  { %v156_v50 = vrot.slane %v155_v1, 2  ;;  %v284_v6 = vrot.slane %v283_v3, 2  ;;  %v412_v8 = vrot.slane %v411_v56, 2  ;;  %v468_v13 = vrot.slane %v467_v41, 2 }
 0x11c   :  { %v540_v18 = vrot.slane %v539_v37, 2  ;;  %v655_v58 = vadd.f32 %v2795_v60, %v215_v36  ;;  %v671_v24 = vadd.f32 %v2804_v19, %v343_v39  ;;  %v703_v45 = vadd.f32 %v2822_v42, %v599_v52 }
 0x11d   :  { %v157_v23 = vadd.f32 %v156_v50, %v155_v1  ;;  %v285_v26 = vadd.f32 %v284_v6, %v283_v3  ;;  %v413_v28 = vadd.f32 %v412_v8, %v411_v56  ;;  %v469_v29 = vadd.f32 %v468_v13, %v467_v41 }
 0x11e   :  { %v541_v11 = vadd.f32 %v540_v18, %v539_v37 }
 0x11f   :  { %v158_v7 = vrot.slane %v157_v23, 1  ;;  %v286_v33 = vrot.slane %v285_v26, 1  ;;  %v414_v30 = vrot.slane %v413_v28, 1  ;;  %v470_v35 = vrot.slane %v469_v29, 1 }
 0x120   :  { %v542_v38 = vrot.slane %v541_v11, 1 }
 0x121   :  { %v159_v40 = vadd.f32 %v158_v7, %v157_v23  ;;  %v287_v48 = vadd.f32 %v286_v33, %v285_v26  ;;  %v415_v34 = vadd.f32 %v414_v30, %v413_v28  ;;  %v471_v49 = vadd.f32 %v470_v35, %v469_v29 }
 0x122   :  { %v543_v57 = vadd.f32 %v542_v38, %v541_v11 }
 0x123   :  { %v647_v17 = vadd.f32 %v2795_v60, %v159_v40  ;;  %v663_v51 = vadd.f32 %v2804_v19, %v287_v48  ;;  %v679_v4 = vadd.f32 %v2810_v22, %v415_v34  ;;  %v687_v31 = vadd.f32 %v2810_v22, %v471_v49 }
 0x124   :  { %v695_v41 = vadd.f32 %v2822_v42, %v543_v57 }
 0x147   :  { %v904_v12 = vpop.xlane.xlu2 %903 }
 0x148   :  { %v905_v59 = vmul.f32 %v904_v12, %v2798_v61  ;;  %v906_v14 = vmul.f32 %v904_v12, %v2807_v20  ;;  %v907_v62 = vmul.f32 %v904_v12, %v2813_v25  ;;  %v908_v16 = vmul.f32 %v904_v12, %v2825_v43 }
 0x14a   :  { %v913_v54 = vrot.slane %v905_v59, 1  ;;  %v914_v55 = vrot.slane %v906_v14, 1  ;;  %v915_v44 = vrot.slane %v907_v62, 1  ;;  %v916_v47 = vrot.slane %v908_v16, 1 }
 0x14b   :  { %v925_v1 = vadd.f32 %v905_v59, %v647_v17  ;;  %v927_v3 = vadd.f32 %v906_v14, %v663_v51  ;;  %v929_v56 = vadd.f32 %v907_v62, %v679_v4  ;;  %v931_v8 = vadd.f32 %v908_v16, %v695_v41 }
 0x14c   :  { %v926_v46 = vadd.f32 %v913_v54, %v655_v58  ;;  %v928_v10 = vadd.f32 %v914_v55, %v671_v24  ;;  %v930_v37 = vadd.f32 %v915_v44, %v687_v31  ;;  %v932_v2 = vadd.f32 %v916_v47, %v703_v45 }
 0x14d   :  { %v2349_v50 = vmul.f32 -1.442695, %v925_v1  ;;  %v2351_v6 = vmul.f32 -1.442695, %v927_v3  ;;  %v2353_v18 = vmul.f32 -1.442695, %v929_v56 }
 0x14e   :  { %v2350_v13 = vmul.f32 -1.442695, %v926_v46  ;;  %v2352_v15 = vmul.f32 -1.442695, %v928_v10  ;;  %v2354_v21 = vmul.f32 -1.442695, %v930_v37 }
 0x14f   :  { %2458 = vpow2.f32 %v2349_v50  ;;  %v2355_v23 = vmul.f32 -1.442695, %v931_v8  ;;  %v2356_v26 = vmul.f32 -1.442695, %v932_v2 }
 0x150   :  { %2460 = vpow2.f32 %v2350_v13 }
 0x151   :  { %2462 = vpow2.f32 %v2351_v6 }
 0x152   :  { %2464 = vpow2.f32 %v2352_v15 }
 0x153   :  { %2466 = vpow2.f32 %v2353_v18 }
 0x154   :  { %2468 = vpow2.f32 %v2354_v21 }
 0x155   :  { %v2459_v28 = vpop.eup %2458  ;;  %2470 = vpow2.f32 %v2355_v23 }
 0x156   :  { %v2461_v29 = vpop.eup %2460  ;;  %v3038_v27 = vadd.f32 1.0, %v2459_v28  ;;  %2472 = vpow2.f32 %v2356_v26 }
 0x157   :  { %v2463_v63 = vpop.eup %2462  ;;  %v3040_v11 = vadd.f32 1.0, %v2461_v29 }
 0x158   :  { %v2465_v53 = vpop.eup %2464  ;;  %v3042_v7 = vadd.f32 1.0, %v2463_v63  ;;  %2474 = vrcp.f32 %v3038_v27  ;;  %v976_v59 = vand.u32 2147483648, %v3038_v27  ;;  %vm970_vm8 = vweird.f32 %v3038_v27 }
 0x159   :  { %v2467_v33 = vpop.eup %2466  ;;  %v3045_v30 = vadd.f32 1.0, %v2465_v53  ;;  %2476 = vrcp.f32 %v3040_v11  ;;  %v991_v14 = vand.u32 2147483648, %v3040_v11  ;;  %vm985_vm10 = vweird.f32 %v3040_v11 }
 0x15a   :  { %v2469_v35 = vpop.eup %2468  ;;  %v961_v36 = vadd.f32 1.0, %v2467_v33  ;;  %2478 = vrcp.f32 %v3042_v7  ;;  %v1006_v58 = vand.u32 2147483648, %v3042_v7  ;;  %vm1000_vm6 = vweird.f32 %v3042_v7 }
 0x15b   :  { %v3049_v9 = vadd.f32 1.0, %v2469_v35  ;;  %2480 = vrcp.f32 %v3045_v30  ;;  %v2471_v38 = vpop.eup %2470  ;;  %v1021_v4 = vand.u32 2147483648, %v3045_v30  ;;  %vm1015_vm9 = vweird.f32 %v3045_v30 }
 0x15c   :  { %2482 = vrcp.f32 %v961_v36  ;;  %v2473_v39 = vpop.eup %2472  ;;  %v3057_v34 = vadd.f32 1.0, %v2471_v38  ;;  %vm1030_vm7 = vweird.f32 %v961_v36  ;;  %v1007_v47 = vor.u32 1.1754944e-38, %v1006_v58 }
 0x15d   :  { %2484 = vrcp.f32 %v3049_v9  ;;  %v3074_v17 = vadd.f32 1.0, %v2473_v39  ;;  %v1034_v3 = vand.u32 2147483647, %v961_v36  ;;  %v1036_v46 = vand.u32 2147483648, %v961_v36 }
 0x15e   :  { %v3052_v40 = vpop.eup %2474  ;;  %2486 = vrcp.f32 %v3057_v34  ;;  %vm1045_vm11 = vweird.f32 %v3049_v9  ;;  %v1051_v45 = vand.u32 2147483648, %v3049_v9  ;;  %v1004_v63 = vand.u32 2147483647, %v3042_v7 }
 0x15f   :  { %v3055_v48 = vpop.eup %2476  ;;  %v966_v49 = vmul.f32 %v3052_v40, %v3038_v27  ;;  %2488 = vrcp.f32 %v3074_v17  ;;  %vm971_vm12 = vweird.f32 %v3052_v40  ;;  %vm3097_vm14 = vcmp.eq.f32.partialorder %v1034_v3, 8.507059e+37 }
 0x160   :  { %v3061_v52 = vpop.eup %2478  ;;  %v981_v57 = vmul.f32 %v3055_v48, %v3040_v11  ;;  %v1037_v28 = vor.u32 1.1754944e-38, %v1036_v46  ;;  %v1049_v38 = vand.u32 2147483647, %v3049_v9 }
 0x161   :  { %v3066_v12 = vpop.eup %2480  ;;  %v996_v62 = vmul.f32 %v3061_v52, %v3042_v7  ;;  %v967_v51 = vsub.f32 1.0, %v966_v49  ;;  %vm1001_vm13 = vweird.f32 %v3061_v52  ;;  %v1052_v49 = vor.u32 1.1754944e-38, %v1051_v45 }
 0x162   :  { %v3072_v16 = vpop.eup %2482  ;;  %v1011_v24 = vmul.f32 %v3066_v12, %v3045_v30  ;;  %v982_v44 = vsub.f32 1.0, %v981_v57  ;;  %vm1016_vm2 = vweird.f32 %v3066_v12  ;;  %vm3115_vm0 = vmor %vm1000_vm6, %vm1001_vm13  ;;  %vm986_vm6 = vweird.f32 %v3055_v48 }
 0x163   :  { %v997_v31 = vsub.f32 1.0, %v996_v62  ;;  %v1026_v54 = vmul.f32 %v3072_v16, %v961_v36  ;;  %v2485_v55 = vpop.eup %2484  ;;  %v968_v37 = vmul.f32 %v3052_v40, %v967_v51  ;;  %vm1031_vm5 = vweird.f32 %v3072_v16 }
 0x164   :  { %v1012_v1 = vsub.f32 1.0, %v1011_v24  ;;  %v1041_v10 = vmul.f32 %v2485_v55, %v3049_v9  ;;  %v983_v13 = vmul.f32 %v3055_v48, %v982_v44  ;;  %v3101_v2 = vpop.eup %2486  ;;  %vm1046_vm15 = vweird.f32 %v2485_v55  ;;  %vm3106_vm1 = vmor %vm1030_vm7, %vm1031_vm5  ;;  %v3227_v44 = vld [vmem:[%s4508_s1 + $0x10] sm:$0x3f] }
 0x165   :  { %v998_v56 = vmul.f32 %v3061_v52, %v997_v31  ;;  %v1027_v41 = vsub.f32 1.0, %v1026_v54  ;;  %v969_v29 = vadd.f32 %v3052_v40, %v968_v37  ;;  %v3124_v39 = vpop.eup %2488  ;;  %vm1047_vm7 = vmor %vm1045_vm11, %vm1046_vm15  ;;  %v1056_v57 = vmul.f32 %v3101_v2, %v3057_v34  ;;  %v3215_v31 = vld [vmem:[%s4508_s1] sm:$0x3f] }
 0x166   :  { %v1013_v50 = vmul.f32 %v3066_v12, %v1012_v1  ;;  %v1042_v8 = vsub.f32 1.0, %v1041_v10  ;;  %v984_v7 = vadd.f32 %v3055_v48, %v983_v13  ;;  %vm3136_vm5 = vmor %vm970_vm8, %vm971_vm12  ;;  %v1019_v62 = vand.u32 2147483647, %v3045_v30  ;;  %v3182_v30 = vld [vmem:[%s4507_s0 + $0x8] sm:$0xff] }
 0x167   :  { %v1028_v6 = vmul.f32 %v3072_v16, %v1027_v41  ;;  %v999_v23 = vadd.f32 %v3061_v52, %v998_v56  ;;  %vm1050_vm11 = vcmp.eq.f32.partialorder %v1049_v38, 8.507059e+37  ;;  %v974_v51 = vand.u32 2147483647, %v3038_v27  ;;  %vm3150_vm8 = vmor %vm1015_vm9, %vm1016_vm2 }
 0x168   :  { %v1043_v21 = vmul.f32 %v2485_v55, %v1042_v8  ;;  %v1014_v33 = vadd.f32 %v3066_v12, %v1013_v50  ;;  %v989_v24 = vand.u32 2147483647, %v3040_v11  ;;  %vm1005_vm12 = vcmp.eq.f32.partialorder %v1004_v63, 8.507059e+37 }
 0x169   :  { %v1029_v18 = vadd.f32 %v3072_v16, %v1028_v6  ;;  %v1003_v9 = vsel %vm3115_vm0, %v3061_v52, %v999_v23  ;;  %vm3161_vm0 = vmor %vm985_vm10, %vm986_vm6  ;;  %v1071_v3 = vmul.f32 %v3124_v39, %v3074_v17  ;;  %v1057_v46 = vsub.f32 1.0, %v1056_v57 }
 0x16a   :  { %v1044_v36 = vadd.f32 %v2485_v55, %v1043_v21  ;;  %v1018_v1 = vsel %vm3150_vm8, %v3066_v12, %v1014_v33  ;;  %v988_v56 = vsel %vm3161_vm0, %v3055_v48, %v984_v7  ;;  %v1008_v41 = vsel %vm1005_vm12, %v1007_v47, %v1003_v9 }
 0x16b   :  { %v1033_v35 = vsel %vm3106_vm1, %v3072_v16, %v1029_v18  ;;  %vm1020_vm9 = vcmp.eq.f32.partialorder %v1019_v62, 8.507059e+37  ;;  %v1072_v10 = vsub.f32 1.0, %v1071_v3  ;;  %v977_v50 = vor.u32 1.1754944e-38, %v976_v59 }
 0x16c   :  { %v1048_v16 = vsel %vm1047_vm7, %v2485_v55, %v1044_v36  ;;  %v1038_v54 = vsel %vm3097_vm14, %v1037_v28, %v1033_v35  ;;  %v973_v55 = vsel %vm3136_vm5, %v3052_v40, %v969_v29  ;;  %v1022_v40 = vor.u32 1.1754944e-38, %v1021_v4 }
 0x16d   :  { %v1053_v52 = vsel %vm1050_vm11, %v1052_v49, %v1048_v16  ;;  %v1085_v37 = vmul.f32 2.0, %v1038_v54  ;;  %vm975_vm10 = vcmp.eq.f32.partialorder %v974_v51, 8.507059e+37  ;;  %v992_v12 = vor.u32 1.1754944e-38, %v991_v14  ;;  %v37_v51 = vpop.permute.xlu0 %36 }
 0x16e   :  { %v1086_v45 = vmul.f32 2.0, %v1053_v52  ;;  %v1023_v6 = vsel %vm1020_vm9, %v1022_v40, %v1018_v1  ;;  %vm990_vm13 = vcmp.eq.f32.partialorder %v989_v24, 8.507059e+37  ;;  %v87_v4 = vperm.slane %v3182_v30, 2  ;;  %v3221_v52 = vld [vmem:[%s4508_s1 + $0x8] sm:$0x3f] }
 0x16f   :  { %v2357_v8 = vadd.f32 -1.0, %v1085_v37  ;;  %v978_v47 = vsel %vm975_vm10, %v977_v50, %v973_v55  ;;  %v993_v13 = vsel %vm990_vm13, %v992_v12, %v988_v56  ;;  %v1058_v27 = vmul.f32 %v3101_v2, %v1057_v46 }
 0x170   :  { %v2358_v48 = vadd.f32 -1.0, %v1086_v45  ;;  %v1089_v59 = vmul.f32 %v1008_v41, %v2985_v5  ;;  %v1073_v11 = vmul.f32 %v3124_v39, %v1072_v10  ;;  %v1090_v14 = vmul.f32 %v1023_v6, %v2987_v0  ;;  %92 = vperm.xlu2 %2421, %v87_v4  }
 0x171   :  { %v1091_v15 = vmul.f32 %v2357_v8, %v978_v47  ;;  %vm1061_vm14 = vweird.f32 %v3101_v2  ;;  %v1059_v26 = vadd.f32 %v3101_v2, %v1058_v27  ;;  %vm1076_vm15 = vweird.f32 %v3124_v39  ;;  %v3242_v8 = vld [vmem:[%s4508_s1 + $0x18] sm:$0x3f] }
 0x172   :  { %v1092_v18 = vmul.f32 %v2358_v48, %v993_v13  ;;  %v1074_v28 = vadd.f32 %v3124_v39, %v1073_v11  ;;  %vm1060_vm1 = vweird.f32 %v3057_v34  ;;  %v1066_v5 = vand.u32 2147483648, %v3057_v34 }
 0x173   :  { %v3189_v21 = vadd.f32 %v1091_v15, %v1089_v59  ;;  %v1081_v0 = vand.u32 2147483648, %v3074_v17  ;;  %vm1062_vm2 = vmor %vm1060_vm1, %vm1061_vm14  ;;  %v1064_v29 = vand.u32 2147483647, %v3057_v34  ;;  %vm1075_vm7 = vweird.f32 %v3074_v17 }
 0x174   :  { %v3191_v23 = vadd.f32 %v1092_v18, %v1090_v14  ;;  %v1079_v63 = vand.u32 2147483647, %v3074_v17  ;;  %vm1077_vm6 = vmor %vm1075_vm7, %vm1076_vm15  ;;  %v1063_v53 = vsel %vm1062_vm2, %v3101_v2, %v1059_v26  ;;  %v1067_v35 = vor.u32 1.1754944e-38, %v1066_v5 }
 0x175   :  { %2490 = vtanh.f32 %v3189_v21  ;;  %v1078_v33 = vsel %vm1077_vm6, %v3124_v39, %v1074_v28  ;;  %v1082_v36 = vor.u32 1.1754944e-38, %v1081_v0  ;;  %vm1065_vm5 = vcmp.eq.f32.partialorder %v1064_v29, 8.507059e+37 }
 0x176   :  { %2492 = vtanh.f32 %v3191_v23  ;;  %vm1080_vm11 = vcmp.eq.f32.partialorder %v1079_v63, 8.507059e+37  ;;  %v1068_v7 = vsel %vm1065_vm5, %v1067_v35, %v1063_v53  ;;  %v108_v39 = vperm.slane %v3182_v30, 5 }
 0x177   :  { %v1083_v57 = vsel %vm1080_vm11, %v1082_v36, %v1078_v33  ;;  %v131_v54 = vmul.f32 %v3215_v31, %v37_v51  ;;  %v260_v55 = vmul.f32 %v3221_v52, %v37_v51  ;;  %v388_v1 = vmul.f32 %v3227_v44, %v37_v51 }
 0x178   :  { %vm4531_vm8 = vcmask 18432   ;;  %v516_v48 = vmul.f32 %v3242_v8, %v37_v51 }
 0x179   :  { %v160_v40 = vsel %vm4531_vm8, %v131_v54, 0.0  ;;  %vm4532_vm0 = vmmov %vm4531_vm8 }
 0x17a   :  { %v288_v46 = vsel %vm4532_vm0, %v260_v55, 0.0  ;;  %vm4533_vm12 = vmmov %vm4532_vm0  ;;  %v161_v50 = vrot.slane %v160_v40, 4 }
 0x17b   :  { %v2491_v38 = vpop.eup %2490  ;;  %v416_v10 = vsel %vm4533_vm12, %v388_v1, 0.0  ;;  %vm4534_vm9 = vmmov %vm4532_vm0  ;;  %v289_v6 = vrot.slane %v288_v46, 4 }
 0x17c   :  { %v2493_v49 = vpop.eup %2492  ;;  %v1097_v58 = vmul.f32 %v2491_v38, %v1068_v7  ;;  %vm4535_vm10 = vmmov %vm4532_vm0  ;;  %v417_v4 = vrot.slane %v416_v10, 4  ;;  %v162_v59 = vadd.f32 %v161_v50, %v160_v40 }
 0x17d   :  { %v1098_v9 = vmul.f32 %v2493_v49, %v1083_v57  ;;  %vm4536_vm13 = vmmov %vm4532_vm0  ;;  %v290_v11 = vadd.f32 %v289_v6, %v288_v46 }
 0x17e   :  { %v1099_v62 = vmul.f32 %v1097_v58, %v3004_v32  ;;  %vm4537_vm14 = vmmov %vm4532_vm0  ;;  %v418_v15 = vadd.f32 %v417_v4, %v416_v10  ;;  %v163_v0 = vrot.slane %v162_v59, 2 }
 0x17f   :  { %v1100_v34 = vmul.f32 %v1098_v9, %v3004_v32  ;;  %v544_v14 = vsel %vm4537_vm14, %v516_v48, 0.0  ;;  %v291_v63 = vrot.slane %v290_v11, 2  ;;  %vm4538_vm15 = vmmov %vm4532_vm0 }
 0x180   :  { %v545_v29 = vrot.slane %v544_v14, 4  ;;  %v419_v53 = vrot.slane %v418_v15, 2  ;;  %v164_v49 = vadd.f32 %v163_v0, %v162_v59 }
 0x181   :  { %v1103_v17 = vrot.slane %v1100_v34, 7  ;;  %v292_v57 = vadd.f32 %v291_v63, %v290_v11 }
 0x182   :  { %v546_v7 = vadd.f32 %v545_v29, %v544_v14  ;;  %v420_v58 = vadd.f32 %v419_v53, %v418_v15 }
 0x183   :  { %v1104_v16 = vsel %vm898_vm3, %v1103_v17, %v1099_v62 }
 0x184   :  { %v1106_v2 = vsel %vm901_vm4, %v1104_v16, 0.0  ;;  %v165_v16 = vrot.slane %v164_v49, 1  ;;  %v421_v51 = vrot.slane %v420_v58, 1 }
 0x185   :  { %1107 = vadd.xlane.f32.xlu1 %v1106_v2  ;;  %v547_v2 = vrot.slane %v546_v7, 2 }
 0x19e   :  { %113 = vperm.xlu1 %2420, %v108_v39   ;;  %v293_v39 = vrot.slane %v292_v57, 1 }
 0x1ca   :  { %v93_v24 = vpop.permute.xlu2 %92 }
 0x1cb   :  { %v139_v3 = vmul.f32 %v3215_v31, %v93_v24  ;;  %v268_v56 = vmul.f32 %v3221_v52, %v93_v24  ;;  %v396_v41 = vmul.f32 %v3227_v44, %v93_v24  ;;  %v524_v5 = vmul.f32 %v3242_v8, %v93_v24 }
 0x1cd   :  { %v216_v37 = vsel %vm4534_vm9, %v139_v3, 0.0  ;;  %v344_v45 = vsel %vm4535_vm10, %v268_v56, 0.0  ;;  %v472_v12 = vsel %vm4536_vm13, %v396_v41, 0.0  ;;  %v600_v38 = vsel %vm4538_vm15, %v524_v5, 0.0 }
 0x1ce   :  { %v217_v47 = vrot.slane %v216_v37, 4  ;;  %v345_v13 = vrot.slane %v344_v45, 4  ;;  %v473_v27 = vrot.slane %v472_v12, 4  ;;  %v601_v62 = vrot.slane %v600_v38, 4 }
 0x1cf   :  { %v548_v3 = vadd.f32 %v547_v2, %v546_v7  ;;  %v166_v56 = vadd.f32 %v165_v16, %v164_v49  ;;  %v294_v41 = vadd.f32 %v293_v39, %v292_v57 }
 0x1d0   :  { %v218_v18 = vadd.f32 %v217_v47, %v216_v37  ;;  %v346_v26 = vadd.f32 %v345_v13, %v344_v45  ;;  %v474_v28 = vadd.f32 %v473_v27, %v472_v12  ;;  %v602_v55 = vadd.f32 %v601_v62, %v600_v38 }
 0x1d1   :  { %v422_v37 = vadd.f32 %v421_v51, %v420_v58  ;;  %v549_v50 = vrot.slane %v548_v3, 1  ;;  %v648_v6 = vadd.f32 %v2795_v60, %v166_v56  ;;  %v664_v48 = vadd.f32 %v2804_v19, %v294_v41 }
 0x1d2   :  { %v219_v33 = vrot.slane %v218_v18, 2  ;;  %v347_v35 = vrot.slane %v346_v26, 2  ;;  %v475_v36 = vrot.slane %v474_v28, 2  ;;  %v603_v10 = vrot.slane %v602_v55, 2 }
 0x1d3   :  { %v680_v14 = vadd.f32 %v2810_v22, %v422_v37  ;;  %v550_v5 = vadd.f32 %v549_v50, %v548_v3 }
 0x1d4   :  { %v220_v9 = vadd.f32 %v219_v33, %v218_v18  ;;  %v348_v34 = vadd.f32 %v347_v35, %v346_v26  ;;  %v476_v17 = vadd.f32 %v475_v36, %v474_v28  ;;  %v604_v27 = vadd.f32 %v603_v10, %v602_v55 }
 0x1d6   :  { %v221_v24 = vrot.slane %v220_v9, 1  ;;  %v349_v54 = vrot.slane %v348_v34, 1  ;;  %v477_v1 = vrot.slane %v476_v17, 1  ;;  %v605_v7 = vrot.slane %v604_v27, 1 }
 0x1d8   :  { %v222_v40 = vadd.f32 %v221_v24, %v220_v9  ;;  %v350_v46 = vadd.f32 %v349_v54, %v348_v34  ;;  %v478_v45 = vadd.f32 %v477_v1, %v476_v17  ;;  %v696_v9 = vadd.f32 %v2822_v42, %v550_v5 }
 0x1d9   :  { %v606_v16 = vadd.f32 %v605_v7, %v604_v27 }
 0x1da   :  { %v656_v59 = vadd.f32 %v2795_v60, %v222_v40  ;;  %v672_v11 = vadd.f32 %v2804_v19, %v350_v46  ;;  %v688_v15 = vadd.f32 %v2810_v22, %v478_v45 }
 0x1db   :  { %v704_v54 = vadd.f32 %v2822_v42, %v606_v16 }
 0x1f8   :  { %v1108_v12 = vpop.xlane.xlu1 %1107 }
 0x1f9   :  { %v1109_v4 = vmul.f32 %v1108_v12, %v2798_v61  ;;  %v1110_v47 = vmul.f32 %v1108_v12, %v2807_v20  ;;  %v1111_v13 = vmul.f32 %v1108_v12, %v2813_v25  ;;  %v1112_v36 = vmul.f32 %v1108_v12, %v2825_v43 }
 0x1fb   :  { %v1117_v18 = vrot.slane %v1109_v4, 1  ;;  %v1118_v26 = vrot.slane %v1110_v47, 1  ;;  %v1119_v28 = vrot.slane %v1111_v13, 1  ;;  %v1129_v0 = vadd.f32 %v1109_v4, %v648_v6 }
 0x1fc   :  { %v1131_v29 = vadd.f32 %v1110_v47, %v664_v48  ;;  %v1133_v63 = vadd.f32 %v1111_v13, %v680_v14  ;;  %v1135_v17 = vadd.f32 %v1112_v36, %v696_v9  ;;  %v1120_v2 = vrot.slane %v1112_v36, 1 }
 0x1fd   :  { %v1130_v53 = vadd.f32 %v1117_v18, %v656_v59  ;;  %v1132_v33 = vadd.f32 %v1118_v26, %v672_v11  ;;  %v1134_v35 = vadd.f32 %v1119_v28, %v688_v15  ;;  %v2359_v38 = vmul.f32 -1.442695, %v1129_v0 }
 0x1fe   :  { %v2361_v49 = vmul.f32 -1.442695, %v1131_v29  ;;  %v2363_v34 = vmul.f32 -1.442695, %v1133_v63  ;;  %v2365_v51 = vmul.f32 -1.442695, %v1135_v17  ;;  %v1136_v56 = vadd.f32 %v1120_v2, %v704_v54 }
 0x1ff   :  { %v2360_v57 = vmul.f32 -1.442695, %v1130_v53  ;;  %v2362_v58 = vmul.f32 -1.442695, %v1132_v33  ;;  %2494 = vpow2.f32 %v2359_v38  ;;  %v2364_v62 = vmul.f32 -1.442695, %v1134_v35 }
 0x200   :  { %v2366_v12 = vmul.f32 -1.442695, %v1136_v56 }
 0x201   :  { %2496 = vpow2.f32 %v2360_v57 }
 0x202   :  { %2498 = vpow2.f32 %v2361_v49 }
 0x203   :  { %2500 = vpow2.f32 %v2362_v58 }
 0x204   :  { %2502 = vpow2.f32 %v2363_v34 }
 0x205   :  { %2504 = vpow2.f32 %v2364_v62  ;;  %v2495_v39 = vpop.eup %2494 }
 0x206   :  { %v3260_v55 = vadd.f32 1.0, %v2495_v39  ;;  %2506 = vpow2.f32 %v2365_v51 }
 0x207   :  { %v2497_v24 = vpop.eup %2496 }
 0x208   :  { %v2499_v1 = vpop.eup %2498  ;;  %2508 = vrcp.f32 %v3260_v55  ;;  %v3269_v45 = vadd.f32 1.0, %v2497_v24  ;;  %vm1174_vm1 = vweird.f32 %v3260_v55  ;;  %v1180_v7 = vand.u32 2147483648, %v3260_v55 }
 0x209   :  { %v2501_v3 = vpop.eup %2500  ;;  %v3262_v41 = vadd.f32 1.0, %v2499_v1  ;;  %v1178_v56 = vand.u32 2147483647, %v3260_v55 }
 0x20a   :  { %v2503_v40 = vpop.eup %2502  ;;  %v3264_v46 = vadd.f32 1.0, %v2501_v3  ;;  %v1195_v58 = vand.u32 2147483648, %v3269_v45  ;;  %vm1189_vm5 = vweird.f32 %v3269_v45 }
 0x20b   :  { %v2505_v10 = vpop.eup %2504  ;;  %v3266_v37 = vadd.f32 1.0, %v2503_v40  ;;  %2510 = vrcp.f32 %v3262_v41  ;;  %v1210_v35 = vand.u32 2147483648, %v3262_v41  ;;  %vm1204_vm2 = vweird.f32 %v3262_v41 }
 0x20c   :  { %v3271_v50 = vadd.f32 1.0, %v2505_v10  ;;  %v2507_v6 = vpop.eup %2506  ;;  %vm1219_vm7 = vweird.f32 %v3264_v46  ;;  %v1225_v34 = vand.u32 2147483648, %v3264_v46 }
 0x20d   :  { %2512 = vrcp.f32 %v3266_v37  ;;  %v3296_v26 = vadd.f32 1.0, %v2507_v6  ;;  %vm1234_vm6 = vweird.f32 %v3266_v37  ;;  %v1211_v17 = vor.u32 1.1754944e-38, %v1210_v35 }
 0x20e   :  { %2514 = vrcp.f32 %v3264_v46  ;;  %v3278_v48 = vpop.eup %2508  ;;  %v1238_v16 = vand.u32 2147483647, %v3266_v37  ;;  %v1240_v2 = vand.u32 2147483648, %v3266_v37  ;;  %vm1249_vm0 = vweird.f32 %v3271_v50 }
 0x20f   :  { %2516 = vrcp.f32 %v3271_v50  ;;  %v1170_v18 = vmul.f32 %v3278_v48, %v3260_v55  ;;  %v1255_v1 = vand.u32 2147483648, %v3271_v50  ;;  %vm1175_vm12 = vweird.f32 %v3278_v48 }
 0x210   :  { %2518 = vrcp.f32 %v3269_v45  ;;  %vm3342_vm13 = vcmp.eq.f32.partialorder %v1238_v16, 8.507059e+37  ;;  %v1241_v6 = vor.u32 1.1754944e-38, %v1240_v2  ;;  %v1226_v2 = vor.u32 1.1754944e-38, %v1225_v34 }
 0x211   :  { %2520 = vpow2.f32 %v2366_v12  ;;  %v3280_v4 = vpop.eup %2510  ;;  %v1171_v33 = vsub.f32 1.0, %v1170_v18 }
 0x212   :  { %v1200_v14 = vmul.f32 %v3280_v4, %v3262_v41  ;;  %2522 = vrcp.f32 %v3296_v26  ;;  %vm1205_vm8 = vweird.f32 %v3280_v4 }
 0x213   :  { %v3282_v47 = vpop.eup %2512  ;;  %v1172_v62 = vmul.f32 %v3278_v48, %v1171_v33  ;;  %vm3352_vm14 = vmor %vm1204_vm2, %vm1205_vm8  ;;  %v1256_v33 = vor.u32 1.1754944e-38, %v1255_v1  ;;  %v1181_v1 = vor.u32 1.1754944e-38, %v1180_v7 }
 0x214   :  { %v3284_v13 = vpop.eup %2514  ;;  %v1230_v27 = vmul.f32 %v3282_v47, %v3266_v37  ;;  %v1201_v53 = vsub.f32 1.0, %v1200_v14  ;;  %vm1235_vm11 = vweird.f32 %v3282_v47  ;;  %v1208_v14 = vand.u32 2147483647, %v3262_v41 }
 0x215   :  { %v3288_v59 = vpop.eup %2516  ;;  %v1215_v28 = vmul.f32 %v3284_v13, %v3264_v46  ;;  %vm3338_vm10 = vmor %vm1234_vm6, %vm1235_vm11  ;;  %vm1220_vm15 = vweird.f32 %v3284_v13 }
 0x216   :  { %v3290_v11 = vpop.eup %2518  ;;  %v1231_v5 = vsub.f32 1.0, %v1230_v27  ;;  %v1245_v0 = vmul.f32 %v3288_v59, %v3271_v50  ;;  %v1202_v9 = vmul.f32 %v3280_v4, %v1201_v53  ;;  %vm1250_vm9 = vweird.f32 %v3288_v59  ;;  %vm3377_vm11 = vmor %vm1174_vm1, %vm1175_vm12 }
 0x217   :  { %v2521_v15 = vpop.eup %2520  ;;  %v1185_v29 = vmul.f32 %v3290_v11, %v3269_v45  ;;  %v1216_v36 = vsub.f32 1.0, %v1215_v28  ;;  %v1173_v27 = vadd.f32 %v3278_v48, %v1172_v62  ;;  %vm3364_vm6 = vmor %vm1249_vm0, %vm1250_vm9  ;;  %vm1190_vm2 = vweird.f32 %v3290_v11 }
 0x218   :  { %v3304_v63 = vadd.f32 1.0, %v2521_v15  ;;  %v1232_v38 = vmul.f32 %v3282_v47, %v1231_v5  ;;  %v1246_v49 = vsub.f32 1.0, %v1245_v0  ;;  %v3330_v3 = vpop.eup %2522  ;;  %v1203_v40 = vadd.f32 %v3280_v4, %v1202_v9  ;;  %vm3393_vm1 = vmor %vm1219_vm7, %vm1220_vm15 }
 0x219   :  { %v1186_v57 = vsub.f32 1.0, %v1185_v29  ;;  %v1217_v39 = vmul.f32 %v3284_v13, %v1216_v36  ;;  %v1253_v29 = vand.u32 2147483647, %v3271_v50  ;;  %v1260_v53 = vmul.f32 %v3330_v3, %v3296_v26  ;;  %vm3403_vm0 = vmor %vm1189_vm5, %vm1190_vm2 }
 0x21a   :  { %2524 = vrcp.f32 %v3304_v63  ;;  %v1233_v51 = vadd.f32 %v3282_v47, %v1232_v38  ;;  %v1247_v24 = vmul.f32 %v3288_v59, %v1246_v49  ;;  %v1207_v35 = vsel %vm3352_vm14, %v3280_v4, %v1203_v40 }
 0x21b   :  { %v1187_v54 = vmul.f32 %v3290_v11, %v1186_v57  ;;  %v1218_v37 = vadd.f32 %v3284_v13, %v1217_v39  ;;  %v1223_v36 = vand.u32 2147483647, %v3264_v46  ;;  %v1177_v38 = vsel %vm3377_vm11, %v3278_v48, %v1173_v27 }
 0x21c   :  { %v1237_v28 = vsel %vm3338_vm10, %v3282_v47, %v1233_v51  ;;  %v1248_v5 = vadd.f32 %v3288_v59, %v1247_v24  ;;  %vm1254_vm8 = vcmp.eq.f32.partialorder %v1253_v29, 8.507059e+37  ;;  %v1193_v48 = vand.u32 2147483647, %v3269_v45 }
 0x21d   :  { %v1188_v41 = vadd.f32 %v3290_v11, %v1187_v54  ;;  %v1242_v57 = vsel %vm3342_vm13, %v1241_v6, %v1237_v28  ;;  %vm1209_vm12 = vcmp.eq.f32.partialorder %v1208_v14, 8.507059e+37  ;;  %v1222_v46 = vsel %vm3393_vm1, %v3284_v13, %v1218_v37 }
 0x21e   :  { %v1252_v50 = vsel %vm3364_vm6, %v3288_v59, %v1248_v5  ;;  %v1212_v16 = vsel %vm1209_vm12, %v1211_v17, %v1207_v35  ;;  %v1261_v39 = vsub.f32 1.0, %v1260_v53  ;;  %vm1224_vm7 = vcmp.eq.f32.partialorder %v1223_v36, 8.507059e+37  ;;  %v100_v59 = vpop.permute.xlu0 %99 }
 0x21f   :  { %v1257_v9 = vsel %vm1254_vm8, %v1256_v33, %v1252_v50  ;;  %v1192_v62 = vsel %vm3403_vm0, %v3290_v11, %v1188_v41  ;;  %v1289_v24 = vmul.f32 2.0, %v1242_v57  ;;  %v1196_v40 = vor.u32 1.1754944e-38, %v1195_v58 }
 0x220   :  { %v3348_v15 = vpop.eup %2524  ;;  %v1290_v54 = vmul.f32 2.0, %v1257_v9  ;;  %v1227_v10 = vsel %vm1224_vm7, %v1226_v2, %v1222_v46  ;;  %vm1179_vm5 = vcmp.eq.f32.partialorder %v1178_v56, 8.507059e+37  ;;  %vm1194_vm9 = vcmp.eq.f32.partialorder %v1193_v48, 8.507059e+37 }
 0x221   :  { %v1275_v4 = vmul.f32 %v3348_v15, %v3304_v63  ;;  %v2367_v13 = vadd.f32 -1.0, %v1289_v24  ;;  %v1182_v6 = vsel %vm1179_vm5, %v1181_v1, %v1177_v38  ;;  %v1197_v11 = vsel %vm1194_vm9, %v1196_v40, %v1192_v62 }
 0x222   :  { %v2368_v12 = vadd.f32 -1.0, %v1290_v54  ;;  %v1262_v34 = vmul.f32 %v3330_v3, %v1261_v39  ;;  %v1293_v17 = vmul.f32 %v1212_v16, %v3189_v21  ;;  %v1294_v14 = vmul.f32 %v1227_v10, %v3191_v23 }
 0x223   :  { %v1276_v51 = vsub.f32 1.0, %v1275_v4  ;;  %v1295_v55 = vmul.f32 %v2367_v13, %v1182_v6  ;;  %vm1265_vm10 = vweird.f32 %v3330_v3  ;;  %vm1280_vm13 = vweird.f32 %v3348_v15 }
 0x224   :  { %v1296_v7 = vmul.f32 %v2368_v12, %v1197_v11  ;;  %v1263_v58 = vadd.f32 %v3330_v3, %v1262_v34  ;;  %vm1264_vm14 = vweird.f32 %v3296_v26  ;;  %v1270_v21 = vand.u32 2147483648, %v3296_v26 }
 0x225   :  { %v1277_v27 = vmul.f32 %v3348_v15, %v1276_v51  ;;  %v3422_v18 = vadd.f32 %v1295_v55, %v1293_v17  ;;  %v1285_v23 = vand.u32 2147483648, %v3304_v63  ;;  %vm1266_vm15 = vmor %vm1264_vm14, %vm1265_vm10  ;;  %v1268_v37 = vand.u32 2147483647, %v3296_v26 }
 0x226   :  { %v3424_v45 = vadd.f32 %v1296_v7, %v1294_v14  ;;  %vm1279_vm6 = vweird.f32 %v3304_v63  ;;  %v1283_v28 = vand.u32 2147483647, %v3304_v63  ;;  %v1267_v5 = vsel %vm1266_vm15, %v3330_v3, %v1263_v58  ;;  %v44_v48 = vpop.permute.xlu0 %43 }
 0x227   :  { %v1278_v56 = vadd.f32 %v3348_v15, %v1277_v27  ;;  %2526 = vtanh.f32 %v3422_v18  ;;  %vm1281_vm2 = vmor %vm1279_vm6, %vm1280_vm13  ;;  %v1271_v41 = vor.u32 1.1754944e-38, %v1270_v21  ;;  %v1286_v29 = vor.u32 1.1754944e-38, %v1285_v23 }
 0x228   :  { %2528 = vtanh.f32 %v3424_v45  ;;  %vm1269_vm11 = vcmp.eq.f32.partialorder %v1268_v37, 8.507059e+37  ;;  %vm1284_vm1 = vcmp.eq.f32.partialorder %v1283_v28, 8.507059e+37  ;;  %v115_v4 = vperm.slane %v3182_v30, 6 }
 0x229   :  { %v1282_v0 = vsel %vm1281_vm2, %v3348_v15, %v1278_v56  ;;  %v1272_v33 = vsel %vm1269_vm11, %v1271_v41, %v1267_v5  ;;  %v3447_v15 = vld [vmem:[%s4507_s0] sm:$0xff]  ;;  %v132_v46 = vmul.f32 %v3215_v31, %v44_v48  ;;  %v140_v9 = vmul.f32 %v3215_v31, %v100_v59 }
 0x22a   :  { %v1287_v35 = vsel %vm1284_vm1, %v1286_v29, %v1282_v0  ;;  %v52_v57 = vperm.slane %v3447_v15, 5  ;;  %v269_v62 = vmul.f32 %v3221_v52, %v100_v59  ;;  %v261_v16 = vmul.f32 %v3221_v52, %v44_v48 }
 0x22b   :  { %v389_v2 = vmul.f32 %v3227_v44, %v44_v48  ;;  %v397_v39 = vmul.f32 %v3227_v44, %v100_v59  ;;  %vm4553_vm8 = vcmask 18432   ;;  %v517_v10 = vmul.f32 %v3242_v8, %v44_v48 }
 0x22c   :  { %v167_v51 = vsel %vm4553_vm8, %v132_v46, 0.0  ;;  %vm4554_vm0 = vmmov %vm4553_vm8  ;;  %v525_v56 = vmul.f32 %v3242_v8, %v100_v59 }
 0x22d   :  { %v2527_v53 = vpop.eup %2526  ;;  %v223_v24 = vsel %vm4554_vm0, %v140_v9, 0.0  ;;  %vm4555_vm12 = vmmov %vm4554_vm0  ;;  %v168_v40 = vrot.slane %v167_v51, 4 }
 0x22e   :  { %v2529_v47 = vpop.eup %2528  ;;  %v1301_v36 = vmul.f32 %v2527_v53, %v1272_v33  ;;  %v351_v30 = vsel %vm4555_vm12, %v269_v62, 0.0  ;;  %vm4556_vm7 = vmmov %vm4554_vm0  ;;  %v224_v52 = vrot.slane %v223_v24, 4 }
 0x22f   :  { %v1302_v50 = vmul.f32 %v2529_v47, %v1287_v35  ;;  %v295_v54 = vsel %vm4556_vm7, %v261_v16, 0.0  ;;  %vm4557_vm5 = vmmov %vm4554_vm0  ;;  %v352_v13 = vrot.slane %v351_v30, 4  ;;  %v169_v11 = vadd.f32 %v168_v40, %v167_v51 }
 0x230   :  { %v1303_v38 = vmul.f32 %v1301_v36, %v3004_v32  ;;  %v423_v1 = vsel %vm4557_vm5, %v389_v2, 0.0  ;;  %vm4558_vm9 = vmmov %vm4554_vm0  ;;  %v296_v12 = vrot.slane %v295_v54, 4  ;;  %v225_v17 = vadd.f32 %v224_v52, %v223_v24 }
 0x231   :  { %v1304_v26 = vmul.f32 %v1302_v50, %v3004_v32  ;;  %v479_v31 = vsel %vm4558_vm9, %v397_v39, 0.0  ;;  %v424_v6 = vrot.slane %v423_v1, 4  ;;  %vm4559_vm10 = vmmov %vm4554_vm0  ;;  %v353_v27 = vadd.f32 %v352_v13, %v351_v30 }
 0x232   :  { %v480_v44 = vrot.slane %v479_v31, 4  ;;  %v551_v34 = vsel %vm4559_vm10, %v517_v10, 0.0  ;;  %v297_v14 = vadd.f32 %v296_v12, %v295_v54  ;;  %v170_v21 = vrot.slane %v169_v11, 2  ;;  %vm4560_vm13 = vmmov %vm4554_vm0 }
 0x233   :  { %v1307_v63 = vrot.slane %v1304_v26, 7  ;;  %v425_v55 = vadd.f32 %v424_v6, %v423_v1  ;;  %v552_v58 = vrot.slane %v551_v34, 4  ;;  %v226_v23 = vrot.slane %v225_v17, 2 }
 0x234   :  { %v481_v7 = vadd.f32 %v480_v44, %v479_v31  ;;  %v354_v37 = vrot.slane %v353_v27, 2  ;;  %v298_v28 = vrot.slane %v297_v14, 2  ;;  %v607_v29 = vsel %vm4560_vm13, %v525_v56, 0.0 }
 0x235   :  { %v1308_v49 = vsel %vm898_vm3, %v1307_v63, %v1303_v38  ;;  %v426_v5 = vrot.slane %v425_v55, 2  ;;  %v553_v41 = vadd.f32 %v552_v58, %v551_v34  ;;  %v171_v53 = vadd.f32 %v170_v21, %v169_v11 }
 0x236   :  { %v1310_v3 = vsel %vm901_vm4, %v1308_v49, 0.0  ;;  %v482_v0 = vrot.slane %v481_v7, 2  ;;  %v227_v47 = vadd.f32 %v226_v23, %v225_v17  ;;  %v355_v33 = vadd.f32 %v354_v37, %v353_v27 }
 0x237   :  { %1311 = vadd.xlane.f32.xlu2 %v1310_v3  ;;  %v299_v35 = vadd.f32 %v298_v28, %v297_v14  ;;  %v427_v36 = vadd.f32 %v426_v5, %v425_v55  ;;  %v608_v26 = vrot.slane %v607_v29, 4  ;;  %v554_v38 = vrot.slane %v553_v41, 2 }
 0x238   :  { %v483_v50 = vadd.f32 %v482_v0, %v481_v7  ;;  %v172_v63 = vrot.slane %v171_v53, 1  ;;  %v228_v49 = vrot.slane %v227_v47, 1  ;;  %v356_v8 = vrot.slane %v355_v33, 1 }
 0x239   :  { %v300_v3 = vrot.slane %v299_v35, 1  ;;  %v609_v59 = vadd.f32 %v608_v26, %v607_v29  ;;  %v555_v48 = vadd.f32 %v554_v38, %v553_v41 }
 0x23a   :  { %v173_v46 = vadd.f32 %v172_v63, %v171_v53  ;;  %v229_v9 = vadd.f32 %v228_v49, %v227_v47  ;;  %v357_v62 = vadd.f32 %v356_v8, %v355_v33 }
 0x23b   :  { %v301_v16 = vadd.f32 %v300_v3, %v299_v35  ;;  %v610_v51 = vrot.slane %v609_v59, 2  ;;  %v556_v24 = vrot.slane %v555_v48, 1 }
 0x23c   :  { %v649_v54 = vadd.f32 %v2795_v60, %v173_v46  ;;  %v657_v10 = vadd.f32 %v2795_v60, %v229_v9  ;;  %v673_v13 = vadd.f32 %v2804_v19, %v357_v62 }
 0x23d   :  { %v665_v52 = vadd.f32 %v2804_v19, %v301_v16  ;;  %v611_v56 = vadd.f32 %v610_v51, %v609_v59  ;;  %v557_v21 = vadd.f32 %v556_v24, %v555_v48 }
 0x23f   :  { %v612_v53 = vrot.slane %v611_v56, 1  ;;  %v697_v47 = vadd.f32 %v2822_v42, %v557_v21 }
 0x24f   :  { %57 = vperm.xlu2 %2421, %v52_v57   ;;  %v428_v57 = vrot.slane %v427_v36, 1 }
 0x251   :  { %v429_v2 = vadd.f32 %v428_v57, %v427_v36  ;;  %v613_v36 = vadd.f32 %v612_v53, %v611_v56 }
 0x253   :  { %v681_v12 = vadd.f32 %v2810_v22, %v429_v2  ;;  %v705_v3 = vadd.f32 %v2822_v42, %v613_v36 }
 0x257   :  { %120 = vperm.xlu2 %2421, %v115_v4   ;;  %v484_v4 = vrot.slane %v483_v50, 1 }
 0x259   :  { %v485_v39 = vadd.f32 %v484_v4, %v483_v50 }
 0x25b   :  { %v689_v6 = vadd.f32 %v2810_v22, %v485_v39 }
 0x2aa   :  { %v1312_v30 = vpop.xlane.xlu2 %1311 }
 0x2ab   :  { %v1313_v1 = vmul.f32 %v1312_v30, %v2798_v61  ;;  %v1314_v31 = vmul.f32 %v1312_v30, %v2807_v20  ;;  %v1315_v40 = vmul.f32 %v1312_v30, %v2813_v25  ;;  %v1316_v0 = vmul.f32 %v1312_v30, %v2825_v43 }
 0x2ad   :  { %v1321_v44 = vrot.slane %v1313_v1, 1  ;;  %v1322_v11 = vrot.slane %v1314_v31, 1  ;;  %v1323_v34 = vrot.slane %v1315_v40, 1  ;;  %v1333_v17 = vadd.f32 %v1313_v1, %v649_v54 }
 0x2ae   :  { %v1335_v27 = vadd.f32 %v1314_v31, %v665_v52  ;;  %v1337_v14 = vadd.f32 %v1315_v40, %v681_v12  ;;  %v1339_v33 = vadd.f32 %v1316_v0, %v697_v47  ;;  %v1324_v38 = vrot.slane %v1316_v0, 1 }
 0x2af   :  { %v1334_v55 = vadd.f32 %v1321_v44, %v657_v10  ;;  %v1336_v7 = vadd.f32 %v1322_v11, %v673_v13  ;;  %v1338_v58 = vadd.f32 %v1323_v34, %v689_v6  ;;  %v2369_v23 = vmul.f32 -1.442695, %v1333_v17 }
 0x2b0   :  { %v2371_v37 = vmul.f32 -1.442695, %v1335_v27  ;;  %v2373_v41 = vmul.f32 -1.442695, %v1337_v14  ;;  %v2375_v63 = vmul.f32 -1.442695, %v1339_v33  ;;  %v1340_v46 = vadd.f32 %v1324_v38, %v705_v3 }
 0x2b1   :  { %v2370_v28 = vmul.f32 -1.442695, %v1334_v55  ;;  %v2372_v5 = vmul.f32 -1.442695, %v1336_v7  ;;  %2530 = vpow2.f32 %v2369_v23  ;;  %v2374_v29 = vmul.f32 -1.442695, %v1338_v58 }
 0x2b2   :  { %v2376_v2 = vmul.f32 -1.442695, %v1340_v46 }
 0x2b3   :  { %2532 = vpow2.f32 %v2370_v28 }
 0x2b4   :  { %2534 = vpow2.f32 %v2371_v37 }
 0x2b5   :  { %2536 = vpow2.f32 %v2372_v5 }
 0x2b6   :  { %2538 = vpow2.f32 %v2373_v41 }
 0x2b7   :  { %2540 = vpow2.f32 %v2374_v29  ;;  %v2531_v35 = vpop.eup %2530 }
 0x2b8   :  { %v3479_v57 = vadd.f32 1.0, %v2531_v35  ;;  %2542 = vpow2.f32 %v2375_v63 }
 0x2b9   :  { %v2533_v50 = vpop.eup %2532 }
 0x2ba   :  { %v2535_v26 = vpop.eup %2534  ;;  %v3481_v59 = vadd.f32 1.0, %v2533_v50  ;;  %v1384_v17 = vand.u32 2147483648, %v3479_v57  ;;  %vm1378_vm14 = vweird.f32 %v3479_v57 }
 0x2bb   :  { %v2537_v49 = vpop.eup %2536  ;;  %v3485_v9 = vadd.f32 1.0, %v2535_v26 }
 0x2bc   :  { %v2539_v8 = vpop.eup %2538  ;;  %v3490_v16 = vadd.f32 1.0, %v2537_v49  ;;  %v3530_v37 = vor.u32 1.1754944e-38, %v1384_v17  ;;  %vm1393_vm15 = vweird.f32 %v3481_v59  ;;  %v1399_v28 = vand.u32 2147483648, %v3481_v59 }
 0x2bd   :  { %v2541_v4 = vpop.eup %2540  ;;  %v3483_v48 = vadd.f32 1.0, %v2539_v8  ;;  %v1414_v21 = vand.u32 2147483648, %v3485_v9  ;;  %vm1408_vm6 = vweird.f32 %v3485_v9 }
 0x2be   :  { %v3487_v62 = vadd.f32 1.0, %v2541_v4  ;;  %v2543_v39 = vpop.eup %2542  ;;  %v1429_v5 = vand.u32 2147483648, %v3490_v16  ;;  %vm1423_vm2 = vweird.f32 %v3490_v16 }
 0x2bf   :  { %2544 = vrcp.f32 %v3483_v48  ;;  %v3519_v11 = vadd.f32 1.0, %v2543_v39  ;;  %v1444_v29 = vand.u32 2147483648, %v3483_v48  ;;  %v1415_v35 = vor.u32 1.1754944e-38, %v1414_v21 }
 0x2c0   :  { %2546 = vrcp.f32 %v3479_v57  ;;  %vm1438_vm8 = vweird.f32 %v3483_v48  ;;  %v1442_v50 = vand.u32 2147483647, %v3483_v48  ;;  %vm1453_vm0 = vweird.f32 %v3487_v62 }
 0x2c1   :  { %2548 = vrcp.f32 %v3481_v59  ;;  %v1459_v26 = vand.u32 2147483648, %v3487_v62  ;;  %v1445_v49 = vor.u32 1.1754944e-38, %v1444_v29 }
 0x2c2   :  { %2550 = vrcp.f32 %v3485_v9 }
 0x2c3   :  { %2552 = vrcp.f32 %v3487_v62 }
 0x2c4   :  { %2554 = vrcp.f32 %v3490_v16 }
 0x2c5   :  { %v3497_v51 = vpop.eup %2544  ;;  %2556 = vpow2.f32 %v2376_v2 }
 0x2c6   :  { %v3499_v24 = vpop.eup %2546  ;;  %v1434_v1 = vmul.f32 %v3497_v51, %v3483_v48  ;;  %2558 = vrcp.f32 %v3519_v11  ;;  %vm1439_vm11 = vweird.f32 %v3497_v51 }
 0x2c7   :  { %v3501_v30 = vpop.eup %2548  ;;  %v1374_v10 = vmul.f32 %v3499_v24, %v3479_v57  ;;  %vm1379_vm1 = vweird.f32 %v3499_v24  ;;  %vm3555_vm5 = vmor %vm1438_vm8, %vm1439_vm11 }
 0x2c8   :  { %v3503_v54 = vpop.eup %2550  ;;  %v1389_v52 = vmul.f32 %v3501_v30, %v3481_v59  ;;  %v1435_v6 = vsub.f32 1.0, %v1434_v1  ;;  %vm3563_vm9 = vmor %vm1378_vm14, %vm1379_vm1  ;;  %vm1394_vm10 = vweird.f32 %v3501_v30  ;;  %vm1443_vm1 = vcmp.eq.f32.partialorder %v1442_v50, 8.507059e+37 }
 0x2c9   :  { %v3507_v31 = vpop.eup %2552  ;;  %v1404_v12 = vmul.f32 %v3503_v54, %v3485_v9  ;;  %v1375_v14 = vsub.f32 1.0, %v1374_v10  ;;  %vm1409_vm7 = vweird.f32 %v3503_v54  ;;  %v1412_v10 = vand.u32 2147483647, %v3485_v9  ;;  %vm3603_vm8 = vmor %vm1393_vm15, %vm1394_vm10 }
 0x2ca   :  { %v3509_v40 = vpop.eup %2554  ;;  %v1449_v44 = vmul.f32 %v3507_v31, %v3487_v62  ;;  %v1390_v55 = vsub.f32 1.0, %v1389_v52  ;;  %v1436_v58 = vmul.f32 %v3497_v51, %v1435_v6  ;;  %vm1454_vm12 = vweird.f32 %v3507_v31  ;;  %vm3589_vm11 = vmor %vm1408_vm6, %vm1409_vm7 }
 0x2cb   :  { %v2557_v13 = vpop.eup %2556  ;;  %v1419_v34 = vmul.f32 %v3509_v40, %v3490_v16  ;;  %v1405_v7 = vsub.f32 1.0, %v1404_v12  ;;  %v1376_v0 = vmul.f32 %v3499_v24, %v1375_v14  ;;  %vm3577_vm13 = vmor %vm1453_vm0, %vm1454_vm12  ;;  %vm1424_vm14 = vweird.f32 %v3509_v40 }
 0x2cc   :  { %v3524_v27 = vadd.f32 1.0, %v2557_v13  ;;  %v1450_v56 = vsub.f32 1.0, %v1449_v44  ;;  %v1391_v41 = vmul.f32 %v3501_v30, %v1390_v55  ;;  %v1437_v47 = vadd.f32 %v3497_v51, %v1436_v58  ;;  %v3552_v38 = vpop.eup %2558  ;;  %vm3614_vm0 = vmor %vm1423_vm2, %vm1424_vm14 }
 0x2cd   :  { %v1420_v23 = vsub.f32 1.0, %v1419_v34  ;;  %v1406_v53 = vmul.f32 %v3503_v54, %v1405_v7  ;;  %v1377_v8 = vadd.f32 %v3499_v24, %v1376_v0  ;;  %v1457_v13 = vand.u32 2147483647, %v3487_v62 }
 0x2ce   :  { %2560 = vrcp.f32 %v3524_v27  ;;  %v1451_v33 = vmul.f32 %v3507_v31, %v1450_v56  ;;  %v1392_v3 = vadd.f32 %v3501_v30, %v1391_v41  ;;  %v1441_v46 = vsel %vm3555_vm5, %v3497_v51, %v1437_v47 }
 0x2cf   :  { %v1421_v36 = vmul.f32 %v3509_v40, %v1420_v23  ;;  %v1407_v48 = vadd.f32 %v3503_v54, %v1406_v53  ;;  %v1460_v12 = vor.u32 1.1754944e-38, %v1459_v26  ;;  %v1464_v44 = vmul.f32 %v3552_v38, %v3519_v11 }
 0x2d0   :  { %v1452_v2 = vadd.f32 %v3507_v31, %v1451_v33  ;;  %v1382_v34 = vand.u32 2147483647, %v3479_v57  ;;  %v1427_v62 = vand.u32 2147483647, %v3490_v16  ;;  %v1446_v17 = vsel %vm1443_vm1, %v1445_v49, %v1441_v46 }
 0x2d1   :  { %v1422_v52 = vadd.f32 %v3509_v40, %v1421_v36  ;;  %vm1458_vm6 = vcmp.eq.f32.partialorder %v1457_v13, 8.507059e+37  ;;  %v1397_v14 = vand.u32 2147483647, %v3481_v59  ;;  %v1381_v58 = vsel %vm3563_vm9, %v3499_v24, %v1377_v8 }
 0x2d2   :  { %v1456_v6 = vsel %vm3577_vm13, %v3507_v31, %v1452_v2  ;;  %v1411_v31 = vsel %vm3589_vm11, %v3503_v54, %v1407_v48  ;;  %v1396_v59 = vsel %vm3603_vm8, %v3501_v30, %v1392_v3  ;;  %vm1413_vm15 = vcmp.eq.f32.partialorder %v1412_v10, 8.507059e+37 }
 0x2d3   :  { %v1461_v55 = vsel %vm1458_vm6, %v1460_v12, %v1456_v6  ;;  %v1426_v16 = vsel %vm3614_vm0, %v3509_v40, %v1422_v52  ;;  %v1430_v54 = vor.u32 1.1754944e-38, %v1429_v5  ;;  %v1465_v56 = vsub.f32 1.0, %v1464_v44 }
 0x2d4   :  { %v3573_v39 = vpop.eup %2560  ;;  %v1493_v23 = vmul.f32 2.0, %v1446_v17  ;;  %v1400_v0 = vor.u32 1.1754944e-38, %v1399_v28  ;;  %v1416_v41 = vsel %vm1413_vm15, %v1415_v35, %v1411_v31  ;;  %vm1428_vm2 = vcmp.eq.f32.partialorder %v1427_v62, 8.507059e+37  ;;  %v107_v62 = vpop.permute.xlu0 %106 }
 0x2d5   :  { %v1479_v7 = vmul.f32 %v3573_v39, %v3524_v27  ;;  %v1494_v29 = vmul.f32 2.0, %v1461_v55  ;;  %vm1383_vm12 = vcmp.eq.f32.partialorder %v1382_v34, 8.507059e+37  ;;  %vm1398_vm7 = vcmp.eq.f32.partialorder %v1397_v14, 8.507059e+37  ;;  %v2716_v34 = vld [vmem:[%s4507_s0 + $0x8] sm:$0xff]  ;;  %v3663_v14 = vld [vmem:[%s4508_s1 + $0x10] sm:$0x3f] }
 0x2d6   :  { %v1431_v24 = vsel %vm1428_vm2, %v1430_v54, %v1426_v16  ;;  %v2377_v53 = vadd.f32 -1.0, %v1493_v23  ;;  %v1386_v47 = vsel %vm1383_vm12, %v3530_v37, %v1381_v58  ;;  %v1401_v30 = vsel %vm1398_vm7, %v1400_v0, %v1396_v59  ;;  %v3675_v55 = vld [vmem:[%s4508_s1 + $0x8] sm:$0x3f] }
 0x2d7   :  { %v1480_v21 = vsub.f32 1.0, %v1479_v7  ;;  %v2378_v33 = vadd.f32 -1.0, %v1494_v29  ;;  %v1466_v36 = vmul.f32 %v3552_v38, %v1465_v56  ;;  %v1497_v5 = vmul.f32 %v1416_v41, %v3422_v18 }
 0x2d8   :  { %v1499_v50 = vmul.f32 %v2377_v53, %v1386_v47  ;;  %v1498_v28 = vmul.f32 %v1431_v24, %v3424_v45  ;;  %vm1469_vm5 = vweird.f32 %v3552_v38  ;;  %vm1484_vm9 = vweird.f32 %v3573_v39 }
 0x2d9   :  { %v1481_v40 = vmul.f32 %v3573_v39, %v1480_v21  ;;  %v1500_v35 = vmul.f32 %v2378_v33, %v1401_v30  ;;  %v1467_v37 = vadd.f32 %v3552_v38, %v1466_v36  ;;  %vm1468_vm10 = vweird.f32 %v3519_v11 }
 0x2da   :  { %v3634_v26 = vadd.f32 %v1499_v50, %v1497_v5  ;;  %v1474_v18 = vand.u32 2147483648, %v3519_v11  ;;  %v1489_v45 = vand.u32 2147483648, %v3524_v27  ;;  %vm1470_vm13 = vmor %vm1468_vm10, %vm1469_vm5  ;;  %v1472_v8 = vand.u32 2147483647, %v3519_v11  ;;  %v3690_v5 = vld [vmem:[%s4508_s1 + $0x18] sm:$0x3f] }
 0x2db   :  { %v3637_v63 = vadd.f32 %v1500_v35, %v1498_v28  ;;  %v1482_v49 = vadd.f32 %v3573_v39, %v1481_v40  ;;  %vm1483_vm14 = vweird.f32 %v3524_v27  ;;  %v1487_v3 = vand.u32 2147483647, %v3524_v27 }
 0x2dc   :  { %2562 = vtanh.f32 %v3634_v26  ;;  %vm1485_vm11 = vmor %vm1483_vm14, %vm1484_vm9  ;;  %v1471_v4 = vsel %vm1470_vm13, %v3552_v38, %v1467_v37  ;;  %v1475_v46 = vor.u32 1.1754944e-38, %v1474_v18  ;;  %v1490_v2 = vor.u32 1.1754944e-38, %v1489_v45  ;;  %v51_v17 = vpop.permute.xlu0 %50 }
 0x2dd   :  { %2564 = vtanh.f32 %v3637_v63  ;;  %v1486_v48 = vsel %vm1485_vm11, %v3573_v39, %v1482_v49  ;;  %vm1473_vm1 = vcmp.eq.f32.partialorder %v1472_v8, 8.507059e+37  ;;  %vm1488_vm8 = vcmp.eq.f32.partialorder %v1487_v3, 8.507059e+37 }
 0x2de   :  { %v1476_v52 = vsel %vm1473_vm1, %v1475_v46, %v1471_v4  ;;  %v1491_v13 = vsel %vm1488_vm8, %v1490_v2, %v1486_v48  ;;  %v59_v39 = vperm.slane %v3447_v15, 6  ;;  %v122_v9 = vperm.slane %v2716_v34, 7  ;;  %v3669_v15 = vld [vmem:[%s4508_s1] sm:$0x3f] }
 0x2df   :  { %v390_v31 = vmul.f32 %v3663_v14, %v51_v17  ;;  %v133_v57 = vmul.f32 %v3669_v15, %v51_v17  ;;  %v262_v7 = vmul.f32 %v3675_v55, %v51_v17  ;;  %v141_v58 = vmul.f32 %v3669_v15, %v107_v62 }
 0x2e0   :  { %v270_v59 = vmul.f32 %v3675_v55, %v107_v62  ;;  %vm4573_vm6 = vcmask 18432   ;;  %v398_v54 = vmul.f32 %v3663_v14, %v107_v62  ;;  %v518_v50 = vmul.f32 %v3690_v5, %v51_v17 }
 0x2e1   :  { %v430_v16 = vsel %vm4573_vm6, %v390_v31, 0.0  ;;  %vm4574_vm0 = vmmov %vm4573_vm6  ;;  %v526_v48 = vmul.f32 %v3690_v5, %v107_v62 }
 0x2e2   :  { %v2563_v1 = vpop.eup %2562  ;;  %v174_v56 = vsel %vm4574_vm0, %v133_v57, 0.0  ;;  %vm4575_vm15 = vmmov %vm4574_vm0  ;;  %v431_v0 = vrot.slane %v430_v16, 4 }
 0x2e3   :  { %v2565_v10 = vpop.eup %2564  ;;  %v1505_v51 = vmul.f32 %v2563_v1, %v1476_v52  ;;  %v302_v21 = vsel %vm4575_vm15, %v262_v7, 0.0  ;;  %vm4576_vm2 = vmmov %vm4574_vm0  ;;  %v175_v29 = vrot.slane %v174_v56, 4 }
 0x2e4   :  { %v1506_v12 = vmul.f32 %v2565_v10, %v1491_v13  ;;  %v230_v23 = vsel %vm4576_vm2, %v141_v58, 0.0  ;;  %vm4577_vm12 = vmmov %vm4574_vm0  ;;  %v303_v53 = vrot.slane %v302_v21, 4  ;;  %v432_v33 = vadd.f32 %v431_v0, %v430_v16 }
 0x2e5   :  { %v1507_v6 = vmul.f32 %v1505_v51, %v3004_v32  ;;  %v358_v41 = vsel %vm4577_vm12, %v270_v59, 0.0  ;;  %vm4578_vm7 = vmmov %vm4574_vm0  ;;  %v231_v47 = vrot.slane %v230_v23, 4  ;;  %v176_v40 = vadd.f32 %v175_v29, %v174_v56 }
 0x2e6   :  { %v1508_v11 = vmul.f32 %v1506_v12, %v3004_v32  ;;  %v486_v24 = vsel %vm4578_vm7, %v398_v54, 0.0  ;;  %v359_v30 = vrot.slane %v358_v41, 4  ;;  %v304_v28 = vadd.f32 %v303_v53, %v302_v21  ;;  %vm4579_vm5 = vmmov %vm4574_vm0 }
 0x2e7   :  { %v487_v36 = vrot.slane %v486_v24, 4  ;;  %v232_v35 = vadd.f32 %v231_v47, %v230_v23  ;;  %v433_v49 = vrot.slane %v432_v33, 2  ;;  %v177_v45 = vrot.slane %v176_v40, 2  ;;  %vm4580_vm9 = vmmov %vm4574_vm0 }
 0x2e8   :  { %v1511_v27 = vrot.slane %v1508_v11, 7  ;;  %v360_v37 = vadd.f32 %v359_v30, %v358_v41  ;;  %v558_v8 = vsel %vm4579_vm5, %v518_v50, 0.0  ;;  %v305_v3 = vrot.slane %v304_v28, 2 }
 0x2e9   :  { %v488_v18 = vadd.f32 %v487_v36, %v486_v24  ;;  %v233_v4 = vrot.slane %v232_v35, 2  ;;  %v434_v2 = vadd.f32 %v433_v49, %v432_v33  ;;  %v559_v1 = vrot.slane %v558_v8, 4 }
 0x2ea   :  { %v1512_v44 = vsel %vm898_vm3, %v1511_v27, %v1507_v6  ;;  %v361_v46 = vrot.slane %v360_v37, 2  ;;  %v178_v52 = vadd.f32 %v177_v45, %v176_v40  ;;  %v306_v13 = vadd.f32 %v305_v3, %v304_v28 }
 0x2eb   :  { %v1514_v38 = vsel %vm901_vm4, %v1512_v44, 0.0  ;;  %v489_v10 = vrot.slane %v488_v18, 2  ;;  %v234_v51 = vadd.f32 %v233_v4, %v232_v35  ;;  %v614_v12 = vsel %vm4580_vm9, %v526_v48, 0.0 }
 0x2ec   :  { %1515 = vadd.xlane.f32.xlu0 %v1514_v38  ;;  %v362_v11 = vadd.f32 %v361_v46, %v360_v37  ;;  %v435_v6 = vrot.slane %v434_v2, 1  ;;  %v560_v27 = vadd.f32 %v559_v1, %v558_v8  ;;  %v179_v38 = vrot.slane %v178_v52, 1 }
 0x2ed   :  { %v490_v44 = vadd.f32 %v489_v10, %v488_v18  ;;  %v307_v34 = vrot.slane %v306_v13, 1 }
 0x2ee   :  { %v363_v17 = vrot.slane %v362_v11, 1  ;;  %v561_v31 = vrot.slane %v560_v27, 2  ;;  %v436_v62 = vadd.f32 %v435_v6, %v434_v2  ;;  %v180_v7 = vadd.f32 %v179_v38, %v178_v52 }
 0x2ef   :  { %v491_v57 = vrot.slane %v490_v44, 1  ;;  %v308_v59 = vadd.f32 %v307_v34, %v306_v13 }
 0x2f0   :  { %v364_v0 = vadd.f32 %v363_v17, %v362_v11  ;;  %v562_v41 = vadd.f32 %v561_v31, %v560_v27  ;;  %v682_v29 = vadd.f32 %v2810_v22, %v436_v62  ;;  %v650_v53 = vadd.f32 %v2795_v60, %v180_v7 }
 0x2f1   :  { %v492_v24 = vadd.f32 %v491_v57, %v490_v44  ;;  %v666_v30 = vadd.f32 %v2804_v19, %v308_v59 }
 0x2f2   :  { %v563_v37 = vrot.slane %v562_v41, 1  ;;  %v674_v49 = vadd.f32 %v2804_v19, %v364_v0 }
 0x2f3   :  { %v690_v45 = vadd.f32 %v2810_v22, %v492_v24 }
 0x2f4   :  { %v564_v1 = vadd.f32 %v563_v37, %v562_v41 }
 0x2f6   :  { %v698_v6 = vadd.f32 %v2822_v42, %v564_v1 }
 0x300   :  { %64 = vperm.xlu0 %2419, %v59_v39   ;;  %v615_v39 = vrot.slane %v614_v12, 4 }
 0x302   :  { %v616_v58 = vadd.f32 %v615_v39, %v614_v12 }
 0x304   :  { %v617_v40 = vrot.slane %v616_v58, 2 }
 0x306   :  { %v618_v48 = vadd.f32 %v617_v40, %v616_v58 }
 0x308   :  { %127 = vperm.xlu0 %2419, %v122_v9   ;;  %v235_v9 = vrot.slane %v234_v51, 1  ;;  %v619_v12 = vrot.slane %v618_v48, 1 }
 0x30a   :  { %v236_v54 = vadd.f32 %v235_v9, %v234_v51  ;;  %v620_v44 = vadd.f32 %v619_v12, %v618_v48 }
 0x30c   :  { %v658_v50 = vadd.f32 %v2795_v60, %v236_v54  ;;  %v706_v62 = vadd.f32 %v2822_v42, %v620_v44 }
 0x35f   :  { %v1516_v16 = vpop.xlane.xlu0 %1515 }
 0x360   :  { %v1517_v56 = vmul.f32 %v1516_v16, %v2798_v61  ;;  %v1518_v21 = vmul.f32 %v1516_v16, %v2807_v20  ;;  %v1519_v23 = vmul.f32 %v1516_v16, %v2813_v25  ;;  %v1520_v13 = vmul.f32 %v1516_v16, %v2825_v43 }
 0x362   :  { %v1525_v47 = vrot.slane %v1517_v56, 1  ;;  %v1526_v33 = vrot.slane %v1518_v21, 1  ;;  %v1541_v36 = vadd.f32 %v1519_v23, %v682_v29  ;;  %v1527_v28 = vrot.slane %v1519_v23, 1 }
 0x363   :  { %v1537_v35 = vadd.f32 %v1517_v56, %v650_v53  ;;  %v1539_v18 = vadd.f32 %v1518_v21, %v666_v30  ;;  %v1543_v27 = vadd.f32 %v1520_v13, %v698_v6  ;;  %v1528_v34 = vrot.slane %v1520_v13, 1 }
 0x364   :  { %v1538_v8 = vadd.f32 %v1525_v47, %v658_v50  ;;  %v1540_v3 = vadd.f32 %v1526_v33, %v674_v49  ;;  %v2383_v4 = vmul.f32 -1.442695, %v1541_v36  ;;  %v1542_v46 = vadd.f32 %v1527_v28, %v690_v45 }
 0x365   :  { %v2379_v2 = vmul.f32 -1.442695, %v1537_v35  ;;  %v2381_v10 = vmul.f32 -1.442695, %v1539_v18  ;;  %v2385_v17 = vmul.f32 -1.442695, %v1543_v27  ;;  %v1544_v16 = vadd.f32 %v1528_v34, %v706_v62 }
 0x366   :  { %v2380_v52 = vmul.f32 -1.442695, %v1538_v8  ;;  %v2382_v51 = vmul.f32 -1.442695, %v1540_v3  ;;  %2566 = vpow2.f32 %v2383_v4  ;;  %v2384_v11 = vmul.f32 -1.442695, %v1542_v46 }
 0x367   :  { %2568 = vpow2.f32 %v2379_v2  ;;  %v2386_v0 = vmul.f32 -1.442695, %v1544_v16 }
 0x368   :  { %2570 = vpow2.f32 %v2381_v10 }
 0x369   :  { %2572 = vpow2.f32 %v2380_v52 }
 0x36a   :  { %2574 = vpow2.f32 %v2382_v51 }
 0x36b   :  { %2576 = vpow2.f32 %v2384_v11 }
 0x36c   :  { %v2567_v38 = vpop.eup %2566  ;;  %2578 = vpow2.f32 %v2385_v17 }
 0x36d   :  { %v2569_v39 = vpop.eup %2568  ;;  %v3708_v57 = vadd.f32 1.0, %v2567_v38 }
 0x36e   :  { %v2571_v9 = vpop.eup %2570  ;;  %v3710_v58 = vadd.f32 1.0, %v2569_v39 }
 0x36f   :  { %v2573_v31 = vpop.eup %2572  ;;  %v3712_v54 = vadd.f32 1.0, %v2571_v9  ;;  %2580 = vrcp.f32 %v3708_v57  ;;  %v1646_v11 = vand.u32 2147483647, %v3708_v57  ;;  %v1648_v44 = vand.u32 2147483648, %v3708_v57 }
 0x370   :  { %v2575_v7 = vpop.eup %2574  ;;  %v3714_v56 = vadd.f32 1.0, %v2573_v31  ;;  %2582 = vrcp.f32 %v3710_v58  ;;  %vm1582_vm10 = vweird.f32 %v3710_v58  ;;  %v1588_v46 = vand.u32 2147483648, %v3710_v58 }
 0x371   :  { %v2577_v59 = vpop.eup %2576  ;;  %v3716_v21 = vadd.f32 1.0, %v2575_v7  ;;  %2584 = vrcp.f32 %v3712_v54  ;;  %vm1612_vm13 = vweird.f32 %v3712_v54  ;;  %v1618_v52 = vand.u32 2147483648, %v3712_v54 }
 0x372   :  { %v3719_v23 = vadd.f32 1.0, %v2577_v59  ;;  %2586 = vrcp.f32 %v3714_v56  ;;  %v2579_v41 = vpop.eup %2578  ;;  %v1603_v10 = vand.u32 2147483648, %v3714_v56  ;;  %vm1597_vm11 = vweird.f32 %v3714_v56 }
 0x373   :  { %2588 = vrcp.f32 %v3716_v21  ;;  %v3746_v37 = vadd.f32 1.0, %v2579_v41  ;;  %vm1627_vm14 = vweird.f32 %v3716_v21  ;;  %v1633_v27 = vand.u32 2147483648, %v3716_v21 }
 0x374   :  { %2590 = vrcp.f32 %v3719_v23  ;;  %v1663_v38 = vand.u32 2147483648, %v3719_v23  ;;  %vm1642_vm1 = vweird.f32 %v3708_v57  ;;  %v1619_v9 = vor.u32 1.1754944e-38, %v1618_v52 }
 0x375   :  { %v3726_v29 = vpop.eup %2580  ;;  %2592 = vpow2.f32 %v2386_v0  ;;  %vm1657_vm0 = vweird.f32 %v3719_v23  ;;  %vm3781_vm2 = vcmp.eq.f32.partialorder %v1646_v11, 8.507059e+37  ;;  %v1649_v16 = vor.u32 1.1754944e-38, %v1648_v44 }
 0x376   :  { %v3728_v24 = vpop.eup %2582  ;;  %v1638_v30 = vmul.f32 %v3726_v29, %v3708_v57  ;;  %2594 = vrcp.f32 %v3746_v37  ;;  %vm1643_vm8 = vweird.f32 %v3726_v29  ;;  %v1664_v0 = vor.u32 1.1754944e-38, %v1663_v38 }
 0x377   :  { %v3730_v53 = vpop.eup %2584  ;;  %v1578_v40 = vmul.f32 %v3728_v24, %v3710_v58  ;;  %vm1583_vm6 = vweird.f32 %v3728_v24  ;;  %vm3787_vm12 = vmor %vm1642_vm1, %vm1643_vm8 }
 0x378   :  { %v3732_v47 = vpop.eup %2586  ;;  %v1608_v50 = vmul.f32 %v3730_v53, %v3712_v54  ;;  %v1639_v18 = vsub.f32 1.0, %v1638_v30  ;;  %vm1613_vm15 = vweird.f32 %v3730_v53  ;;  %vm3799_vm5 = vmor %vm1582_vm10, %vm1583_vm6 }
 0x379   :  { %v3736_v33 = vpop.eup %2588  ;;  %v1593_v35 = vmul.f32 %v3732_v47, %v3714_v56  ;;  %v1579_v3 = vsub.f32 1.0, %v1578_v40  ;;  %vm3813_vm1 = vmor %vm1612_vm13, %vm1613_vm15  ;;  %vm1598_vm10 = vweird.f32 %v3732_v47 }
 0x37a   :  { %v3738_v36 = vpop.eup %2590  ;;  %v1623_v49 = vmul.f32 %v3736_v33, %v3716_v21  ;;  %v1609_v4 = vsub.f32 1.0, %v1608_v50  ;;  %v1640_v1 = vmul.f32 %v3726_v29, %v1639_v18  ;;  %v1616_v50 = vand.u32 2147483647, %v3712_v54 }
 0x37b   :  { %v2593_v28 = vpop.eup %2592  ;;  %v1653_v45 = vmul.f32 %v3738_v36, %v3719_v23  ;;  %v1594_v48 = vsub.f32 1.0, %v1593_v35  ;;  %v1580_v51 = vmul.f32 %v3728_v24, %v1579_v3  ;;  %vm1658_vm7 = vweird.f32 %v3738_v36 }
 0x37c   :  { %v3752_v8 = vadd.f32 1.0, %v2593_v28  ;;  %v1624_v2 = vsub.f32 1.0, %v1623_v49  ;;  %v1610_v12 = vmul.f32 %v3730_v53, %v1609_v4  ;;  %v1641_v34 = vadd.f32 %v3726_v29, %v1640_v1  ;;  %v3778_v31 = vpop.eup %2594  ;;  %vm1659_vm8 = vmor %vm1657_vm0, %vm1658_vm7 }
 0x37d   :  { %v1654_v13 = vsub.f32 1.0, %v1653_v45  ;;  %v1595_v6 = vmul.f32 %v3732_v47, %v1594_v48  ;;  %v1581_v7 = vadd.f32 %v3728_v24, %v1580_v51  ;;  %vm1628_vm9 = vweird.f32 %v3736_v33  ;;  %vm3845_vm0 = vmor %vm1597_vm11, %vm1598_vm10 }
 0x37e   :  { %2596 = vrcp.f32 %v3752_v8  ;;  %v1625_v39 = vmul.f32 %v3736_v33, %v1624_v2  ;;  %v1611_v57 = vadd.f32 %v3730_v53, %v1610_v12  ;;  %v1645_v35 = vsel %vm3787_vm12, %v3726_v29, %v1641_v34  ;;  %vm3834_vm13 = vmor %vm1627_vm14, %vm1628_vm9 }
 0x37f   :  { %v1655_v17 = vmul.f32 %v3738_v36, %v1654_v13  ;;  %v1596_v41 = vadd.f32 %v3732_v47, %v1595_v6  ;;  %v1661_v45 = vand.u32 2147483647, %v3719_v23  ;;  %v1668_v3 = vmul.f32 %v3778_v31, %v3746_v37 }
 0x380   :  { %v1626_v28 = vadd.f32 %v3736_v33, %v1625_v39  ;;  %v1585_v54 = vsel %vm3799_vm5, %v3728_v24, %v1581_v7  ;;  %v1586_v29 = vand.u32 2147483647, %v3710_v58  ;;  %v1615_v4 = vsel %vm3813_vm1, %v3730_v53, %v1611_v57 }
 0x381   :  { %v1656_v18 = vadd.f32 %v3738_v36, %v1655_v17  ;;  %v1631_v48 = vand.u32 2147483647, %v3716_v21  ;;  %v1650_v23 = vsel %vm3781_vm2, %v1649_v16, %v1645_v35  ;;  %vm1662_vm6 = vcmp.eq.f32.partialorder %v1661_v45, 8.507059e+37 }
 0x382   :  { %v1601_v21 = vand.u32 2147483647, %v3714_v56  ;;  %vm1617_vm14 = vcmp.eq.f32.partialorder %v1616_v50, 8.507059e+37  ;;  %v1630_v52 = vsel %vm3834_vm13, %v3736_v33, %v1626_v28  ;;  %v1634_v12 = vor.u32 1.1754944e-38, %v1633_v27 }
 0x383   :  { %v1660_v1 = vsel %vm1659_vm8, %v3738_v36, %v1656_v18  ;;  %v1600_v36 = vsel %vm3845_vm0, %v3732_v47, %v1596_v41  ;;  %v1620_v51 = vsel %vm1617_vm14, %v1619_v9, %v1615_v4  ;;  %v1669_v11 = vsub.f32 1.0, %v1668_v3 }
 0x384   :  { %v3793_v30 = vpop.eup %2596  ;;  %v1665_v13 = vsel %vm1662_vm6, %v1664_v0, %v1660_v1  ;;  %vm1632_vm15 = vcmp.eq.f32.partialorder %v1631_v48, 8.507059e+37  ;;  %v1697_v44 = vmul.f32 2.0, %v1650_v23  ;;  %v1589_v39 = vor.u32 1.1754944e-38, %v1588_v46  ;;  %v114_v1 = vpop.permute.xlu1 %113 }
 0x385   :  { %v1683_v24 = vmul.f32 %v3793_v30, %v3752_v8  ;;  %v1698_v38 = vmul.f32 2.0, %v1665_v13  ;;  %v1604_v34 = vor.u32 1.1754944e-38, %v1603_v10  ;;  %v1635_v17 = vsel %vm1632_vm15, %v1634_v12, %v1630_v52 }
 0x386   :  { %vm1587_vm11 = vcmp.eq.f32.partialorder %v1586_v29, 8.507059e+37  ;;  %vm1602_vm2 = vcmp.eq.f32.partialorder %v1601_v21, 8.507059e+37  ;;  %v2387_v33 = vadd.f32 -1.0, %v1697_v44  ;;  %v1670_v27 = vmul.f32 %v3778_v31, %v1669_v11 }
 0x387   :  { %v1684_v6 = vsub.f32 1.0, %v1683_v24  ;;  %v2388_v62 = vadd.f32 -1.0, %v1698_v38  ;;  %v1590_v7 = vsel %vm1587_vm11, %v1589_v39, %v1585_v54  ;;  %v1605_v47 = vsel %vm1602_vm2, %v1604_v34, %v1600_v36  ;;  %v58_v24 = vpop.permute.xlu2 %57 }
 0x388   :  { %v1701_v9 = vmul.f32 %v1620_v51, %v3634_v26  ;;  %v1702_v59 = vmul.f32 %v1635_v17, %v3637_v63  ;;  %v1703_v58 = vmul.f32 %v2387_v33, %v1590_v7  ;;  %vm1673_vm12 = vweird.f32 %v3778_v31 }
 0x389   :  { %v1685_v57 = vmul.f32 %v3793_v30, %v1684_v6  ;;  %v1704_v46 = vmul.f32 %v2388_v62, %v1605_v47  ;;  %v1671_v10 = vadd.f32 %v3778_v31, %v1670_v27  ;;  %vm1688_vm7 = vweird.f32 %v3793_v30 }
 0x38a   :  { %v3864_v16 = vadd.f32 %v1703_v58, %v1701_v9  ;;  %vm1672_vm5 = vweird.f32 %v3746_v37  ;;  %v1678_v26 = vand.u32 2147483648, %v3746_v37  ;;  %v1693_v63 = vand.u32 2147483648, %v3752_v8 }
 0x38b   :  { %v3866_v56 = vadd.f32 %v1704_v46, %v1702_v59  ;;  %v1686_v0 = vadd.f32 %v3793_v30, %v1685_v57  ;;  %vm1674_vm9 = vmor %vm1672_vm5, %vm1673_vm12  ;;  %v1676_v41 = vand.u32 2147483647, %v3746_v37  ;;  %vm1687_vm1 = vweird.f32 %v3752_v8 }
 0x38c   :  { %2598 = vtanh.f32 %v3864_v16  ;;  %v1691_v40 = vand.u32 2147483647, %v3752_v8  ;;  %vm1689_vm10 = vmor %vm1687_vm1, %vm1688_vm7  ;;  %v1675_v50 = vsel %vm1674_vm9, %v3778_v31, %v1671_v10  ;;  %v1679_v35 = vor.u32 1.1754944e-38, %v1678_v26 }
 0x38d   :  { %2600 = vtanh.f32 %v3866_v56  ;;  %v1690_v28 = vsel %vm1689_vm10, %v3793_v30, %v1686_v0  ;;  %v1694_v49 = vor.u32 1.1754944e-38, %v1693_v63  ;;  %vm1677_vm8 = vcmp.eq.f32.partialorder %v1676_v41, 8.507059e+37  ;;  %v2721_v30 = vld [vmem:[%s4507_s0] sm:$0xff] }
 0x38e   :  { %vm1692_vm13 = vcmp.eq.f32.partialorder %v1691_v40, 8.507059e+37  ;;  %v1680_v3 = vsel %vm1677_vm8, %v1679_v35, %v1675_v50  ;;  %v66_v23 = vperm.slane %v2721_v30, 7  ;;  %v142_v53 = vmul.f32 %v3669_v15, %v114_v1 }
 0x38f   :  { %v1695_v54 = vsel %vm1692_vm13, %v1694_v49, %v1690_v28  ;;  %v271_v21 = vmul.f32 %v3675_v55, %v114_v1  ;;  %v399_v52 = vmul.f32 %v3663_v14, %v114_v1  ;;  %v134_v13 = vmul.f32 %v3669_v15, %v58_v24 }
 0x390   :  { %v263_v36 = vmul.f32 %v3675_v55, %v58_v24  ;;  %v391_v51 = vmul.f32 %v3663_v14, %v58_v24  ;;  %vm4593_vm6 = vcmask 18432   ;;  %v519_v17 = vmul.f32 %v3690_v5, %v58_v24 }
 0x391   :  { %v237_v12 = vsel %vm4593_vm6, %v142_v53, 0.0  ;;  %vm4594_vm0 = vmmov %vm4593_vm6  ;;  %v527_v9 = vmul.f32 %v3690_v5, %v114_v1 }
 0x392   :  { %v2599_v18 = vpop.eup %2598  ;;  %v365_v11 = vsel %vm4594_vm0, %v271_v21, 0.0  ;;  %vm4595_vm14 = vmmov %vm4594_vm0  ;;  %v238_v34 = vrot.slane %v237_v12, 4 }
 0x393   :  { %v2601_v45 = vpop.eup %2600  ;;  %v1709_v29 = vmul.f32 %v2599_v18, %v1680_v3  ;;  %v493_v6 = vsel %vm4595_vm14, %v399_v52, 0.0  ;;  %vm4596_vm15 = vmmov %vm4594_vm0  ;;  %v366_v15 = vrot.slane %v365_v11, 4 }
 0x394   :  { %v1710_v4 = vmul.f32 %v2601_v45, %v1695_v54  ;;  %v181_v44 = vsel %vm4596_vm15, %v134_v13, 0.0  ;;  %vm4597_vm11 = vmmov %vm4594_vm0  ;;  %v494_v33 = vrot.slane %v493_v6, 4  ;;  %v239_v7 = vadd.f32 %v238_v34, %v237_v12 }
 0x395   :  { %v1711_v48 = vmul.f32 %v1709_v29, %v3004_v32  ;;  %v309_v38 = vsel %vm4597_vm11, %v263_v36, 0.0  ;;  %vm4598_vm2 = vmmov %vm4594_vm0  ;;  %v182_v55 = vrot.slane %v181_v44, 4  ;;  %v367_v27 = vadd.f32 %v366_v15, %v365_v11 }
 0x396   :  { %v1712_v37 = vmul.f32 %v1710_v4, %v3004_v32  ;;  %v437_v39 = vsel %vm4598_vm2, %v391_v51, 0.0  ;;  %v310_v62 = vrot.slane %v309_v38, 4  ;;  %vm4599_vm12 = vmmov %vm4594_vm0  ;;  %v495_v57 = vadd.f32 %v494_v33, %v493_v6 }
 0x397   :  { %v438_v14 = vrot.slane %v437_v39, 4  ;;  %v565_v47 = vsel %vm4599_vm12, %v519_v17, 0.0  ;;  %v183_v59 = vadd.f32 %v182_v55, %v181_v44  ;;  %v240_v0 = vrot.slane %v239_v7, 2  ;;  %vm4600_vm7 = vmmov %vm4594_vm0 }
 0x398   :  { %v1715_v8 = vrot.slane %v1712_v37, 7  ;;  %v311_v58 = vadd.f32 %v310_v62, %v309_v38  ;;  %v566_v10 = vrot.slane %v565_v47, 4  ;;  %v368_v26 = vrot.slane %v367_v27, 2 }
 0x399   :  { %v439_v46 = vadd.f32 %v438_v14, %v437_v39  ;;  %v621_v63 = vsel %vm4600_vm7, %v527_v9, 0.0  ;;  %v496_v41 = vrot.slane %v495_v57, 2  ;;  %v184_v40 = vrot.slane %v183_v59, 2 }
 0x39a   :  { %v1716_v2 = vsel %vm898_vm3, %v1715_v8, %v1711_v48  ;;  %v312_v50 = vrot.slane %v311_v58, 2  ;;  %v567_v35 = vadd.f32 %v566_v10, %v565_v47  ;;  %v241_v49 = vadd.f32 %v240_v0, %v239_v7 }
 0x39b   :  { %v1718_v31 = vsel %vm901_vm4, %v1716_v2, 0.0  ;;  %v440_v28 = vrot.slane %v439_v46, 2  ;;  %v622_v18 = vrot.slane %v621_v63, 4  ;;  %v369_v45 = vadd.f32 %v368_v26, %v367_v27 }
 0x39c   :  { %1719 = vadd.xlane.f32.xlu1 %v1718_v31  ;;  %v497_v3 = vadd.f32 %v496_v41, %v495_v57  ;;  %v185_v54 = vadd.f32 %v184_v40, %v183_v59  ;;  %v313_v5 = vadd.f32 %v312_v50, %v311_v58  ;;  %v568_v4 = vrot.slane %v567_v35, 2 }
 0x39d   :  { %v441_v29 = vadd.f32 %v440_v28, %v439_v46  ;;  %v242_v37 = vrot.slane %v241_v49, 1  ;;  %v623_v48 = vadd.f32 %v622_v18, %v621_v63  ;;  %v370_v8 = vrot.slane %v369_v45, 1 }
 0x39e   :  { %v498_v2 = vrot.slane %v497_v3, 1  ;;  %v186_v31 = vrot.slane %v185_v54, 1  ;;  %v314_v30 = vrot.slane %v313_v5, 1  ;;  %v569_v1 = vadd.f32 %v568_v4, %v567_v35 }
 0x39f   :  { %v243_v24 = vadd.f32 %v242_v37, %v241_v49  ;;  %v624_v53 = vrot.slane %v623_v48, 2  ;;  %v371_v21 = vadd.f32 %v370_v8, %v369_v45 }
 0x3a0   :  { %v499_v52 = vadd.f32 %v498_v2, %v497_v3  ;;  %v187_v13 = vadd.f32 %v186_v31, %v185_v54  ;;  %v315_v36 = vadd.f32 %v314_v30, %v313_v5  ;;  %v570_v12 = vrot.slane %v569_v1, 1 }
 0x3a1   :  { %v625_v11 = vadd.f32 %v624_v53, %v623_v48  ;;  %v659_v6 = vadd.f32 %v2795_v60, %v243_v24  ;;  %v675_v38 = vadd.f32 %v2804_v19, %v371_v21 }
 0x3a2   :  { %v651_v15 = vadd.f32 %v2795_v60, %v187_v13  ;;  %v667_v33 = vadd.f32 %v2804_v19, %v315_v36  ;;  %v691_v62 = vadd.f32 %v2810_v22, %v499_v52  ;;  %v571_v14 = vadd.f32 %v570_v12, %v569_v1 }
 0x3a3   :  { %v626_v26 = vrot.slane %v625_v11, 1 }
 0x3a4   :  { %v699_v40 = vadd.f32 %v2822_v42, %v571_v14 }
 0x3a5   :  { %v627_v45 = vadd.f32 %v626_v26, %v625_v11 }
 0x3b5   :  { %71 = vperm.xlu1 %2420, %v66_v23   ;;  %v442_v23 = vrot.slane %v441_v29, 1 }
 0x3b7   :  { %v443_v51 = vadd.f32 %v442_v23, %v441_v29  ;;  %v707_v29 = vadd.f32 %v2822_v42, %v627_v45 }
 0x3b9   :  { %v683_v55 = vadd.f32 %v2810_v22, %v443_v51 }
 0x40f   :  { %v1720_v44 = vpop.xlane.xlu1 %1719 }
 0x410   :  { %v1721_v39 = vmul.f32 %v1720_v44, %v2798_v61  ;;  %v1722_v34 = vmul.f32 %v1720_v44, %v2807_v20  ;;  %v1723_v17 = vmul.f32 %v1720_v44, %v2813_v25  ;;  %v1724_v58 = vmul.f32 %v1720_v44, %v2825_v43 }
 0x412   :  { %v1729_v7 = vrot.slane %v1721_v39, 1  ;;  %v1730_v47 = vrot.slane %v1722_v34, 1  ;;  %v1731_v27 = vrot.slane %v1723_v17, 1  ;;  %v1741_v9 = vadd.f32 %v1721_v39, %v651_v15 }
 0x413   :  { %v1743_v57 = vadd.f32 %v1722_v34, %v667_v33  ;;  %v1745_v59 = vadd.f32 %v1723_v17, %v683_v55  ;;  %v1747_v49 = vadd.f32 %v1724_v58, %v699_v40  ;;  %v1732_v3 = vrot.slane %v1724_v58, 1 }
 0x414   :  { %v1742_v46 = vadd.f32 %v1729_v7, %v659_v6  ;;  %v1744_v10 = vadd.f32 %v1730_v47, %v675_v38  ;;  %v1746_v0 = vadd.f32 %v1731_v27, %v691_v62  ;;  %v2389_v63 = vmul.f32 -1.442695, %v1741_v9 }
 0x415   :  { %v2391_v41 = vmul.f32 -1.442695, %v1743_v57  ;;  %v2393_v35 = vmul.f32 -1.442695, %v1745_v59  ;;  %v2395_v54 = vmul.f32 -1.442695, %v1747_v49  ;;  %v1748_v8 = vadd.f32 %v1732_v3, %v707_v29 }
 0x416   :  { %v2390_v50 = vmul.f32 -1.442695, %v1742_v46  ;;  %v2392_v28 = vmul.f32 -1.442695, %v1744_v10  ;;  %2602 = vpow2.f32 %v2389_v63  ;;  %v2394_v18 = vmul.f32 -1.442695, %v1746_v0 }
 0x417   :  { %v2396_v21 = vmul.f32 -1.442695, %v1748_v8 }
 0x418   :  { %2604 = vpow2.f32 %v2390_v50 }
 0x419   :  { %2606 = vpow2.f32 %v2391_v41 }
 0x41a   :  { %2608 = vpow2.f32 %v2392_v28 }
 0x41b   :  { %2610 = vpow2.f32 %v2393_v35 }
 0x41c   :  { %2612 = vpow2.f32 %v2394_v18  ;;  %v2603_v5 = vpop.eup %2602 }
 0x41d   :  { %v3917_v37 = vadd.f32 1.0, %v2603_v5  ;;  %2614 = vpow2.f32 %v2395_v54 }
 0x41e   :  { %v2605_v4 = vpop.eup %2604 }
 0x41f   :  { %v2607_v48 = vpop.eup %2606  ;;  %v3919_v2 = vadd.f32 1.0, %v2605_v4  ;;  %2616 = vrcp.f32 %v3917_v37  ;;  %vm1786_vm5 = vweird.f32 %v3917_v37  ;;  %v1792_v46 = vand.u32 2147483648, %v3917_v37 }
 0x420   :  { %v2609_v31 = vpop.eup %2608  ;;  %v3921_v30 = vadd.f32 1.0, %v2607_v48  ;;  %v1790_v29 = vand.u32 2147483647, %v3917_v37 }
 0x421   :  { %v2611_v23 = vpop.eup %2610  ;;  %v3923_v1 = vadd.f32 1.0, %v2609_v31  ;;  %2618 = vrcp.f32 %v3919_v2  ;;  %v1807_v10 = vand.u32 2147483648, %v3919_v2  ;;  %vm1801_vm10 = vweird.f32 %v3919_v2 }
 0x422   :  { %v2613_v24 = vpop.eup %2612  ;;  %v3926_v53 = vadd.f32 1.0, %v2611_v23  ;;  %2620 = vrcp.f32 %v3921_v30  ;;  %v1822_v57 = vand.u32 2147483648, %v3921_v30  ;;  %vm1816_vm9 = vweird.f32 %v3921_v30 }
 0x423   :  { %v3929_v52 = vadd.f32 1.0, %v2613_v24  ;;  %v2615_v13 = vpop.eup %2614  ;;  %vm1831_vm1 = vweird.f32 %v3923_v1  ;;  %v1837_v41 = vand.u32 2147483648, %v3923_v1 }
 0x424   :  { %2622 = vrcp.f32 %v3926_v53  ;;  %v3955_v33 = vadd.f32 1.0, %v2615_v13  ;;  %vm1846_vm8 = vweird.f32 %v3926_v53  ;;  %v1850_v50 = vand.u32 2147483647, %v3926_v53 }
 0x425   :  { %2624 = vrcp.f32 %v3923_v1  ;;  %v3935_v36 = vpop.eup %2616  ;;  %v1852_v28 = vand.u32 2147483648, %v3926_v53  ;;  %v1823_v35 = vor.u32 1.1754944e-38, %v1822_v57  ;;  %vm1861_vm0 = vweird.f32 %v3929_v52 }
 0x426   :  { %2626 = vrcp.f32 %v3929_v52  ;;  %v1782_v39 = vmul.f32 %v3935_v36, %v3917_v37  ;;  %vm1787_vm6 = vweird.f32 %v3935_v36  ;;  %v1867_v3 = vand.u32 2147483648, %v3929_v52 }
 0x427   :  { %2628 = vpow2.f32 %v2396_v21  ;;  %v3937_v51 = vpop.eup %2618  ;;  %vm3999_vm11 = vcmp.eq.f32.partialorder %v1850_v50, 8.507059e+37  ;;  %v1853_v31 = vor.u32 1.1754944e-38, %v1852_v28  ;;  %vm4011_vm12 = vmor %vm1786_vm5, %vm1787_vm6  ;;  %v1820_v21 = vand.u32 2147483647, %v3921_v30 }
 0x428   :  { %v3939_v12 = vpop.eup %2620  ;;  %v1797_v15 = vmul.f32 %v3937_v51, %v3919_v2  ;;  %v1783_v47 = vsub.f32 1.0, %v1782_v39  ;;  %2630 = vrcp.f32 %v3955_v33  ;;  %vm1802_vm5 = vweird.f32 %v3937_v51 }
 0x429   :  { %v1812_v34 = vmul.f32 %v3939_v12, %v3921_v30  ;;  %vm1817_vm14 = vweird.f32 %v3939_v12  ;;  %v1808_v50 = vor.u32 1.1754944e-38, %v1807_v10 }
 0x42a   :  { %v3941_v11 = vpop.eup %2622  ;;  %v1798_v9 = vsub.f32 1.0, %v1797_v15  ;;  %v1784_v26 = vmul.f32 %v3935_v36, %v1783_v47 }
 0x42b   :  { %v3943_v6 = vpop.eup %2624  ;;  %v1842_v44 = vmul.f32 %v3941_v11, %v3926_v53  ;;  %v1813_v27 = vsub.f32 1.0, %v1812_v34  ;;  %vm1847_vm13 = vweird.f32 %v3941_v11 }
 0x42c   :  { %v3947_v38 = vpop.eup %2626  ;;  %v1827_v55 = vmul.f32 %v3943_v6, %v3923_v1  ;;  %v1799_v40 = vmul.f32 %v3937_v51, %v1798_v9  ;;  %v1785_v5 = vadd.f32 %v3935_v36, %v1784_v26  ;;  %vm3995_vm15 = vmor %vm1846_vm8, %vm1847_vm13  ;;  %vm1832_vm7 = vweird.f32 %v3943_v6 }
 0x42d   :  { %v2629_v17 = vpop.eup %2628  ;;  %v1843_v62 = vsub.f32 1.0, %v1842_v44  ;;  %v1857_v14 = vmul.f32 %v3947_v38, %v3929_v52  ;;  %v1814_v63 = vmul.f32 %v3939_v12, %v1813_v27  ;;  %vm1862_vm2 = vweird.f32 %v3947_v38  ;;  %vm4025_vm8 = vmor %vm1816_vm9, %vm1817_vm14 }
 0x42e   :  { %v3961_v7 = vadd.f32 1.0, %v2629_v17  ;;  %v1828_v59 = vsub.f32 1.0, %v1827_v55  ;;  %v3987_v54 = vpop.eup %2630  ;;  %v1800_v23 = vadd.f32 %v3937_v51, %v1799_v40  ;;  %v1865_v17 = vand.u32 2147483647, %v3929_v52  ;;  %vm1863_vm13 = vmor %vm1861_vm0, %vm1862_vm2 }
 0x42f   :  { %v1844_v58 = vmul.f32 %v3941_v11, %v1843_v62  ;;  %v1858_v0 = vsub.f32 1.0, %v1857_v14  ;;  %v1815_v4 = vadd.f32 %v3939_v12, %v1814_v63  ;;  %v1872_v15 = vmul.f32 %v3987_v54, %v3955_v33  ;;  %vm4045_vm9 = vmor %vm1831_vm1, %vm1832_vm7  ;;  %v4106_v14 = vld [vmem:[%s4508_s1 + $0x8] sm:$0x3f] }
 0x430   :  { %2632 = vrcp.f32 %v3961_v7  ;;  %v1829_v49 = vmul.f32 %v3943_v6, %v1828_v59  ;;  %v1789_v30 = vsel %vm4011_vm12, %v3935_v36, %v1785_v5  ;;  %v1835_v62 = vand.u32 2147483647, %v3923_v1  ;;  %vm4056_vm0 = vmor %vm1801_vm10, %vm1802_vm5 }
 0x431   :  { %v1845_v18 = vadd.f32 %v3941_v11, %v1844_v58  ;;  %v1859_v45 = vmul.f32 %v3947_v38, %v1858_v0  ;;  %v1819_v55 = vsel %vm4025_vm8, %v3939_v12, %v1815_v4  ;;  %vm1866_vm6 = vcmp.eq.f32.partialorder %v1865_v17, 8.507059e+37  ;;  %v4114_v12 = vld [vmem:[%s4508_s1 + $0x10] sm:$0x3f] }
 0x432   :  { %v1830_v13 = vadd.f32 %v3943_v6, %v1829_v49  ;;  %v1805_v1 = vand.u32 2147483647, %v3919_v2  ;;  %vm1821_vm1 = vcmp.eq.f32.partialorder %v1820_v21, 8.507059e+37  ;;  %v1838_v59 = vor.u32 1.1754944e-38, %v1837_v41 }
 0x433   :  { %v1849_v44 = vsel %vm3995_vm15, %v3941_v11, %v1845_v18  ;;  %v1860_v34 = vadd.f32 %v3947_v38, %v1859_v45  ;;  %v1868_v11 = vor.u32 1.1754944e-38, %v1867_v3  ;;  %v1824_v57 = vsel %vm1821_vm1, %v1823_v35, %v1819_v55  ;;  %v4100_v55 = vld [vmem:[%s4508_s1] sm:$0x3f] }
 0x434   :  { %v1854_v52 = vsel %vm3999_vm11, %v1853_v31, %v1849_v44  ;;  %v1834_v27 = vsel %vm4045_vm9, %v3943_v6, %v1830_v13  ;;  %v1873_v58 = vsub.f32 1.0, %v1872_v15  ;;  %vm1836_vm14 = vcmp.eq.f32.partialorder %v1835_v62, 8.507059e+37 }
 0x435   :  { %v1864_v47 = vsel %vm1863_vm13, %v3947_v38, %v1860_v34  ;;  %v1804_v38 = vsel %vm4056_vm0, %v3937_v51, %v1800_v23  ;;  %v1901_v26 = vmul.f32 2.0, %v1854_v52  ;;  %v1793_v40 = vor.u32 1.1754944e-38, %v1792_v46 }
 0x436   :  { %v4005_v24 = vpop.eup %2632  ;;  %v1869_v9 = vsel %vm1866_vm6, %v1868_v11, %v1864_v47  ;;  %v1839_v28 = vsel %vm1836_vm14, %v1838_v59, %v1834_v27  ;;  %vm1791_vm10 = vcmp.eq.f32.partialorder %v1790_v29, 8.507059e+37  ;;  %vm1806_vm15 = vcmp.eq.f32.partialorder %v1805_v1, 8.507059e+37 }
 0x437   :  { %v1887_v36 = vmul.f32 %v4005_v24, %v3961_v7  ;;  %v1902_v63 = vmul.f32 2.0, %v1869_v9  ;;  %v2397_v6 = vadd.f32 -1.0, %v1901_v26  ;;  %v1794_v18 = vsel %vm1791_vm10, %v1793_v40, %v1789_v30  ;;  %v65_v30 = vpop.permute.xlu0 %64 }
 0x438   :  { %v1809_v51 = vsel %vm1806_vm15, %v1808_v50, %v1804_v38  ;;  %v1874_v41 = vmul.f32 %v3987_v54, %v1873_v58  ;;  %v1905_v35 = vmul.f32 %v1824_v57, %v3864_v16  ;;  %v1906_v3 = vmul.f32 %v1839_v28, %v3866_v56  ;;  %v4122_v38 = vld [vmem:[%s4508_s1 + $0x18] sm:$0x3f] }
 0x439   :  { %v1888_v0 = vsub.f32 1.0, %v1887_v36  ;;  %v2398_v49 = vadd.f32 -1.0, %v1902_v63  ;;  %v1907_v37 = vmul.f32 %v2397_v6, %v1794_v18  ;;  %vm1877_vm11 = vweird.f32 %v3987_v54 }
 0x43a   :  { %v1875_v10 = vadd.f32 %v3987_v54, %v1874_v41  ;;  %vm1892_vm2 = vweird.f32 %v4005_v24  ;;  %vm1876_vm12 = vweird.f32 %v3955_v33  ;;  %v1882_v16 = vand.u32 2147483648, %v3955_v33 }
 0x43b   :  { %v1889_v45 = vmul.f32 %v4005_v24, %v1888_v0  ;;  %v1908_v46 = vmul.f32 %v2398_v49, %v1809_v51  ;;  %v4075_v5 = vadd.f32 %v1907_v37, %v1905_v35  ;;  %v1897_v56 = vand.u32 2147483648, %v3961_v7  ;;  %vm1878_vm7 = vmor %vm1876_vm12, %vm1877_vm11 }
 0x43c   :  { %v1880_v4 = vand.u32 2147483647, %v3955_v33  ;;  %vm1891_vm8 = vweird.f32 %v3961_v7  ;;  %v1895_v48 = vand.u32 2147483647, %v3961_v7  ;;  %v1879_v8 = vsel %vm1878_vm7, %v3987_v54, %v1875_v10 }
 0x43d   :  { %v4077_v2 = vadd.f32 %v1908_v46, %v1906_v3  ;;  %v1890_v29 = vadd.f32 %v4005_v24, %v1889_v45  ;;  %2634 = vtanh.f32 %v4075_v5  ;;  %vm1893_vm5 = vmor %vm1891_vm8, %vm1892_vm2  ;;  %v1883_v23 = vor.u32 1.1754944e-38, %v1882_v16 }
 0x43e   :  { %v1898_v53 = vor.u32 1.1754944e-38, %v1897_v56  ;;  %vm1881_vm13 = vcmp.eq.f32.partialorder %v1880_v4, 8.507059e+37  ;;  %vm1896_vm9 = vcmp.eq.f32.partialorder %v1895_v48, 8.507059e+37  ;;  %v135_v47 = vmul.f32 %v4100_v55, %v65_v30 }
 0x43f   :  { %2636 = vtanh.f32 %v4077_v2  ;;  %v1894_v31 = vsel %vm1893_vm5, %v4005_v24, %v1890_v29  ;;  %v1884_v44 = vsel %vm1881_vm13, %v1883_v23, %v1879_v8  ;;  %v121_v24 = vpop.permute.xlu2 %120  ;;  %v264_v36 = vmul.f32 %v4106_v14, %v65_v30 }
 0x440   :  { %v1899_v39 = vsel %vm1896_vm9, %v1898_v53, %v1894_v31  ;;  %v143_v62 = vmul.f32 %v4100_v55, %v121_v24  ;;  %v272_v52 = vmul.f32 %v4106_v14, %v121_v24  ;;  %v392_v1 = vmul.f32 %v4114_v12, %v65_v30 }
 0x441   :  { %v400_v27 = vmul.f32 %v4114_v12, %v121_v24  ;;  %vm4613_vm6 = vcmask 18432   ;;  %v528_v57 = vmul.f32 %v4122_v38, %v121_v24  ;;  %v520_v59 = vmul.f32 %v4122_v38, %v65_v30 }
 0x442   :  { %v244_v9 = vsel %vm4613_vm6, %v143_v62, 0.0  ;;  %vm4614_vm0 = vmmov %vm4613_vm6 }
 0x443   :  { %v2635_v21 = vpop.eup %2634  ;;  %v372_v58 = vsel %vm4614_vm0, %v272_v52, 0.0  ;;  %vm4615_vm1 = vmmov %vm4614_vm0  ;;  %v245_v40 = vrot.slane %v244_v9, 4 }
 0x444   :  { %v1913_v34 = vmul.f32 %v2635_v21, %v1884_v44  ;;  %v188_v0 = vsel %vm4615_vm1, %v135_v47, 0.0  ;;  %vm4616_vm14 = vmmov %vm4614_vm0  ;;  %v373_v49 = vrot.slane %v372_v58, 4 }
 0x445   :  { %v2637_v13 = vpop.eup %2636  ;;  %v316_v26 = vsel %vm4616_vm14, %v264_v36, 0.0  ;;  %vm4617_vm10 = vmmov %vm4614_vm0  ;;  %v189_v18 = vrot.slane %v188_v0, 4  ;;  %v246_v45 = vadd.f32 %v245_v40, %v244_v9 }
 0x446   :  { %v1914_v17 = vmul.f32 %v2637_v13, %v1899_v39  ;;  %v1915_v15 = vmul.f32 %v1913_v34, %v3004_v32  ;;  %v444_v63 = vsel %vm4617_vm10, %v392_v1, 0.0  ;;  %vm4618_vm15 = vmmov %vm4614_vm0  ;;  %v317_v51 = vrot.slane %v316_v26, 4 }
 0x447   :  { %v500_v50 = vsel %vm4618_vm15, %v400_v27, 0.0  ;;  %vm4619_vm11 = vmmov %vm4614_vm0  ;;  %v445_v41 = vrot.slane %v444_v63, 4  ;;  %v374_v46 = vadd.f32 %v373_v49, %v372_v58  ;;  %v190_v10 = vadd.f32 %v189_v18, %v188_v0 }
 0x448   :  { %v1916_v33 = vmul.f32 %v1914_v17, %v3004_v32  ;;  %v628_v28 = vsel %vm4619_vm11, %v528_v57, 0.0  ;;  %vm4620_vm2 = vmmov %vm4614_vm0  ;;  %v501_v35 = vrot.slane %v500_v50, 4  ;;  %v318_v29 = vadd.f32 %v317_v51, %v316_v26 }
 0x449   :  { %v572_v6 = vsel %vm4620_vm2, %v520_v59, 0.0  ;;  %v629_v3 = vrot.slane %v628_v28, 4  ;;  %v446_v16 = vadd.f32 %v445_v41, %v444_v63  ;;  %v247_v4 = vrot.slane %v246_v45, 2 }
 0x44a   :  { %v1919_v7 = vrot.slane %v1916_v33, 7  ;;  %v573_v37 = vrot.slane %v572_v6, 4  ;;  %v502_v56 = vadd.f32 %v501_v35, %v500_v50  ;;  %v375_v31 = vrot.slane %v374_v46, 2 }
 0x44b   :  { %v630_v48 = vadd.f32 %v629_v3, %v628_v28  ;;  %v191_v23 = vrot.slane %v190_v10, 2  ;;  %v319_v53 = vrot.slane %v318_v29, 2  ;;  %v447_v21 = vrot.slane %v446_v16, 2 }
 0x44c   :  { %v1920_v11 = vsel %vm898_vm3, %v1919_v7, %v1915_v15  ;;  %v574_v8 = vadd.f32 %v573_v37, %v572_v6  ;;  %v503_v13 = vrot.slane %v502_v56, 2  ;;  %v248_v44 = vadd.f32 %v247_v4, %v246_v45 }
 0x44d   :  { %v1922_v54 = vsel %vm901_vm4, %v1920_v11, 0.0  ;;  %v631_v39 = vrot.slane %v630_v48, 2  ;;  %v376_v17 = vadd.f32 %v375_v31, %v374_v46  ;;  %v192_v33 = vadd.f32 %v191_v23, %v190_v10 }
 0x44e   :  { %1923 = vadd.xlane.f32.xlu2 %v1922_v54  ;;  %v575_v34 = vrot.slane %v574_v8, 2  ;;  %v320_v15 = vadd.f32 %v319_v53, %v318_v29  ;;  %v448_v7 = vadd.f32 %v447_v21, %v446_v16  ;;  %v504_v11 = vadd.f32 %v503_v13, %v502_v56 }
 0x44f   :  { %v249_v54 = vrot.slane %v248_v44, 1  ;;  %v632_v24 = vadd.f32 %v631_v39, %v630_v48  ;;  %v377_v62 = vrot.slane %v376_v17, 1  ;;  %v193_v52 = vrot.slane %v192_v33, 1 }
 0x450   :  { %v576_v30 = vadd.f32 %v575_v34, %v574_v8  ;;  %v321_v47 = vrot.slane %v320_v15, 1  ;;  %v449_v36 = vrot.slane %v448_v7, 1  ;;  %v505_v1 = vrot.slane %v504_v11, 1 }
 0x451   :  { %v250_v27 = vadd.f32 %v249_v54, %v248_v44  ;;  %v633_v9 = vrot.slane %v632_v24, 1  ;;  %v378_v59 = vadd.f32 %v377_v62, %v376_v17  ;;  %v194_v58 = vadd.f32 %v193_v52, %v192_v33 }
 0x452   :  { %v577_v57 = vrot.slane %v576_v30, 1  ;;  %v322_v0 = vadd.f32 %v321_v47, %v320_v15  ;;  %v450_v26 = vadd.f32 %v449_v36, %v448_v7  ;;  %v506_v63 = vadd.f32 %v505_v1, %v504_v11 }
 0x453   :  { %v634_v40 = vadd.f32 %v633_v9, %v632_v24  ;;  %v660_v50 = vadd.f32 %v2795_v60, %v250_v27  ;;  %v676_v35 = vadd.f32 %v2804_v19, %v378_v59  ;;  %v652_v45 = vadd.f32 %v2795_v60, %v194_v58 }
 0x454   :  { %v578_v6 = vadd.f32 %v577_v57, %v576_v30  ;;  %v668_v3 = vadd.f32 %v2804_v19, %v322_v0  ;;  %v684_v37 = vadd.f32 %v2810_v22, %v450_v26  ;;  %v692_v46 = vadd.f32 %v2810_v22, %v506_v63 }
 0x455   :  { %v708_v13 = vadd.f32 %v2822_v42, %v634_v40 }
 0x456   :  { %v700_v31 = vadd.f32 %v2822_v42, %v578_v6 }
 0x4c1   :  { %v1924_v28 = vpop.xlane.xlu2 %1923 }
 0x4c2   :  { %v1925_v49 = vmul.f32 %v1924_v28, %v2798_v61  ;;  %v1926_v18 = vmul.f32 %v1924_v28, %v2807_v20  ;;  %v1927_v51 = vmul.f32 %v1924_v28, %v2813_v25  ;;  %v1928_v41 = vmul.f32 %v1924_v28, %v2825_v43 }
 0x4c4   :  { %v1933_v10 = vrot.slane %v1925_v49, 1  ;;  %v1934_v29 = vrot.slane %v1926_v18, 1  ;;  %v1935_v16 = vrot.slane %v1927_v51, 1  ;;  %v1936_v56 = vrot.slane %v1928_v41, 1 }
 0x4c5   :  { %v1945_v4 = vadd.f32 %v1925_v49, %v652_v45  ;;  %v1947_v48 = vadd.f32 %v1926_v18, %v668_v3  ;;  %v1949_v8 = vadd.f32 %v1927_v51, %v684_v37  ;;  %v1951_v34 = vadd.f32 %v1928_v41, %v700_v31 }
 0x4c6   :  { %v1946_v23 = vadd.f32 %v1933_v10, %v660_v50  ;;  %v1948_v53 = vadd.f32 %v1934_v29, %v676_v35  ;;  %v1950_v21 = vadd.f32 %v1935_v16, %v692_v46  ;;  %v1952_v15 = vadd.f32 %v1936_v56, %v708_v13 }
 0x4c7   :  { %v2399_v44 = vmul.f32 -1.442695, %v1945_v4  ;;  %v2401_v39 = vmul.f32 -1.442695, %v1947_v48  ;;  %v2403_v7 = vmul.f32 -1.442695, %v1949_v8 }
 0x4c8   :  { %v2400_v17 = vmul.f32 -1.442695, %v1946_v23  ;;  %v2402_v33 = vmul.f32 -1.442695, %v1948_v53  ;;  %v2404_v11 = vmul.f32 -1.442695, %v1950_v21 }
 0x4c9   :  { %2638 = vpow2.f32 %v2399_v44  ;;  %v2405_v54 = vmul.f32 -1.442695, %v1951_v34  ;;  %v2406_v24 = vmul.f32 -1.442695, %v1952_v15 }
 0x4ca   :  { %2640 = vpow2.f32 %v2400_v17 }
 0x4cb   :  { %2642 = vpow2.f32 %v2401_v39 }
 0x4cc   :  { %2644 = vpow2.f32 %v2402_v33 }
 0x4cd   :  { %2646 = vpow2.f32 %v2403_v7 }
 0x4ce   :  { %2648 = vpow2.f32 %v2404_v11 }
 0x4cf   :  { %v2639_v30 = vpop.eup %2638  ;;  %2650 = vpow2.f32 %v2405_v54 }
 0x4d0   :  { %v2641_v62 = vpop.eup %2640  ;;  %v4145_v52 = vadd.f32 1.0, %v2639_v30  ;;  %2652 = vpow2.f32 %v2406_v24 }
 0x4d1   :  { %v2643_v47 = vpop.eup %2642  ;;  %v4147_v36 = vadd.f32 1.0, %v2641_v62 }
 0x4d2   :  { %v2645_v1 = vpop.eup %2644  ;;  %v4149_v27 = vadd.f32 1.0, %v2643_v47  ;;  %2654 = vrcp.f32 %v4145_v52  ;;  %v1996_v35 = vand.u32 2147483648, %v4145_v52  ;;  %vm1990_vm8 = vweird.f32 %v4145_v52 }
 0x4d3   :  { %v2647_v9 = vpop.eup %2646  ;;  %v4152_v57 = vadd.f32 1.0, %v2645_v1  ;;  %2656 = vrcp.f32 %v4147_v36  ;;  %v2011_v45 = vand.u32 2147483648, %v4147_v36  ;;  %vm2005_vm13 = vweird.f32 %v4147_v36 }
 0x4d4   :  { %v2649_v59 = vpop.eup %2648  ;;  %v1981_v58 = vadd.f32 1.0, %v2647_v9  ;;  %2658 = vrcp.f32 %v4149_v27  ;;  %v2026_v51 = vand.u32 2147483648, %v4149_v27  ;;  %vm2020_vm12 = vweird.f32 %v4149_v27 }
 0x4d5   :  { %v4156_v0 = vadd.f32 1.0, %v2649_v59  ;;  %2660 = vrcp.f32 %v4152_v57  ;;  %v2651_v26 = vpop.eup %2650  ;;  %v2041_v16 = vand.u32 2147483648, %v4152_v57  ;;  %vm2035_vm5 = vweird.f32 %v4152_v57 }
 0x4d6   :  { %2662 = vrcp.f32 %v1981_v58  ;;  %v2653_v63 = vpop.eup %2652  ;;  %v4164_v28 = vadd.f32 1.0, %v2651_v26  ;;  %vm2050_vm7 = vweird.f32 %v1981_v58  ;;  %v2027_v31 = vor.u32 1.1754944e-38, %v2026_v51 }
 0x4d7   :  { %2664 = vrcp.f32 %v4156_v0  ;;  %v4181_v46 = vadd.f32 1.0, %v2653_v63  ;;  %v2054_v53 = vand.u32 2147483647, %v1981_v58  ;;  %v2056_v44 = vand.u32 2147483648, %v1981_v58 }
 0x4d8   :  { %v4159_v40 = vpop.eup %2654  ;;  %2666 = vrcp.f32 %v4164_v28  ;;  %vm2065_vm9 = vweird.f32 %v4156_v0  ;;  %v2071_v17 = vand.u32 2147483648, %v4156_v0  ;;  %v2024_v26 = vand.u32 2147483647, %v4149_v27 }
 0x4d9   :  { %v4162_v50 = vpop.eup %2656  ;;  %v1986_v6 = vmul.f32 %v4159_v40, %v4145_v52  ;;  %2668 = vrcp.f32 %v4181_v46  ;;  %vm1991_vm0 = vweird.f32 %v4159_v40  ;;  %vm4204_vm14 = vcmp.eq.f32.partialorder %v2054_v53, 8.507059e+37  ;;  %v72_v53 = vpop.permute.xlu1 %71 }
 0x4da   :  { %v4168_v49 = vpop.eup %2658  ;;  %v2001_v18 = vmul.f32 %v4162_v50, %v4147_v36  ;;  %v2057_v9 = vor.u32 1.1754944e-38, %v2056_v44  ;;  %v2069_v51 = vand.u32 2147483647, %v4156_v0  ;;  %v1997_v54 = vor.u32 1.1754944e-38, %v1996_v35 }
 0x4db   :  { %v4173_v41 = vpop.eup %2660  ;;  %v2016_v3 = vmul.f32 %v4168_v49, %v4149_v27  ;;  %v1987_v10 = vsub.f32 1.0, %v1986_v6  ;;  %vm2021_vm1 = vweird.f32 %v4168_v49  ;;  %v2084_v63 = vand.u32 2147483647, %v4164_v28 }
 0x4dc   :  { %v4179_v37 = vpop.eup %2662  ;;  %v2031_v29 = vmul.f32 %v4173_v41, %v4152_v57  ;;  %v2002_v8 = vsub.f32 1.0, %v2001_v18  ;;  %vm2036_vm11 = vweird.f32 %v4173_v41  ;;  %vm4222_vm2 = vmor %vm2020_vm12, %vm2021_vm1  ;;  %vm2006_vm12 = vweird.f32 %v4162_v50 }
 0x4dd   :  { %v2017_v56 = vsub.f32 1.0, %v2016_v3  ;;  %v2046_v4 = vmul.f32 %v4179_v37, %v1981_v58  ;;  %v2665_v48 = vpop.eup %2664  ;;  %v1988_v34 = vmul.f32 %v4159_v40, %v1987_v10  ;;  %vm2051_vm6 = vweird.f32 %v4179_v37 }
 0x4de   :  { %v2032_v23 = vsub.f32 1.0, %v2031_v29  ;;  %v2061_v39 = vmul.f32 %v2665_v48, %v4156_v0  ;;  %v2003_v11 = vmul.f32 %v4162_v50, %v2002_v8  ;;  %v4208_v24 = vpop.eup %2666  ;;  %vm2066_vm10 = vweird.f32 %v2665_v48  ;;  %vm4213_vm15 = vmor %vm2050_vm7, %vm2051_vm6 }
 0x4df   :  { %v2018_v21 = vmul.f32 %v4168_v49, %v2017_v56  ;;  %v2047_v13 = vsub.f32 1.0, %v2046_v4  ;;  %v1989_v59 = vadd.f32 %v4159_v40, %v1988_v34  ;;  %v4231_v3 = vpop.eup %2668  ;;  %vm2067_vm7 = vmor %vm2065_vm9, %vm2066_vm10  ;;  %v2072_v10 = vor.u32 1.1754944e-38, %v2071_v17 }
 0x4e0   :  { %v2033_v33 = vmul.f32 %v4173_v41, %v2032_v23  ;;  %v2062_v7 = vsub.f32 1.0, %v2061_v39  ;;  %v2004_v27 = vadd.f32 %v4162_v50, %v2003_v11  ;;  %v2076_v29 = vmul.f32 %v4208_v24, %v4164_v28  ;;  %vm4243_vm6 = vmor %vm1990_vm8, %vm1991_vm0 }
 0x4e1   :  { %v2048_v15 = vmul.f32 %v4179_v37, %v2047_v13  ;;  %v2019_v47 = vadd.f32 %v4168_v49, %v2018_v21  ;;  %v2039_v56 = vand.u32 2147483647, %v4152_v57  ;;  %vm2070_vm9 = vcmp.eq.f32.partialorder %v2069_v51, 8.507059e+37  ;;  %vm4257_vm8 = vmor %vm2035_vm5, %vm2036_vm11 }
 0x4e2   :  { %v2063_v62 = vmul.f32 %v2665_v48, %v2062_v7  ;;  %v2034_v6 = vadd.f32 %v4173_v41, %v2033_v33  ;;  %v1994_v8 = vand.u32 2147483647, %v4145_v52  ;;  %v2009_v23 = vand.u32 2147483647, %v4147_v36  ;;  %vm4268_vm0 = vmor %vm2005_vm13, %vm2006_vm12 }
 0x4e3   :  { %v2049_v30 = vadd.f32 %v4179_v37, %v2048_v15  ;;  %v2023_v0 = vsel %vm4222_vm2, %v4168_v49, %v2019_v47  ;;  %vm2025_vm1 = vcmp.eq.f32.partialorder %v2024_v26, 8.507059e+37  ;;  %v2091_v39 = vmul.f32 %v4231_v3, %v4181_v46 }
 0x4e4   :  { %v2064_v18 = vadd.f32 %v2665_v48, %v2063_v62  ;;  %v2038_v44 = vsel %vm4257_vm8, %v4173_v41, %v2034_v6  ;;  %v2008_v34 = vsel %vm4268_vm0, %v4162_v50, %v2004_v27  ;;  %v2028_v17 = vsel %vm2025_vm1, %v2027_v31, %v2023_v0 }
 0x4e5   :  { %v2053_v58 = vsel %vm4213_vm15, %v4179_v37, %v2049_v30  ;;  %v2077_v33 = vsub.f32 1.0, %v2076_v29  ;;  %vm2040_vm5 = vcmp.eq.f32.partialorder %v2039_v56, 8.507059e+37  ;;  %v2092_v15 = vsub.f32 1.0, %v2091_v39 }
 0x4e6   :  { %v2068_v4 = vsel %vm2067_vm7, %v2665_v48, %v2064_v18  ;;  %v2058_v21 = vsel %vm4204_vm14, %v2057_v9, %v2053_v58  ;;  %v1993_v48 = vsel %vm4243_vm6, %v4159_v40, %v1989_v59  ;;  %v2042_v40 = vor.u32 1.1754944e-38, %v2041_v16 }
 0x4e7   :  { %v2073_v49 = vsel %vm2070_vm9, %v2072_v10, %v2068_v4  ;;  %v2105_v7 = vmul.f32 2.0, %v2058_v21  ;;  %v2012_v41 = vor.u32 1.1754944e-38, %v2011_v45  ;;  %vm1995_vm13 = vcmp.eq.f32.partialorder %v1994_v8, 8.507059e+37 }
 0x4e8   :  { %v2106_v11 = vmul.f32 2.0, %v2073_v49  ;;  %v2043_v30 = vsel %vm2040_vm5, %v2042_v40, %v2038_v44  ;;  %vm2010_vm14 = vcmp.eq.f32.partialorder %v2009_v23, 8.507059e+37  ;;  %v1998_v31 = vsel %vm1995_vm13, %v1997_v54, %v1993_v48 }
 0x4e9   :  { %v2407_v62 = vadd.f32 -1.0, %v2105_v7  ;;  %v2013_v47 = vsel %vm2010_vm14, %v2012_v41, %v2008_v34  ;;  %v2078_v57 = vmul.f32 %v4208_v24, %v2077_v33  ;;  %v2109_v16 = vmul.f32 %v2028_v17, %v4075_v5 }
 0x4ea   :  { %v2408_v50 = vadd.f32 -1.0, %v2106_v11  ;;  %v2093_v1 = vmul.f32 %v4231_v3, %v2092_v15  ;;  %v2110_v9 = vmul.f32 %v2043_v30, %v4077_v2  ;;  %vm2081_vm10 = vweird.f32 %v4208_v24 }
 0x4eb   :  { %v2111_v52 = vmul.f32 %v2407_v62, %v1998_v31  ;;  %v2079_v45 = vadd.f32 %v4208_v24, %v2078_v57  ;;  %vm2096_vm15 = vweird.f32 %v4231_v3  ;;  %vm2080_vm11 = vweird.f32 %v4164_v28 }
 0x4ec   :  { %v2112_v35 = vmul.f32 %v2408_v50, %v2013_v47  ;;  %v2094_v26 = vadd.f32 %v4231_v3, %v2093_v1  ;;  %v2086_v5 = vand.u32 2147483648, %v4164_v28  ;;  %v2101_v2 = vand.u32 2147483648, %v4181_v46  ;;  %vm2082_vm2 = vmor %vm2080_vm11, %vm2081_vm10 }
 0x4ed   :  { %v4290_v59 = vadd.f32 %v2111_v52, %v2109_v16  ;;  %vm2095_vm7 = vweird.f32 %v4181_v46  ;;  %v2099_v6 = vand.u32 2147483647, %v4181_v46  ;;  %v2083_v58 = vsel %vm2082_vm2, %v4208_v24, %v2079_v45 }
 0x4ee   :  { %v4292_v36 = vadd.f32 %v2112_v35, %v2110_v9  ;;  %vm2097_vm12 = vmor %vm2095_vm7, %vm2096_vm15  ;;  %v2087_v51 = vor.u32 1.1754944e-38, %v2086_v5  ;;  %v2102_v10 = vor.u32 1.1754944e-38, %v2101_v2  ;;  %vm2085_vm6 = vcmp.eq.f32.partialorder %v2084_v63, 8.507059e+37 }
 0x4ef   :  { %2670 = vtanh.f32 %v4290_v59  ;;  %v2098_v18 = vsel %vm2097_vm12, %v4231_v3, %v2094_v26  ;;  %vm2100_vm9 = vcmp.eq.f32.partialorder %v2099_v6, 8.507059e+37  ;;  %v128_v3 = vpop.permute.xlu0 %127  ;;  %v136_v48 = vmul.f32 %v4100_v55, %v72_v53 }
 0x4f0   :  { %2672 = vtanh.f32 %v4292_v36  ;;  %v2088_v37 = vsel %vm2085_vm6, %v2087_v51, %v2083_v58  ;;  %v2103_v0 = vsel %vm2100_vm9, %v2102_v10, %v2098_v18  ;;  %v144_v21 = vmul.f32 %v4100_v55, %v128_v3 }
 0x4f1   :  { %v273_v49 = vmul.f32 %v4106_v14, %v128_v3  ;;  %v265_v13 = vmul.f32 %v4106_v14, %v72_v53  ;;  %v393_v44 = vmul.f32 %v4114_v12, %v72_v53  ;;  %v401_v39 = vmul.f32 %v4114_v12, %v128_v3 }
 0x4f2   :  { %vm4633_vm8 = vcmask 18432   ;;  %v529_v17 = vmul.f32 %v4122_v38, %v128_v3  ;;  %v521_v40 = vmul.f32 %v4122_v38, %v72_v53 }
 0x4f3   :  { %v251_v34 = vsel %vm4633_vm8, %v144_v21, 0.0  ;;  %vm4634_vm0 = vmmov %vm4633_vm8 }
 0x4f4   :  { %v379_v33 = vsel %vm4634_vm0, %v273_v49, 0.0  ;;  %vm4635_vm1 = vmmov %vm4634_vm0  ;;  %v252_v11 = vrot.slane %v251_v34, 4 }
 0x4f5   :  { %v2671_v27 = vpop.eup %2670  ;;  %v195_v15 = vsel %vm4635_vm1, %v136_v48, 0.0  ;;  %vm4636_vm5 = vmmov %vm4634_vm0  ;;  %v380_v41 = vrot.slane %v379_v33, 4 }
 0x4f6   :  { %v2673_v29 = vpop.eup %2672  ;;  %v2117_v56 = vmul.f32 %v2671_v27, %v2088_v37  ;;  %v323_v7 = vsel %vm4636_vm5, %v265_v13, 0.0  ;;  %vm4637_vm13 = vmmov %vm4634_vm0  ;;  %v196_v30 = vrot.slane %v195_v15, 4  ;;  %v253_v31 = vadd.f32 %v252_v11, %v251_v34 }
 0x4f7   :  { %v2118_v4 = vmul.f32 %v2673_v29, %v2103_v0  ;;  %v451_v55 = vsel %vm4637_vm13, %v393_v44, 0.0  ;;  %vm4638_vm14 = vmmov %vm4634_vm0  ;;  %v324_v62 = vrot.slane %v323_v7, 4  ;;  %v381_v16 = vadd.f32 %v380_v41, %v379_v33 }
 0x4f8   :  { %v2119_v8 = vmul.f32 %v2117_v56, %v3004_v32  ;;  %v507_v14 = vsel %vm4638_vm14, %v401_v39, 0.0  ;;  %vm4639_vm10 = vmmov %vm4634_vm0  ;;  %v452_v50 = vrot.slane %v451_v55, 4  ;;  %v197_v1 = vadd.f32 %v196_v30, %v195_v15 }
 0x4f9   :  { %v2120_v28 = vmul.f32 %v2118_v4, %v3004_v32  ;;  %v635_v54 = vsel %vm4639_vm10, %v529_v17, 0.0  ;;  %vm4640_vm15 = vmmov %vm4634_vm0  ;;  %v508_v38 = vrot.slane %v507_v14, 4  ;;  %v325_v9 = vadd.f32 %v324_v62, %v323_v7 }
 0x4fa   :  { %v579_v12 = vsel %vm4640_vm15, %v521_v40, 0.0  ;;  %v636_v47 = vrot.slane %v635_v54, 4  ;;  %v453_v52 = vadd.f32 %v452_v50, %v451_v55  ;;  %v254_v45 = vrot.slane %v253_v31, 2 }
 0x4fb   :  { %v2123_v46 = vrot.slane %v2120_v28, 7  ;;  %v580_v57 = vrot.slane %v579_v12, 4  ;;  %v509_v35 = vadd.f32 %v508_v38, %v507_v14  ;;  %v382_v2 = vrot.slane %v381_v16, 2 }
 0x4fc   :  { %v637_v26 = vadd.f32 %v636_v47, %v635_v54  ;;  %v198_v63 = vrot.slane %v197_v1, 2  ;;  %v326_v6 = vrot.slane %v325_v9, 2  ;;  %v454_v58 = vrot.slane %v453_v52, 2 }
 0x4fd   :  { %v2124_v23 = vsel %vm898_vm3, %v2123_v46, %v2119_v8  ;;  %v581_v5 = vadd.f32 %v580_v57, %v579_v12  ;;  %v510_v18 = vrot.slane %v509_v35, 2  ;;  %v255_v51 = vadd.f32 %v254_v45, %v253_v31 }
 0x4fe   :  { %v2126_v24 = vsel %vm901_vm4, %v2124_v23, 0.0  ;;  %v638_v10 = vrot.slane %v637_v26, 2  ;;  %v383_v29 = vadd.f32 %v382_v2, %v381_v16  ;;  %v199_v37 = vadd.f32 %v198_v63, %v197_v1 }
 0x4ff   :  { %2127 = vadd.xlane.f32.xlu0 %v2126_v24  ;;  %v582_v27 = vrot.slane %v581_v5, 2  ;;  %v327_v0 = vadd.f32 %v326_v6, %v325_v9  ;;  %v455_v56 = vadd.f32 %v454_v58, %v453_v52  ;;  %v511_v4 = vadd.f32 %v510_v18, %v509_v35 }
 0x500   :  { %v256_v28 = vrot.slane %v255_v51, 1  ;;  %v639_v8 = vadd.f32 %v638_v10, %v637_v26  ;;  %v384_v23 = vrot.slane %v383_v29, 1  ;;  %v200_v24 = vrot.slane %v199_v37, 1 }
 0x501   :  { %v583_v46 = vadd.f32 %v582_v27, %v581_v5  ;;  %v328_v3 = vrot.slane %v327_v0, 1  ;;  %v456_v53 = vrot.slane %v455_v56, 1  ;;  %v512_v21 = vrot.slane %v511_v4, 1 }
 0x502   :  { %v640_v49 = vrot.slane %v639_v8, 1  ;;  %v257_v13 = vadd.f32 %v256_v28, %v255_v51  ;;  %v201_v44 = vadd.f32 %v200_v24, %v199_v37  ;;  %v385_v34 = vadd.f32 %v384_v23, %v383_v29 }
 0x503   :  { %v584_v48 = vrot.slane %v583_v46, 1  ;;  %v329_v39 = vadd.f32 %v328_v3, %v327_v0  ;;  %v457_v17 = vadd.f32 %v456_v53, %v455_v56  ;;  %v513_v40 = vadd.f32 %v512_v21, %v511_v4 }
 0x504   :  { %v641_v15 = vadd.f32 %v640_v49, %v639_v8  ;;  %v661_v7 = vadd.f32 %v2795_v60, %v257_v13  ;;  %v653_v41 = vadd.f32 %v2795_v60, %v201_v44  ;;  %v677_v62 = vadd.f32 %v2804_v19, %v385_v34 }
 0x505   :  { %v585_v33 = vadd.f32 %v584_v48, %v583_v46  ;;  %v669_v30 = vadd.f32 %v2804_v19, %v329_v39  ;;  %v685_v50 = vadd.f32 %v2810_v22, %v457_v17  ;;  %v693_v38 = vadd.f32 %v2810_v22, %v513_v40 }
 0x506   :  { %v709_v52 = vadd.f32 %v2822_v42, %v641_v15 }
 0x572   :  { %v2128_v55 = vpop.xlane.xlu0 %2127 }
 0x573   :  { %v2129_v11 = vmul.f32 %v2128_v55, %v2798_v61  ;;  %v2130_v14 = vmul.f32 %v2128_v55, %v2807_v20  ;;  %v2131_v54 = vmul.f32 %v2128_v55, %v2813_v25  ;;  %v2132_v12 = vmul.f32 %v2128_v55, %v2825_v43 }
 0x574   :  { %v701_v25 = vadd.f32 %v2822_v42, %v585_v33 }
 0x575   :  { %v2137_v31 = vrot.slane %v2129_v11, 1  ;;  %v2138_v47 = vrot.slane %v2130_v14, 1  ;;  %v2139_v57 = vrot.slane %v2131_v54, 1  ;;  %v2140_v61 = vrot.slane %v2132_v12, 1 }
 0x576   :  { %v2149_v16 = vadd.f32 %v2129_v11, %v653_v41  ;;  %v2151_v20 = vadd.f32 %v2130_v14, %v669_v30  ;;  %v2153_v1 = vadd.f32 %v2131_v54, %v685_v50  ;;  %v2155_v45 = vadd.f32 %v2132_v12, %v701_v25 }
 0x577   :  { %v2150_v43 = vadd.f32 %v2137_v31, %v661_v7  ;;  %v2152_v9 = vadd.f32 %v2138_v47, %v677_v62  ;;  %v2154_v60 = vadd.f32 %v2139_v57, %v693_v38  ;;  %v2156_v22 = vadd.f32 %v2140_v61, %v709_v52 }
 0x578   :  { %v2409_v35 = vmul.f32 -1.442695, %v2149_v16  ;;  %v2411_v19 = vmul.f32 -1.442695, %v2151_v20  ;;  %v2413_v2 = vmul.f32 -1.442695, %v2153_v1 }
 0x579   :  { %v2410_v26 = vmul.f32 -1.442695, %v2150_v43  ;;  %v2412_v5 = vmul.f32 -1.442695, %v2152_v9  ;;  %v2414_v63 = vmul.f32 -1.442695, %v2154_v60 }
 0x57a   :  { %2674 = vpow2.f32 %v2409_v35  ;;  %v2415_v6 = vmul.f32 -1.442695, %v2155_v45  ;;  %v2416_v58 = vmul.f32 -1.442695, %v2156_v22 }
 0x57b   :  { %2676 = vpow2.f32 %v2410_v26 }
 0x57c   :  { %2678 = vpow2.f32 %v2411_v19 }
 0x57d   :  { %2680 = vpow2.f32 %v2412_v5 }
 0x57e   :  { %2682 = vpow2.f32 %v2413_v2 }
 0x57f   :  { %2684 = vpow2.f32 %v2414_v63 }
 0x580   :  { %v2675_v18 = vpop.eup %2674  ;;  %2686 = vpow2.f32 %v2415_v6 }
 0x581   :  { %v2677_v51 = vpop.eup %2676  ;;  %v4340_v42 = vadd.f32 1.0, %v2675_v18  ;;  %2688 = vpow2.f32 %v2416_v58 }
 0x582   :  { %v2679_v10 = vpop.eup %2678  ;;  %v4342_v27 = vadd.f32 1.0, %v2677_v51 }
 0x583   :  { %v2681_v29 = vpop.eup %2680  ;;  %v4344_v37 = vadd.f32 1.0, %v2679_v10  ;;  %2690 = vrcp.f32 %v4340_v42  ;;  %v2198_v48 = vand.u32 2147483647, %v4340_v42  ;;  %v2200_v44 = vand.u32 2147483648, %v4340_v42 }
 0x584   :  { %v2683_v0 = vpop.eup %2682  ;;  %v4347_v56 = vadd.f32 1.0, %v2681_v29  ;;  %2692 = vrcp.f32 %v4342_v27  ;;  %v2215_v39 = vand.u32 2147483648, %v4342_v27  ;;  %vm2194_vm7 = vweird.f32 %v4340_v42 }
 0x585   :  { %v2685_v4 = vpop.eup %2684  ;;  %v4350_v28 = vadd.f32 1.0, %v2683_v0  ;;  %2694 = vrcp.f32 %v4344_v37  ;;  %vm2224_vm11 = vweird.f32 %v4344_v37  ;;  %v2228_v33 = vand.u32 2147483647, %v4344_v37 }
 0x586   :  { %v4353_v8 = vadd.f32 1.0, %v2685_v4  ;;  %v2687_v46 = vpop.eup %2686  ;;  %2696 = vrcp.f32 %v4347_v56  ;;  %v2230_v15 = vand.u32 2147483648, %v4344_v37  ;;  %v2245_v7 = vand.u32 2147483648, %v4347_v56 }
 0x587   :  { %v2689_v23 = vpop.eup %2688  ;;  %2698 = vrcp.f32 %v4350_v28  ;;  %v4362_v53 = vadd.f32 1.0, %v2687_v46  ;;  %vm2254_vm2 = vweird.f32 %v4350_v28  ;;  %v2258_v62 = vand.u32 2147483647, %v4350_v28 }
 0x588   :  { %2700 = vrcp.f32 %v4353_v8  ;;  %v4378_v40 = vadd.f32 1.0, %v2689_v23  ;;  %vm2239_vm12 = vweird.f32 %v4347_v56  ;;  %v2260_v31 = vand.u32 2147483648, %v4350_v28 }
 0x589   :  { %v4357_v24 = vpop.eup %2690  ;;  %2702 = vrcp.f32 %v4362_v53  ;;  %vm2209_vm9 = vweird.f32 %v4342_v27  ;;  %vm2269_vm8 = vweird.f32 %v4353_v8  ;;  %v2275_v20 = vand.u32 2147483648, %v4353_v8 }
 0x58a   :  { %v4360_v3 = vpop.eup %2692  ;;  %v2190_v49 = vmul.f32 %v4357_v24, %v4340_v42  ;;  %vm2195_vm6 = vweird.f32 %v4357_v24  ;;  %2704 = vrcp.f32 %v4378_v40  ;;  %v2273_v52 = vand.u32 2147483647, %v4353_v8 }
 0x58b   :  { %v4364_v21 = vpop.eup %2694  ;;  %v2205_v13 = vmul.f32 %v4360_v3, %v4342_v27  ;;  %vm4413_vm14 = vcmp.eq.f32.partialorder %v2258_v62, 8.507059e+37  ;;  %v2261_v5 = vor.u32 1.1754944e-38, %v2260_v31  ;;  %vm2210_vm10 = vweird.f32 %v4360_v3 }
 0x58c   :  { %v2220_v34 = vmul.f32 %v4364_v21, %v4344_v37  ;;  %v4376_v17 = vpop.eup %2696  ;;  %v2191_v12 = vsub.f32 1.0, %v2190_v49  ;;  %vm2225_vm0 = vweird.f32 %v4364_v21  ;;  %v2276_v63 = vor.u32 1.1754944e-38, %v2275_v20 }
 0x58d   :  { %v2699_v55 = vpop.eup %2698  ;;  %v2235_v14 = vmul.f32 %v4376_v17, %v4347_v56  ;;  %v2206_v41 = vsub.f32 1.0, %v2205_v13  ;;  %vm4409_vm13 = vmor %vm2224_vm11, %vm2225_vm0  ;;  %vm2240_vm11 = vweird.f32 %v4376_v17  ;;  %v2231_v46 = vor.u32 1.1754944e-38, %v2230_v15 }
 0x58e   :  { %v2221_v11 = vsub.f32 1.0, %v2220_v34  ;;  %v2701_v54 = vpop.eup %2700  ;;  %v2250_v30 = vmul.f32 %v2699_v55, %v4350_v28  ;;  %v2192_v1 = vmul.f32 %v4357_v24, %v2191_v12  ;;  %vm2255_vm1 = vweird.f32 %v2699_v55 }
 0x58f   :  { %v2236_v38 = vsub.f32 1.0, %v2235_v14  ;;  %v2265_v47 = vmul.f32 %v2701_v54, %v4353_v8  ;;  %v2207_v25 = vmul.f32 %v4360_v3, %v2206_v41  ;;  %v4403_v9 = vpop.eup %2702  ;;  %vm2270_vm5 = vweird.f32 %v2701_v54  ;;  %vm4420_vm15 = vmor %vm2254_vm2, %vm2255_vm1 }
 0x590   :  { %v2222_v50 = vmul.f32 %v4364_v21, %v2221_v11  ;;  %v2251_v57 = vsub.f32 1.0, %v2250_v30  ;;  %v4426_v58 = vpop.eup %2704  ;;  %vm2271_vm0 = vmor %vm2269_vm8, %vm2270_vm5  ;;  %v2193_v18 = vadd.f32 %v4357_v24, %v2192_v1  ;;  %v2280_v29 = vmul.f32 %v4403_v9, %v4362_v53 }
 0x591   :  { %v2237_v61 = vmul.f32 %v4376_v17, %v2236_v38  ;;  %v2266_v16 = vsub.f32 1.0, %v2265_v47  ;;  %v2208_v51 = vadd.f32 %v4360_v3, %v2207_v25  ;;  %vm4440_vm2 = vmor %vm2194_vm7, %vm2195_vm6  ;;  %v2243_v28 = vand.u32 2147483647, %v4347_v56 }
 0x592   :  { %v2252_v43 = vmul.f32 %v2699_v55, %v2251_v57  ;;  %v2223_v35 = vadd.f32 %v4364_v21, %v2222_v50  ;;  %vm2274_vm8 = vcmp.eq.f32.partialorder %v2273_v52, 8.507059e+37  ;;  %v2246_v23 = vor.u32 1.1754944e-38, %v2245_v7  ;;  %vm4450_vm1 = vmor %vm2239_vm12, %vm2240_vm11 }
 0x593   :  { %v2267_v60 = vmul.f32 %v2701_v54, %v2266_v16  ;;  %v2238_v6 = vadd.f32 %v4376_v17, %v2237_v61  ;;  %vm4460_vm7 = vmor %vm2209_vm9, %vm2210_vm10  ;;  %v2213_v15 = vand.u32 2147483647, %v4342_v27  ;;  %vm2229_vm12 = vcmp.eq.f32.partialorder %v2228_v33, 8.507059e+37 }
 0x594   :  { %v2253_v45 = vadd.f32 %v2699_v55, %v2252_v43  ;;  %v2227_v4 = vsel %vm4409_vm13, %v4364_v21, %v2223_v35  ;;  %v2295_v7 = vmul.f32 %v4426_v58, %v4378_v40  ;;  %v2212_v11 = vsel %vm4460_vm7, %v4360_v3, %v2208_v51 }
 0x595   :  { %v2268_v2 = vadd.f32 %v2701_v54, %v2267_v60  ;;  %v2242_v56 = vsel %vm4450_vm1, %v4376_v17, %v2238_v6  ;;  %v2232_v14 = vsel %vm2229_vm12, %v2231_v46, %v2227_v4  ;;  %vm2244_vm6 = vcmp.eq.f32.partialorder %v2243_v28, 8.507059e+37 }
 0x596   :  { %v2257_v10 = vsel %vm4420_vm15, %v2699_v55, %v2253_v45  ;;  %v2197_v55 = vsel %vm4440_vm2, %v4357_v24, %v2193_v18  ;;  %v2296_v37 = vsub.f32 1.0, %v2295_v7  ;;  %v2201_v17 = vor.u32 1.1754944e-38, %v2200_v44 }
 0x597   :  { %v2272_v8 = vsel %vm2271_vm0, %v2701_v54, %v2268_v2  ;;  %v2262_v13 = vsel %vm4413_vm14, %v2261_v5, %v2257_v10  ;;  %v2281_v54 = vsub.f32 1.0, %v2280_v29  ;;  %v2216_v41 = vor.u32 1.1754944e-38, %v2215_v39 }
 0x598   :  { %v2277_v34 = vsel %vm2274_vm8, %v2276_v63, %v2272_v8  ;;  %v2309_v33 = vmul.f32 2.0, %v2262_v13  ;;  %v2247_v30 = vsel %vm2244_vm6, %v2246_v23, %v2242_v56  ;;  %vm2199_vm9 = vcmp.eq.f32.partialorder %v2198_v48, 8.507059e+37 }
 0x599   :  { %v2310_v12 = vmul.f32 2.0, %v2277_v34  ;;  %vm2214_vm5 = vcmp.eq.f32.partialorder %v2213_v15, 8.507059e+37  ;;  %v2202_v3 = vsel %vm2199_vm9, %v2201_v17, %v2197_v55  ;;  %v2282_v38 = vmul.f32 %v4403_v9, %v2281_v54 }
 0x59a   :  { %v2417_v24 = vadd.f32 -1.0, %v2309_v33  ;;  %v2217_v50 = vsel %vm2214_vm5, %v2216_v41, %v2212_v11  ;;  %v2313_v31 = vmul.f32 %v2232_v14, %v4290_v59  ;;  %v2297_v47 = vmul.f32 %v4426_v58, %v2296_v37 }
 0x59b   :  { %v2418_v62 = vadd.f32 -1.0, %v2310_v12  ;;  %v2314_v44 = vmul.f32 %v2247_v30, %v4292_v36  ;;  %vm2285_vm13 = vweird.f32 %v4403_v9  ;;  %v2283_v42 = vadd.f32 %v4403_v9, %v2282_v38 }
 0x59c   :  { %v2315_v57 = vmul.f32 %v2417_v24, %v2202_v3  ;;  %v2298_v48 = vadd.f32 %v4426_v58, %v2297_v47  ;;  %vm2300_vm14 = vweird.f32 %v4426_v58  ;;  %vm2284_vm10 = vweird.f32 %v4362_v53 }
 0x59d   :  { %v2316_v27 = vmul.f32 %v2418_v62, %v2217_v50  ;;  %v2290_v59 = vand.u32 2147483648, %v4362_v53  ;;  %v2305_v16 = vand.u32 2147483648, %v4378_v40  ;;  %vm2286_vm15 = vmor %vm2284_vm10, %vm2285_vm13  ;;  %v2288_v36 = vand.u32 2147483647, %v4362_v53 }
 0x59e   :  { %v2317_v39 = vadd.f32 %v2315_v57, %v2313_v31  ;;  %vm2299_vm11 = vweird.f32 %v4378_v40  ;;  %v2303_v20 = vand.u32 2147483647, %v4378_v40  ;;  %v2287_v1 = vsel %vm2286_vm15, %v4403_v9, %v2283_v42 }
 0x59f   :  { %v2318_v61 = vadd.f32 %v2316_v27, %v2314_v44  ;;  %vm2301_vm0 = vmor %vm2299_vm11, %vm2300_vm14  ;;  %v2291_v43 = vor.u32 1.1754944e-38, %v2290_v59  ;;  %v2306_v60 = vor.u32 1.1754944e-38, %v2305_v16  ;;  %vm2289_vm2 = vcmp.eq.f32.partialorder %v2288_v36, 8.507059e+37 }
 0x5a0   :  { %2706 = vtanh.f32 %v2317_v39  ;;  %v2302_v25 = vsel %vm2301_vm0, %v4426_v58, %v2298_v48  ;;  %vm2304_vm8 = vcmp.eq.f32.partialorder %v2303_v20, 8.507059e+37  ;;  %vm2333_vm1 = vcmask 1024  }
 0x5a1   :  { %2708 = vtanh.f32 %v2318_v61  ;;  %v2292_v19 = vsel %vm2289_vm2, %v2291_v43, %v2287_v1  ;;  %v2307_v45 = vsel %vm2304_vm8, %v2306_v60, %v2302_v25 }
 0x5a6   :  { %v2707_v52 = vpop.eup %2706 }
 0x5a7   :  { %v2709_v35 = vpop.eup %2708  ;;  %v2321_v26 = vmul.f32 %v2707_v52, %v2292_v19 }
 0x5a8   :  { %v2322_v5 = vmul.f32 %v2709_v35, %v2307_v45 }
 0x5a9   :  { %v2323_v22 = vmul.f32 %v2321_v26, %v3004_v32 }
 0x5aa   :  { %v2324_v53 = vmul.f32 %v2322_v5, %v3004_v32 }
 0x5ac   :  { %v2327_v40 = vrot.slane %v2324_v53, 7 }
 0x5ae   :  { %v2328_v2 = vsel %vm898_vm3, %v2327_v40, %v2323_v22 }
 0x5af   :  { %v2330_v9 = vsel %vm901_vm4, %v2328_v2, 0.0 }
 0x5b0   :  { %2331 = vadd.xlane.f32.xlu2 %v2330_v9 }
 0x623   :  { %v2332_v63 = vpop.xlane.xlu2 %2331 }
 0x624   :  { %2334 = vst.msk [vmem:[%s4509_s2] sm:$0x3] %vm2333_vm1, %v2332_v63 }

</bundles_post_ra>
